<compile_context>
chip_gen: v6e
topology: v6e:2x2x1
jax: 0.10.0
libtpu: 0.0.40
codegen_flags: <defaults>
</compile_context>

<pallas_src>
import functools

import jax
import jax.numpy as jnp
import numpy as np
from jax import lax
from jax.experimental import pallas as pl
from jax.experimental.pallas import tpu as pltpu


def _round_up(a, m):
    return ((a + m - 1) // m) * m


def _largest_divisor(n, cap):
    for d in range(min(n, cap), 0, -1):
        if n % d == 0:
            return d
    return 1


def _recurrent_kernel(gx_ref, alpha_ref, whh_ref, h0_ref, c0_ref,
                      out_ref, hT_ref, cT_ref,
                      h_sc, c_sc,
                      *, s_count, hp, t_block):
    """Grid = (batch blocks [parallel], time blocks [serial]).

    gx_ref    : (Tblk, Bblk, 4*S*Hp)  precomputed x@W_ih + bias (gate-major i,f,o,g)
    alpha_ref : (Tblk, Bblk, S*Hp)    attention weights pre-broadcast over Hp lanes
    whh_ref   : (Hp, 4*S*Hp)          fused recurrent weight (bf16)
    h_sc/c_sc : (Bblk, Hp) f32        recurrent state carried across time blocks
    """
    t_blk = pl.program_id(1)

    @pl.when(t_blk == 0)
    def _():
        h_sc[...] = h0_ref[...]
        c_sc[...] = c0_ref[...]

    whh = whh_ref[...]               # resident for the whole block
    sh = s_count * hp

    def step(t, carry):
        h, c = carry                                              # (Bblk, Hp) f32
        # Single fused MXU matmul for all S cells & all 4 gates (bf16 in, f32 acc).
        gates = gx_ref[t] + jnp.dot(h.astype(whh.dtype), whh,
                                    preferred_element_type=jnp.float32)
        # Gate-major lane layout: [i(SH) | f(SH) | o(SH) | g(SH)], all 128-aligned.
        ifo = jax.nn.sigmoid(gates[:, :3 * sh])
        g_all = jnp.tanh(gates[:, 3 * sh:])
        i_all = ifo[:, 0 * sh:1 * sh]
        f_all = ifo[:, 1 * sh:2 * sh]
        o_all = ifo[:, 2 * sh:3 * sh]

        c_rep = jnp.concatenate([c] * s_count, axis=1)            # (Bblk, S*Hp)
        c_all = f_all * c_rep + i_all * g_all                     # per-cell c_{t,s}
        h_all = o_all * jnp.tanh(c_all)                           # per-cell h_{t,s}

        # Attention-weighted mix over the S cells (alpha pre-broadcast over lanes).
        a = alpha_ref[t]                                          # (Bblk, S*Hp)
        hw = a * h_all
        cw = a * c_all
        new_h = hw[:, 0:hp]
        new_c = cw[:, 0:hp]
        for s in range(1, s_count):
            new_h = new_h + hw[:, s * hp:(s + 1) * hp]
            new_c = new_c + cw[:, s * hp:(s + 1) * hp]

        out_ref[t] = new_h                                        # lane-dense (Bblk, Hp)
        return new_h, new_c

    h, c = lax.fori_loop(0, t_block, step, (h_sc[...], c_sc[...]),
                         unroll=t_block <= 16)
    h_sc[...] = h
    c_sc[...] = c

    @pl.when(t_blk == pl.num_programs(1) - 1)
    def _():
        hT_ref[...] = h
        cT_ref[...] = c


def _pack_params(params, hidden_size, second_order_size, hp, matmul_dtype):
    """Convert PyTorch-layout params into the fused, padded kernel layout.

    Gate order is remapped from PyTorch [i, f, g, o] to [i, f, o, g] and laid out
    gate-major / s-minor / Hp-inner along the fused output axis.
    """
    H, S, Hp = hidden_size, second_order_size, hp
    perm = jnp.array([0, 1, 3, 2])          # i,f,g,o -> i,f,o,g
    wih, whh, bias = params["wih"], params["whh"], params["bias"]
    E = wih.shape[1]

    wih4 = wih.reshape(S, E, 4, H)[:, :, perm, :]
    wih4 = jnp.pad(wih4, ((0, 0), (0, 0), (0, 0), (0, Hp - H)))
    wx_all = jnp.transpose(wih4, (1, 2, 0, 3)).reshape(E, 4 * S * Hp)

    b4 = bias.reshape(S, 4, H)[:, perm, :]
    b4 = jnp.pad(b4, ((0, 0), (0, 0), (0, Hp - H)))
    b_all = jnp.transpose(b4, (1, 0, 2)).reshape(4 * S * Hp)

    whh4 = whh.reshape(S, H, 4, H)[:, :, perm, :]
    whh4 = jnp.pad(whh4, ((0, 0), (0, Hp - H), (0, 0), (0, Hp - H)))
    whh_all = (jnp.transpose(whh4, (1, 2, 0, 3))
               .reshape(Hp, 4 * S * Hp).astype(matmul_dtype))

    return {"watt": params["watt"], "wx_all": wx_all, "b_all": b_all,
            "whh_all": whh_all}


def attention_second_order_lstm(x_bte, temperature, params, lstm_states=None,
                                matmul_dtype=jnp.bfloat16):
    """x_bte: (B, T, E). Returns (outputs (B, T, H), (h_T, c_T))."""
    B, T, E = x_bte.shape
    S = params["watt"].shape[1]
    H = params["wih"].shape[2] // 4

    Hp = _round_up(H, 128)                      # lane-pad hidden size
    Bblk = min(_round_up(B, 8), 128)            # sublane-pad batch, block it
    Bp = _round_up(B, Bblk)
    Tblk = _largest_divisor(T, 32)              # time-block to amortize grid overhead
    G = 4 * S * Hp
    SH = S * Hp

    pk = _pack_params(params, H, S, Hp, matmul_dtype)

    if lstm_states is None:
        h0 = jnp.zeros((B, H), jnp.float32)
        c0 = jnp.zeros((B, H), jnp.float32)
    else:
        h0, c0 = lstm_states
    h0p = jnp.zeros((Bp, Hp), jnp.float32).at[:B, :H].set(h0.astype(jnp.float32))
    c0p = jnp.zeros((Bp, Hp), jnp.float32).at[:B, :H].set(c0.astype(jnp.float32))

    # ---- Hoisted, fully parallel projections (large MXU matmuls, done once). ----
    xf = x_bte.astype(jnp.float32)
    scores = jnp.einsum('bte,es->bts', xf, pk["watt"]) / temperature
    alpha = jax.nn.softmax(scores, axis=-1)                      # (B, T, S)
    alpha_tbs = jnp.transpose(alpha, (1, 0, 2))                  # (T, B, S)
    alpha_slab = jnp.repeat(alpha_tbs, Hp, axis=-1)              # (T, B, S*Hp)
    alpha_slab = jnp.pad(alpha_slab, ((0, 0), (0, Bp - B), (0, 0)))

    gx = jnp.einsum('bte,eg->tbg', xf, pk["wx_all"]) + pk["b_all"]   # (T, B, G)
    gx = jnp.pad(gx, ((0, 0), (0, Bp - B), (0, 0)))

    kernel = functools.partial(_recurrent_kernel, s_count=S, hp=Hp, t_block=Tblk)

    out_tbh, hT, cT = pl.pallas_call(
        kernel,
        out_shape=(
            jax.ShapeDtypeStruct((T, Bp, Hp), jnp.float32),
            jax.ShapeDtypeStruct((Bp, Hp), jnp.float32),
            jax.ShapeDtypeStruct((Bp, Hp), jnp.float32),
        ),
        grid_spec=pltpu.PrefetchScalarGridSpec(
            num_scalar_prefetch=0,
            grid=(Bp // Bblk, T // Tblk),
            in_specs=[
                pl.BlockSpec((Tblk, Bblk, G), lambda b, t: (t, b, 0)),    # gates_x
                pl.BlockSpec((Tblk, Bblk, SH), lambda b, t: (t, b, 0)),   # alpha slab
                pl.BlockSpec((Hp, G), lambda b, t: (0, 0)),               # fused W_hh
                pl.BlockSpec((Bblk, Hp), lambda b, t: (b, 0)),            # h0
                pl.BlockSpec((Bblk, Hp), lambda b, t: (b, 0)),            # c0
            ],
            out_specs=[
                pl.BlockSpec((Tblk, Bblk, Hp), lambda b, t: (t, b, 0)),   # outputs
                pl.BlockSpec((Bblk, Hp), lambda b, t: (b, 0)),            # h_T
                pl.BlockSpec((Bblk, Hp), lambda b, t: (b, 0)),            # c_T
            ],
            scratch_shapes=[
                pltpu.VMEM((Bblk, Hp), jnp.float32),                      # recurrent h
                pltpu.VMEM((Bblk, Hp), jnp.float32),                      # recurrent c
            ],
        ),
        compiler_params=pltpu.CompilerParams(
            # batch blocks independent (megacore-shardable); time is the recurrence.
            dimension_semantics=("parallel", "arbitrary")),
    )(gx, alpha_slab, pk["whh_all"], h0p, c0p)

    outs = jnp.transpose(out_tbh[:, :B, :H], (1, 0, 2)).astype(x_bte.dtype)
    return outs, (hT[:B, :H].astype(x_bte.dtype), cT[:B, :H].astype(x_bte.dtype))


def _reference(x_bte, temperature, params):
    """Pure-JAX f32 reference mirroring the PyTorch forward exactly."""
    watt, wih, whh, bias = params["watt"], params["wih"], params["whh"], params["bias"]
    B, T, E = x_bte.shape
    S, _, H4 = wih.shape
    H = H4 // 4
    h = jnp.zeros((B, H), x_bte.dtype)
    c = jnp.zeros((B, H), x_bte.dtype)
    outs = []
    for t in range(T):
        x = x_bte[:, t]
        alpha = jax.nn.softmax((x @ watt) / temperature, axis=1)
        new_h = jnp.zeros_like(h)
        new_c = jnp.zeros_like(c)
        for s in range(S):
            g = x @ wih[s] + h @ whh[s] + bias[s]
            i_g = jax.nn.sigmoid(g[:, 0 * H:1 * H])
            f_g = jax.nn.sigmoid(g[:, 1 * H:2 * H])
            g_g = jnp.tanh(g[:, 2 * H:3 * H])
            o_g = jax.nn.sigmoid(g[:, 3 * H:4 * H])
            c_s = f_g * c + i_g * g_g
            h_s = o_g * jnp.tanh(c_s)
            new_h = new_h + alpha[:, s:s + 1] * h_s
            new_c = new_c + alpha[:, s:s + 1] * c_s
        h, c = new_h, new_c
        outs.append(h)
    return jnp.stack(outs, axis=1), (h, c)


def init_params(key, second_order_size, input_size, hidden_size):
    """Deterministic synthetic params. LSTMCell-style uniform(-1/sqrt(H), 1/sqrt(H)).
    Stored pre-transposed (y = x @ W) in PyTorch gate order [i, f, g, o]."""
    k = 1.0 / np.sqrt(hidden_size)
    keys = jax.random.split(key, 6)
    S, E, H = second_order_size, input_size, hidden_size
    watt = jax.random.uniform(keys[0], (E, S), jnp.float32, -k, k)
    wih = jax.random.uniform(keys[1], (S, E, 4 * H), jnp.float32, -k, k)
    whh = jax.random.uniform(keys[2], (S, H, 4 * H), jnp.float32, -k, k)
    b_ih = jax.random.uniform(keys[3], (S, 1, 4 * H), jnp.float32, -k, k)
    b_hh = jax.random.uniform(keys[4], (S, 1, 4 * H), jnp.float32, -k, k)
    return {"watt": watt, "wih": wih, "whh": whh, "bias": b_ih + b_hh}


if __name__ == "__main__":
    B, T, E, H, S = 2, 8, 16, 32, 3
    temperature = 0.7

    key = jax.random.PRNGKey(0)
    k_x, k_p = jax.random.split(key)
    x = jax.random.normal(k_x, (B, T, E), jnp.float32)
    params = init_params(k_p, S, E, H)

    outs, (hT, cT) = attention_second_order_lstm(x, temperature, params)
    outs = jax.block_until_ready(outs)
    hT = jax.block_until_ready(hT)
    cT = jax.block_until_ready(cT)

    ref_outs, (ref_h, ref_c) = _reference(x, temperature, params)
    # bf16 operands in the recurrent matmul (f32 accumulation / elementwise) =>
    # relaxed tolerance, as anticipated by the perf review.
    np.testing.assert_allclose(np.asarray(outs), np.asarray(ref_outs), atol=2e-2, rtol=2e-2)
    np.testing.assert_allclose(np.asarray(hT), np.asarray(ref_h), atol=2e-2, rtol=2e-2)
    np.testing.assert_allclose(np.asarray(cT), np.asarray(ref_c), atol=2e-2, rtol=2e-2)

    print("KERNEL_OK")
</pallas_src>

<mosaic_0001>
module attributes {stable_mosaic.version = 11 : i64} {
  func.func @_recurrent_kernel(%arg0: i32, %arg1: i32, %arg2: memref<8x8x1536xf32, #tpu.memory_space<vmem>>, %arg3: memref<8x8x384xf32, #tpu.memory_space<vmem>>, %arg4: memref<128x1536xbf16, #tpu.memory_space<vmem>>, %arg5: memref<8x128xf32, #tpu.memory_space<vmem>>, %arg6: memref<8x128xf32, #tpu.memory_space<vmem>>, %arg7: memref<8x8x128xf32, #tpu.memory_space<vmem>>, %arg8: memref<8x128xf32, #tpu.memory_space<vmem>>, %arg9: memref<8x128xf32, #tpu.memory_space<vmem>>, %arg10: memref<8x128xf32, #tpu.memory_space<vmem>>, %arg11: memref<8x128xf32, #tpu.memory_space<vmem>>) attributes {dimension_semantics = [#tpu.dimension_semantics<parallel>, #tpu.dimension_semantics<arbitrary>], iteration_bounds = array<i64: 1, 1>, scalar_prefetch = 0 : i64, scratch_operands = 2 : i64, tpu.core_type = #tpu.core_type<tc>, window_params = [{transform_indices = @transform_0, window_bounds = array<i64: 8, 8, 1536>}, {transform_indices = @transform_1, window_bounds = array<i64: 8, 8, 384>}, {pipeline_mode = #tpu.pipeline_mode<synchronous>, transform_indices = @transform_2, window_bounds = array<i64: 128, 1536>}, {transform_indices = @transform_3, window_bounds = array<i64: 8, 128>}, {transform_indices = @transform_4, window_bounds = array<i64: 8, 128>}, {transform_indices = @transform_5, window_bounds = array<i64: 8, 8, 128>}, {transform_indices = @transform_6, window_bounds = array<i64: 8, 128>}, {transform_indices = @transform_7, window_bounds = array<i64: 8, 128>}]} {
    %c0_i32 = arith.constant 0 : i32
    %0 = arith.cmpi eq, %arg1, %c0_i32 : i32
    %1 = arith.extui %0 : i1 to i32
    %c0_i32_0 = arith.constant 0 : i32
    %2 = arith.cmpi ne, %1, %c0_i32_0 : i32
    scf.if %2 {
      %c0_76 = arith.constant 0 : index
      %c0_77 = arith.constant 0 : index
      %347 = vector.load %arg5[%c0_76, %c0_77] : memref<8x128xf32, #tpu.memory_space<vmem>>, vector<8x128xf32>
      %c0_78 = arith.constant 0 : index
      %c0_79 = arith.constant 0 : index
      %348 = vector.load %arg10[%c0_78, %c0_79] : memref<8x128xf32, #tpu.memory_space<vmem>>, vector<8x128xf32>
      tpu.vector_store %arg10[%c0_78, %c0_79], %347 {strides = array<i32>} : memref<8x128xf32, #tpu.memory_space<vmem>>, vector<8x128xf32>,
      %c0_80 = arith.constant 0 : index
      %c0_81 = arith.constant 0 : index
      %349 = vector.load %arg6[%c0_80, %c0_81] : memref<8x128xf32, #tpu.memory_space<vmem>>, vector<8x128xf32>
      %c0_82 = arith.constant 0 : index
      %c0_83 = arith.constant 0 : index
      %350 = vector.load %arg11[%c0_82, %c0_83] : memref<8x128xf32, #tpu.memory_space<vmem>>, vector<8x128xf32>
      tpu.vector_store %arg11[%c0_82, %c0_83], %349 {strides = array<i32>} : memref<8x128xf32, #tpu.memory_space<vmem>>, vector<8x128xf32>,
    } else {
    }
    %c0 = arith.constant 0 : index
    %c0_1 = arith.constant 0 : index
    %3 = vector.load %arg4[%c0, %c0_1] : memref<128x1536xbf16, #tpu.memory_space<vmem>>, vector<128x1536xbf16>
    %c0_2 = arith.constant 0 : index
    %c0_3 = arith.constant 0 : index
    %4 = vector.load %arg10[%c0_2, %c0_3] : memref<8x128xf32, #tpu.memory_space<vmem>>, vector<8x128xf32>
    %c0_4 = arith.constant 0 : index
    %c0_5 = arith.constant 0 : index
    %5 = vector.load %arg11[%c0_4, %c0_5] : memref<8x128xf32, #tpu.memory_space<vmem>>, vector<8x128xf32>
    %c0_i32_6 = arith.constant 0 : i32
    %6 = arith.index_cast %c0_i32_6 : i32 to index
    %c0_7 = arith.constant 0 : index
    %c0_8 = arith.constant 0 : index
    %7 = vector.load %arg2[%6, %c0_7, %c0_8] : memref<8x8x1536xf32, #tpu.memory_space<vmem>>, vector<1x8x1536xf32>
    %8 = vector.shape_cast %7 : vector<1x8x1536xf32> to vector<8x1536xf32>
    %9 = arith.truncf %4 : vector<8x128xf32> to vector<8x128xbf16>
    %cst = arith.constant dense<0.000000e+00> : vector<8x1536xf32>
    %10 = tpu.matmul %9, %3, %cst {dimension_numbers = #tpu.dot_dimension_numbers<[1], [0], [0], [1], [0, 0, 1, 1], [], []>} : vector<8x128xbf16>, vector<128x1536xbf16>, vector<8x1536xf32> -> vector<8x1536xf32>
    %11 = arith.addf %8, %10 : vector<8x1536xf32>
    %12 = vector.extract_strided_slice %11 {offsets = [0, 0], sizes = [8, 1152], strides = [1, 1]} : vector<8x1536xf32> to vector<8x1152xf32>
    %13 = arith.negf %12 : vector<8x1152xf32>
    %14 = math.exp %13 : vector<8x1152xf32>
    %cst_9 = arith.constant 1.000000e+00 : f32
    %15 = vector.broadcast %cst_9 : f32 to vector<8x1152xf32>
    %16 = arith.addf %15, %14 : vector<8x1152xf32>
    %17 = arith.divf %15, %16 : vector<8x1152xf32>
    %18 = vector.extract_strided_slice %11 {offsets = [0, 1152], sizes = [8, 384], strides = [1, 1]} : vector<8x1536xf32> to vector<8x384xf32>
    %19 = math.tanh %18 : vector<8x384xf32>
    %20 = vector.extract_strided_slice %17 {offsets = [0, 0], sizes = [8, 384], strides = [1, 1]} : vector<8x1152xf32> to vector<8x384xf32>
    %21 = vector.extract_strided_slice %17 {offsets = [0, 384], sizes = [8, 384], strides = [1, 1]} : vector<8x1152xf32> to vector<8x384xf32>
    %22 = vector.extract_strided_slice %17 {offsets = [0, 768], sizes = [8, 384], strides = [1, 1]} : vector<8x1152xf32> to vector<8x384xf32>
    %23 = tpu.concatenate %5, %5, %5 in 1 : vector<8x128xf32>, vector<8x128xf32>, vector<8x128xf32> -> vector<8x384xf32>
    %24 = arith.mulf %21, %23 : vector<8x384xf32>
    %25 = arith.mulf %20, %19 : vector<8x384xf32>
    %26 = arith.addf %24, %25 : vector<8x384xf32>
    %27 = math.tanh %26 : vector<8x384xf32>
    %28 = arith.mulf %22, %27 : vector<8x384xf32>
    %29 = arith.index_cast %c0_i32_6 : i32 to index
    %c0_10 = arith.constant 0 : index
    %c0_11 = arith.constant 0 : index
    %30 = vector.load %arg3[%29, %c0_10, %c0_11] : memref<8x8x384xf32, #tpu.memory_space<vmem>>, vector<1x8x384xf32>
    %31 = vector.shape_cast %30 : vector<1x8x384xf32> to vector<8x384xf32>
    %32 = arith.mulf %31, %28 : vector<8x384xf32>
    %33 = arith.mulf %31, %26 : vector<8x384xf32>
    %34 = vector.extract_strided_slice %32 {offsets = [0, 0], sizes = [8, 128], strides = [1, 1]} : vector<8x384xf32> to vector<8x128xf32>
    %35 = vector.extract_strided_slice %33 {offsets = [0, 0], sizes = [8, 128], strides = [1, 1]} : vector<8x384xf32> to vector<8x128xf32>
    %36 = vector.extract_strided_slice %32 {offsets = [0, 128], sizes = [8, 128], strides = [1, 1]} : vector<8x384xf32> to vector<8x128xf32>
    %37 = arith.addf %34, %36 : vector<8x128xf32>
    %38 = vector.extract_strided_slice %33 {offsets = [0, 128], sizes = [8, 128], strides = [1, 1]} : vector<8x384xf32> to vector<8x128xf32>
    %39 = arith.addf %35, %38 : vector<8x128xf32>
    %40 = vector.extract_strided_slice %32 {offsets = [0, 256], sizes = [8, 128], strides = [1, 1]} : vector<8x384xf32> to vector<8x128xf32>
    %41 = arith.addf %37, %40 : vector<8x128xf32>
    %42 = vector.extract_strided_slice %33 {offsets = [0, 256], sizes = [8, 128], strides = [1, 1]} : vector<8x384xf32> to vector<8x128xf32>
    %43 = arith.addf %39, %42 : vector<8x128xf32>
    %44 = arith.index_cast %c0_i32_6 : i32 to index
    %c0_12 = arith.constant 0 : index
    %c0_13 = arith.constant 0 : index
    %45 = vector.load %arg7[%44, %c0_12, %c0_13] : memref<8x8x128xf32, #tpu.memory_space<vmem>>, vector<1x8x128xf32>
    %46 = vector.shape_cast %45 : vector<1x8x128xf32> to vector<8x128xf32>
    %47 = vector.shape_cast %41 : vector<8x128xf32> to vector<1x8x128xf32>
    tpu.vector_store %arg7[%44, %c0_12, %c0_13], %47 {strides = array<i32>} : memref<8x8x128xf32, #tpu.memory_space<vmem>>, vector<1x8x128xf32>,
    %c1_i32 = arith.constant 1 : i32
    %48 = arith.index_cast %c1_i32 : i32 to index
    %c0_14 = arith.constant 0 : index
    %c0_15 = arith.constant 0 : index
    %49 = vector.load %arg2[%48, %c0_14, %c0_15] : memref<8x8x1536xf32, #tpu.memory_space<vmem>>, vector<1x8x1536xf32>
    %50 = vector.shape_cast %49 : vector<1x8x1536xf32> to vector<8x1536xf32>
    %51 = arith.truncf %41 : vector<8x128xf32> to vector<8x128xbf16>
    %cst_16 = arith.constant dense<0.000000e+00> : vector<8x1536xf32>
    %52 = tpu.matmul %51, %3, %cst_16 {dimension_numbers = #tpu.dot_dimension_numbers<[1], [0], [0], [1], [0, 0, 1, 1], [], []>} : vector<8x128xbf16>, vector<128x1536xbf16>, vector<8x1536xf32> -> vector<8x1536xf32>
    %53 = arith.addf %50, %52 : vector<8x1536xf32>
    %54 = vector.extract_strided_slice %53 {offsets = [0, 0], sizes = [8, 1152], strides = [1, 1]} : vector<8x1536xf32> to vector<8x1152xf32>
    %55 = arith.negf %54 : vector<8x1152xf32>
    %56 = math.exp %55 : vector<8x1152xf32>
    %cst_17 = arith.constant 1.000000e+00 : f32
    %57 = vector.broadcast %cst_17 : f32 to vector<8x1152xf32>
    %58 = arith.addf %57, %56 : vector<8x1152xf32>
    %59 = arith.divf %57, %58 : vector<8x1152xf32>
    %60 = vector.extract_strided_slice %53 {offsets = [0, 1152], sizes = [8, 384], strides = [1, 1]} : vector<8x1536xf32> to vector<8x384xf32>
    %61 = math.tanh %60 : vector<8x384xf32>
    %62 = vector.extract_strided_slice %59 {offsets = [0, 0], sizes = [8, 384], strides = [1, 1]} : vector<8x1152xf32> to vector<8x384xf32>
    %63 = vector.extract_strided_slice %59 {offsets = [0, 384], sizes = [8, 384], strides = [1, 1]} : vector<8x1152xf32> to vector<8x384xf32>
    %64 = vector.extract_strided_slice %59 {offsets = [0, 768], sizes = [8, 384], strides = [1, 1]} : vector<8x1152xf32> to vector<8x384xf32>
    %65 = tpu.concatenate %43, %43, %43 in 1 : vector<8x128xf32>, vector<8x128xf32>, vector<8x128xf32> -> vector<8x384xf32>
    %66 = arith.mulf %63, %65 : vector<8x384xf32>
    %67 = arith.mulf %62, %61 : vector<8x384xf32>
    %68 = arith.addf %66, %67 : vector<8x384xf32>
    %69 = math.tanh %68 : vector<8x384xf32>
    %70 = arith.mulf %64, %69 : vector<8x384xf32>
    %71 = arith.index_cast %c1_i32 : i32 to index
    %c0_18 = arith.constant 0 : index
    %c0_19 = arith.constant 0 : index
    %72 = vector.load %arg3[%71, %c0_18, %c0_19] : memref<8x8x384xf32, #tpu.memory_space<vmem>>, vector<1x8x384xf32>
    %73 = vector.shape_cast %72 : vector<1x8x384xf32> to vector<8x384xf32>
    %74 = arith.mulf %73, %70 : vector<8x384xf32>
    %75 = arith.mulf %73, %68 : vector<8x384xf32>
    %76 = vector.extract_strided_slice %74 {offsets = [0, 0], sizes = [8, 128], strides = [1, 1]} : vector<8x384xf32> to vector<8x128xf32>
    %77 = vector.extract_strided_slice %75 {offsets = [0, 0], sizes = [8, 128], strides = [1, 1]} : vector<8x384xf32> to vector<8x128xf32>
    %78 = vector.extract_strided_slice %74 {offsets = [0, 128], sizes = [8, 128], strides = [1, 1]} : vector<8x384xf32> to vector<8x128xf32>
    %79 = arith.addf %76, %78 : vector<8x128xf32>
    %80 = vector.extract_strided_slice %75 {offsets = [0, 128], sizes = [8, 128], strides = [1, 1]} : vector<8x384xf32> to vector<8x128xf32>
    %81 = arith.addf %77, %80 : vector<8x128xf32>
    %82 = vector.extract_strided_slice %74 {offsets = [0, 256], sizes = [8, 128], strides = [1, 1]} : vector<8x384xf32> to vector<8x128xf32>
    %83 = arith.addf %79, %82 : vector<8x128xf32>
    %84 = vector.extract_strided_slice %75 {offsets = [0, 256], sizes = [8, 128], strides = [1, 1]} : vector<8x384xf32> to vector<8x128xf32>
    %85 = arith.addf %81, %84 : vector<8x128xf32>
    %86 = arith.index_cast %c1_i32 : i32 to index
    %c0_20 = arith.constant 0 : index
    %c0_21 = arith.constant 0 : index
    %87 = vector.load %arg7[%86, %c0_20, %c0_21] : memref<8x8x128xf32, #tpu.memory_space<vmem>>, vector<1x8x128xf32>
    %88 = vector.shape_cast %87 : vector<1x8x128xf32> to vector<8x128xf32>
    %89 = vector.shape_cast %83 : vector<8x128xf32> to vector<1x8x128xf32>
    tpu.vector_store %arg7[%86, %c0_20, %c0_21], %89 {strides = array<i32>} : memref<8x8x128xf32, #tpu.memory_space<vmem>>, vector<1x8x128xf32>,
    %c2_i32 = arith.constant 2 : i32
    %90 = arith.index_cast %c2_i32 : i32 to index
    %c0_22 = arith.constant 0 : index
    %c0_23 = arith.constant 0 : index
    %91 = vector.load %arg2[%90, %c0_22, %c0_23] : memref<8x8x1536xf32, #tpu.memory_space<vmem>>, vector<1x8x1536xf32>
    %92 = vector.shape_cast %91 : vector<1x8x1536xf32> to vector<8x1536xf32>
    %93 = arith.truncf %83 : vector<8x128xf32> to vector<8x128xbf16>
    %cst_24 = arith.constant dense<0.000000e+00> : vector<8x1536xf32>
    %94 = tpu.matmul %93, %3, %cst_24 {dimension_numbers = #tpu.dot_dimension_numbers<[1], [0], [0], [1], [0, 0, 1, 1], [], []>} : vector<8x128xbf16>, vector<128x1536xbf16>, vector<8x1536xf32> -> vector<8x1536xf32>
    %95 = arith.addf %92, %94 : vector<8x1536xf32>
    %96 = vector.extract_strided_slice %95 {offsets = [0, 0], sizes = [8, 1152], strides = [1, 1]} : vector<8x1536xf32> to vector<8x1152xf32>
    %97 = arith.negf %96 : vector<8x1152xf32>
    %98 = math.exp %97 : vector<8x1152xf32>
    %cst_25 = arith.constant 1.000000e+00 : f32
    %99 = vector.broadcast %cst_25 : f32 to vector<8x1152xf32>
    %100 = arith.addf %99, %98 : vector<8x1152xf32>
    %101 = arith.divf %99, %100 : vector<8x1152xf32>
    %102 = vector.extract_strided_slice %95 {offsets = [0, 1152], sizes = [8, 384], strides = [1, 1]} : vector<8x1536xf32> to vector<8x384xf32>
    %103 = math.tanh %102 : vector<8x384xf32>
    %104 = vector.extract_strided_slice %101 {offsets = [0, 0], sizes = [8, 384], strides = [1, 1]} : vector<8x1152xf32> to vector<8x384xf32>
    %105 = vector.extract_strided_slice %101 {offsets = [0, 384], sizes = [8, 384], strides = [1, 1]} : vector<8x1152xf32> to vector<8x384xf32>
    %106 = vector.extract_strided_slice %101 {offsets = [0, 768], sizes = [8, 384], strides = [1, 1]} : vector<8x1152xf32> to vector<8x384xf32>
    %107 = tpu.concatenate %85, %85, %85 in 1 : vector<8x128xf32>, vector<8x128xf32>, vector<8x128xf32> -> vector<8x384xf32>
    %108 = arith.mulf %105, %107 : vector<8x384xf32>
    %109 = arith.mulf %104, %103 : vector<8x384xf32>
    %110 = arith.addf %108, %109 : vector<8x384xf32>
    %111 = math.tanh %110 : vector<8x384xf32>
    %112 = arith.mulf %106, %111 : vector<8x384xf32>
    %113 = arith.index_cast %c2_i32 : i32 to index
    %c0_26 = arith.constant 0 : index
    %c0_27 = arith.constant 0 : index
    %114 = vector.load %arg3[%113, %c0_26, %c0_27] : memref<8x8x384xf32, #tpu.memory_space<vmem>>, vector<1x8x384xf32>
    %115 = vector.shape_cast %114 : vector<1x8x384xf32> to vector<8x384xf32>
    %116 = arith.mulf %115, %112 : vector<8x384xf32>
    %117 = arith.mulf %115, %110 : vector<8x384xf32>
    %118 = vector.extract_strided_slice %116 {offsets = [0, 0], sizes = [8, 128], strides = [1, 1]} : vector<8x384xf32> to vector<8x128xf32>
    %119 = vector.extract_strided_slice %117 {offsets = [0, 0], sizes = [8, 128], strides = [1, 1]} : vector<8x384xf32> to vector<8x128xf32>
    %120 = vector.extract_strided_slice %116 {offsets = [0, 128], sizes = [8, 128], strides = [1, 1]} : vector<8x384xf32> to vector<8x128xf32>
    %121 = arith.addf %118, %120 : vector<8x128xf32>
    %122 = vector.extract_strided_slice %117 {offsets = [0, 128], sizes = [8, 128], strides = [1, 1]} : vector<8x384xf32> to vector<8x128xf32>
    %123 = arith.addf %119, %122 : vector<8x128xf32>
    %124 = vector.extract_strided_slice %116 {offsets = [0, 256], sizes = [8, 128], strides = [1, 1]} : vector<8x384xf32> to vector<8x128xf32>
    %125 = arith.addf %121, %124 : vector<8x128xf32>
    %126 = vector.extract_strided_slice %117 {offsets = [0, 256], sizes = [8, 128], strides = [1, 1]} : vector<8x384xf32> to vector<8x128xf32>
    %127 = arith.addf %123, %126 : vector<8x128xf32>
    %128 = arith.index_cast %c2_i32 : i32 to index
    %c0_28 = arith.constant 0 : index
    %c0_29 = arith.constant 0 : index
    %129 = vector.load %arg7[%128, %c0_28, %c0_29] : memref<8x8x128xf32, #tpu.memory_space<vmem>>, vector<1x8x128xf32>
    %130 = vector.shape_cast %129 : vector<1x8x128xf32> to vector<8x128xf32>
    %131 = vector.shape_cast %125 : vector<8x128xf32> to vector<1x8x128xf32>
    tpu.vector_store %arg7[%128, %c0_28, %c0_29], %131 {strides = array<i32>} : memref<8x8x128xf32, #tpu.memory_space<vmem>>, vector<1x8x128xf32>,
    %c3_i32 = arith.constant 3 : i32
    %132 = arith.index_cast %c3_i32 : i32 to index
    %c0_30 = arith.constant 0 : index
    %c0_31 = arith.constant 0 : index
    %133 = vector.load %arg2[%132, %c0_30, %c0_31] : memref<8x8x1536xf32, #tpu.memory_space<vmem>>, vector<1x8x1536xf32>
    %134 = vector.shape_cast %133 : vector<1x8x1536xf32> to vector<8x1536xf32>
    %135 = arith.truncf %125 : vector<8x128xf32> to vector<8x128xbf16>
    %cst_32 = arith.constant dense<0.000000e+00> : vector<8x1536xf32>
    %136 = tpu.matmul %135, %3, %cst_32 {dimension_numbers = #tpu.dot_dimension_numbers<[1], [0], [0], [1], [0, 0, 1, 1], [], []>} : vector<8x128xbf16>, vector<128x1536xbf16>, vector<8x1536xf32> -> vector<8x1536xf32>
    %137 = arith.addf %134, %136 : vector<8x1536xf32>
    %138 = vector.extract_strided_slice %137 {offsets = [0, 0], sizes = [8, 1152], strides = [1, 1]} : vector<8x1536xf32> to vector<8x1152xf32>
    %139 = arith.negf %138 : vector<8x1152xf32>
    %140 = math.exp %139 : vector<8x1152xf32>
    %cst_33 = arith.constant 1.000000e+00 : f32
    %141 = vector.broadcast %cst_33 : f32 to vector<8x1152xf32>
    %142 = arith.addf %141, %140 : vector<8x1152xf32>
    %143 = arith.divf %141, %142 : vector<8x1152xf32>
    %144 = vector.extract_strided_slice %137 {offsets = [0, 1152], sizes = [8, 384], strides = [1, 1]} : vector<8x1536xf32> to vector<8x384xf32>
    %145 = math.tanh %144 : vector<8x384xf32>
    %146 = vector.extract_strided_slice %143 {offsets = [0, 0], sizes = [8, 384], strides = [1, 1]} : vector<8x1152xf32> to vector<8x384xf32>
    %147 = vector.extract_strided_slice %143 {offsets = [0, 384], sizes = [8, 384], strides = [1, 1]} : vector<8x1152xf32> to vector<8x384xf32>
    %148 = vector.extract_strided_slice %143 {offsets = [0, 768], sizes = [8, 384], strides = [1, 1]} : vector<8x1152xf32> to vector<8x384xf32>
    %149 = tpu.concatenate %127, %127, %127 in 1 : vector<8x128xf32>, vector<8x128xf32>, vector<8x128xf32> -> vector<8x384xf32>
    %150 = arith.mulf %147, %149 : vector<8x384xf32>
    %151 = arith.mulf %146, %145 : vector<8x384xf32>
    %152 = arith.addf %150, %151 : vector<8x384xf32>
    %153 = math.tanh %152 : vector<8x384xf32>
    %154 = arith.mulf %148, %153 : vector<8x384xf32>
    %155 = arith.index_cast %c3_i32 : i32 to index
    %c0_34 = arith.constant 0 : index
    %c0_35 = arith.constant 0 : index
    %156 = vector.load %arg3[%155, %c0_34, %c0_35] : memref<8x8x384xf32, #tpu.memory_space<vmem>>, vector<1x8x384xf32>
    %157 = vector.shape_cast %156 : vector<1x8x384xf32> to vector<8x384xf32>
    %158 = arith.mulf %157, %154 : vector<8x384xf32>
    %159 = arith.mulf %157, %152 : vector<8x384xf32>
    %160 = vector.extract_strided_slice %158 {offsets = [0, 0], sizes = [8, 128], strides = [1, 1]} : vector<8x384xf32> to vector<8x128xf32>
    %161 = vector.extract_strided_slice %159 {offsets = [0, 0], sizes = [8, 128], strides = [1, 1]} : vector<8x384xf32> to vector<8x128xf32>
    %162 = vector.extract_strided_slice %158 {offsets = [0, 128], sizes = [8, 128], strides = [1, 1]} : vector<8x384xf32> to vector<8x128xf32>
    %163 = arith.addf %160, %162 : vector<8x128xf32>
    %164 = vector.extract_strided_slice %159 {offsets = [0, 128], sizes = [8, 128], strides = [1, 1]} : vector<8x384xf32> to vector<8x128xf32>
    %165 = arith.addf %161, %164 : vector<8x128xf32>
    %166 = vector.extract_strided_slice %158 {offsets = [0, 256], sizes = [8, 128], strides = [1, 1]} : vector<8x384xf32> to vector<8x128xf32>
    %167 = arith.addf %163, %166 : vector<8x128xf32>
    %168 = vector.extract_strided_slice %159 {offsets = [0, 256], sizes = [8, 128], strides = [1, 1]} : vector<8x384xf32> to vector<8x128xf32>
    %169 = arith.addf %165, %168 : vector<8x128xf32>
    %170 = arith.index_cast %c3_i32 : i32 to index
    %c0_36 = arith.constant 0 : index
    %c0_37 = arith.constant 0 : index
    %171 = vector.load %arg7[%170, %c0_36, %c0_37] : memref<8x8x128xf32, #tpu.memory_space<vmem>>, vector<1x8x128xf32>
    %172 = vector.shape_cast %171 : vector<1x8x128xf32> to vector<8x128xf32>
    %173 = vector.shape_cast %167 : vector<8x128xf32> to vector<1x8x128xf32>
    tpu.vector_store %arg7[%170, %c0_36, %c0_37], %173 {strides = array<i32>} : memref<8x8x128xf32, #tpu.memory_space<vmem>>, vector<1x8x128xf32>,
    %c4_i32 = arith.constant 4 : i32
    %174 = arith.index_cast %c4_i32 : i32 to index
    %c0_38 = arith.constant 0 : index
    %c0_39 = arith.constant 0 : index
    %175 = vector.load %arg2[%174, %c0_38, %c0_39] : memref<8x8x1536xf32, #tpu.memory_space<vmem>>, vector<1x8x1536xf32>
    %176 = vector.shape_cast %175 : vector<1x8x1536xf32> to vector<8x1536xf32>
    %177 = arith.truncf %167 : vector<8x128xf32> to vector<8x128xbf16>
    %cst_40 = arith.constant dense<0.000000e+00> : vector<8x1536xf32>
    %178 = tpu.matmul %177, %3, %cst_40 {dimension_numbers = #tpu.dot_dimension_numbers<[1], [0], [0], [1], [0, 0, 1, 1], [], []>} : vector<8x128xbf16>, vector<128x1536xbf16>, vector<8x1536xf32> -> vector<8x1536xf32>
    %179 = arith.addf %176, %178 : vector<8x1536xf32>
    %180 = vector.extract_strided_slice %179 {offsets = [0, 0], sizes = [8, 1152], strides = [1, 1]} : vector<8x1536xf32> to vector<8x1152xf32>
    %181 = arith.negf %180 : vector<8x1152xf32>
    %182 = math.exp %181 : vector<8x1152xf32>
    %cst_41 = arith.constant 1.000000e+00 : f32
    %183 = vector.broadcast %cst_41 : f32 to vector<8x1152xf32>
    %184 = arith.addf %183, %182 : vector<8x1152xf32>
    %185 = arith.divf %183, %184 : vector<8x1152xf32>
    %186 = vector.extract_strided_slice %179 {offsets = [0, 1152], sizes = [8, 384], strides = [1, 1]} : vector<8x1536xf32> to vector<8x384xf32>
    %187 = math.tanh %186 : vector<8x384xf32>
    %188 = vector.extract_strided_slice %185 {offsets = [0, 0], sizes = [8, 384], strides = [1, 1]} : vector<8x1152xf32> to vector<8x384xf32>
    %189 = vector.extract_strided_slice %185 {offsets = [0, 384], sizes = [8, 384], strides = [1, 1]} : vector<8x1152xf32> to vector<8x384xf32>
    %190 = vector.extract_strided_slice %185 {offsets = [0, 768], sizes = [8, 384], strides = [1, 1]} : vector<8x1152xf32> to vector<8x384xf32>
    %191 = tpu.concatenate %169, %169, %169 in 1 : vector<8x128xf32>, vector<8x128xf32>, vector<8x128xf32> -> vector<8x384xf32>
    %192 = arith.mulf %189, %191 : vector<8x384xf32>
    %193 = arith.mulf %188, %187 : vector<8x384xf32>
    %194 = arith.addf %192, %193 : vector<8x384xf32>
    %195 = math.tanh %194 : vector<8x384xf32>
    %196 = arith.mulf %190, %195 : vector<8x384xf32>
    %197 = arith.index_cast %c4_i32 : i32 to index
    %c0_42 = arith.constant 0 : index
    %c0_43 = arith.constant 0 : index
    %198 = vector.load %arg3[%197, %c0_42, %c0_43] : memref<8x8x384xf32, #tpu.memory_space<vmem>>, vector<1x8x384xf32>
    %199 = vector.shape_cast %198 : vector<1x8x384xf32> to vector<8x384xf32>
    %200 = arith.mulf %199, %196 : vector<8x384xf32>
    %201 = arith.mulf %199, %194 : vector<8x384xf32>
    %202 = vector.extract_strided_slice %200 {offsets = [0, 0], sizes = [8, 128], strides = [1, 1]} : vector<8x384xf32> to vector<8x128xf32>
    %203 = vector.extract_strided_slice %201 {offsets = [0, 0], sizes = [8, 128], strides = [1, 1]} : vector<8x384xf32> to vector<8x128xf32>
    %204 = vector.extract_strided_slice %200 {offsets = [0, 128], sizes = [8, 128], strides = [1, 1]} : vector<8x384xf32> to vector<8x128xf32>
    %205 = arith.addf %202, %204 : vector<8x128xf32>
    %206 = vector.extract_strided_slice %201 {offsets = [0, 128], sizes = [8, 128], strides = [1, 1]} : vector<8x384xf32> to vector<8x128xf32>
    %207 = arith.addf %203, %206 : vector<8x128xf32>
    %208 = vector.extract_strided_slice %200 {offsets = [0, 256], sizes = [8, 128], strides = [1, 1]} : vector<8x384xf32> to vector<8x128xf32>
    %209 = arith.addf %205, %208 : vector<8x128xf32>
    %210 = vector.extract_strided_slice %201 {offsets = [0, 256], sizes = [8, 128], strides = [1, 1]} : vector<8x384xf32> to vector<8x128xf32>
    %211 = arith.addf %207, %210 : vector<8x128xf32>
    %212 = arith.index_cast %c4_i32 : i32 to index
    %c0_44 = arith.constant 0 : index
    %c0_45 = arith.constant 0 : index
    %213 = vector.load %arg7[%212, %c0_44, %c0_45] : memref<8x8x128xf32, #tpu.memory_space<vmem>>, vector<1x8x128xf32>
    %214 = vector.shape_cast %213 : vector<1x8x128xf32> to vector<8x128xf32>
    %215 = vector.shape_cast %209 : vector<8x128xf32> to vector<1x8x128xf32>
    tpu.vector_store %arg7[%212, %c0_44, %c0_45], %215 {strides = array<i32>} : memref<8x8x128xf32, #tpu.memory_space<vmem>>, vector<1x8x128xf32>,
    %c5_i32 = arith.constant 5 : i32
    %216 = arith.index_cast %c5_i32 : i32 to index
    %c0_46 = arith.constant 0 : index
    %c0_47 = arith.constant 0 : index
    %217 = vector.load %arg2[%216, %c0_46, %c0_47] : memref<8x8x1536xf32, #tpu.memory_space<vmem>>, vector<1x8x1536xf32>
    %218 = vector.shape_cast %217 : vector<1x8x1536xf32> to vector<8x1536xf32>
    %219 = arith.truncf %209 : vector<8x128xf32> to vector<8x128xbf16>
    %cst_48 = arith.constant dense<0.000000e+00> : vector<8x1536xf32>
    %220 = tpu.matmul %219, %3, %cst_48 {dimension_numbers = #tpu.dot_dimension_numbers<[1], [0], [0], [1], [0, 0, 1, 1], [], []>} : vector<8x128xbf16>, vector<128x1536xbf16>, vector<8x1536xf32> -> vector<8x1536xf32>
    %221 = arith.addf %218, %220 : vector<8x1536xf32>
    %222 = vector.extract_strided_slice %221 {offsets = [0, 0], sizes = [8, 1152], strides = [1, 1]} : vector<8x1536xf32> to vector<8x1152xf32>
    %223 = arith.negf %222 : vector<8x1152xf32>
    %224 = math.exp %223 : vector<8x1152xf32>
    %cst_49 = arith.constant 1.000000e+00 : f32
    %225 = vector.broadcast %cst_49 : f32 to vector<8x1152xf32>
    %226 = arith.addf %225, %224 : vector<8x1152xf32>
    %227 = arith.divf %225, %226 : vector<8x1152xf32>
    %228 = vector.extract_strided_slice %221 {offsets = [0, 1152], sizes = [8, 384], strides = [1, 1]} : vector<8x1536xf32> to vector<8x384xf32>
    %229 = math.tanh %228 : vector<8x384xf32>
    %230 = vector.extract_strided_slice %227 {offsets = [0, 0], sizes = [8, 384], strides = [1, 1]} : vector<8x1152xf32> to vector<8x384xf32>
    %231 = vector.extract_strided_slice %227 {offsets = [0, 384], sizes = [8, 384], strides = [1, 1]} : vector<8x1152xf32> to vector<8x384xf32>
    %232 = vector.extract_strided_slice %227 {offsets = [0, 768], sizes = [8, 384], strides = [1, 1]} : vector<8x1152xf32> to vector<8x384xf32>
    %233 = tpu.concatenate %211, %211, %211 in 1 : vector<8x128xf32>, vector<8x128xf32>, vector<8x128xf32> -> vector<8x384xf32>
    %234 = arith.mulf %231, %233 : vector<8x384xf32>
    %235 = arith.mulf %230, %229 : vector<8x384xf32>
    %236 = arith.addf %234, %235 : vector<8x384xf32>
    %237 = math.tanh %236 : vector<8x384xf32>
    %238 = arith.mulf %232, %237 : vector<8x384xf32>
    %239 = arith.index_cast %c5_i32 : i32 to index
    %c0_50 = arith.constant 0 : index
    %c0_51 = arith.constant 0 : index
    %240 = vector.load %arg3[%239, %c0_50, %c0_51] : memref<8x8x384xf32, #tpu.memory_space<vmem>>, vector<1x8x384xf32>
    %241 = vector.shape_cast %240 : vector<1x8x384xf32> to vector<8x384xf32>
    %242 = arith.mulf %241, %238 : vector<8x384xf32>
    %243 = arith.mulf %241, %236 : vector<8x384xf32>
    %244 = vector.extract_strided_slice %242 {offsets = [0, 0], sizes = [8, 128], strides = [1, 1]} : vector<8x384xf32> to vector<8x128xf32>
    %245 = vector.extract_strided_slice %243 {offsets = [0, 0], sizes = [8, 128], strides = [1, 1]} : vector<8x384xf32> to vector<8x128xf32>
    %246 = vector.extract_strided_slice %242 {offsets = [0, 128], sizes = [8, 128], strides = [1, 1]} : vector<8x384xf32> to vector<8x128xf32>
    %247 = arith.addf %244, %246 : vector<8x128xf32>
    %248 = vector.extract_strided_slice %243 {offsets = [0, 128], sizes = [8, 128], strides = [1, 1]} : vector<8x384xf32> to vector<8x128xf32>
    %249 = arith.addf %245, %248 : vector<8x128xf32>
    %250 = vector.extract_strided_slice %242 {offsets = [0, 256], sizes = [8, 128], strides = [1, 1]} : vector<8x384xf32> to vector<8x128xf32>
    %251 = arith.addf %247, %250 : vector<8x128xf32>
    %252 = vector.extract_strided_slice %243 {offsets = [0, 256], sizes = [8, 128], strides = [1, 1]} : vector<8x384xf32> to vector<8x128xf32>
    %253 = arith.addf %249, %252 : vector<8x128xf32>
    %254 = arith.index_cast %c5_i32 : i32 to index
    %c0_52 = arith.constant 0 : index
    %c0_53 = arith.constant 0 : index
    %255 = vector.load %arg7[%254, %c0_52, %c0_53] : memref<8x8x128xf32, #tpu.memory_space<vmem>>, vector<1x8x128xf32>
    %256 = vector.shape_cast %255 : vector<1x8x128xf32> to vector<8x128xf32>
    %257 = vector.shape_cast %251 : vector<8x128xf32> to vector<1x8x128xf32>
    tpu.vector_store %arg7[%254, %c0_52, %c0_53], %257 {strides = array<i32>} : memref<8x8x128xf32, #tpu.memory_space<vmem>>, vector<1x8x128xf32>,
    %c6_i32 = arith.constant 6 : i32
    %258 = arith.index_cast %c6_i32 : i32 to index
    %c0_54 = arith.constant 0 : index
    %c0_55 = arith.constant 0 : index
    %259 = vector.load %arg2[%258, %c0_54, %c0_55] : memref<8x8x1536xf32, #tpu.memory_space<vmem>>, vector<1x8x1536xf32>
    %260 = vector.shape_cast %259 : vector<1x8x1536xf32> to vector<8x1536xf32>
    %261 = arith.truncf %251 : vector<8x128xf32> to vector<8x128xbf16>
    %cst_56 = arith.constant dense<0.000000e+00> : vector<8x1536xf32>
    %262 = tpu.matmul %261, %3, %cst_56 {dimension_numbers = #tpu.dot_dimension_numbers<[1], [0], [0], [1], [0, 0, 1, 1], [], []>} : vector<8x128xbf16>, vector<128x1536xbf16>, vector<8x1536xf32> -> vector<8x1536xf32>
    %263 = arith.addf %260, %262 : vector<8x1536xf32>
    %264 = vector.extract_strided_slice %263 {offsets = [0, 0], sizes = [8, 1152], strides = [1, 1]} : vector<8x1536xf32> to vector<8x1152xf32>
    %265 = arith.negf %264 : vector<8x1152xf32>
    %266 = math.exp %265 : vector<8x1152xf32>
    %cst_57 = arith.constant 1.000000e+00 : f32
    %267 = vector.broadcast %cst_57 : f32 to vector<8x1152xf32>
    %268 = arith.addf %267, %266 : vector<8x1152xf32>
    %269 = arith.divf %267, %268 : vector<8x1152xf32>
    %270 = vector.extract_strided_slice %263 {offsets = [0, 1152], sizes = [8, 384], strides = [1, 1]} : vector<8x1536xf32> to vector<8x384xf32>
    %271 = math.tanh %270 : vector<8x384xf32>
    %272 = vector.extract_strided_slice %269 {offsets = [0, 0], sizes = [8, 384], strides = [1, 1]} : vector<8x1152xf32> to vector<8x384xf32>
    %273 = vector.extract_strided_slice %269 {offsets = [0, 384], sizes = [8, 384], strides = [1, 1]} : vector<8x1152xf32> to vector<8x384xf32>
    %274 = vector.extract_strided_slice %269 {offsets = [0, 768], sizes = [8, 384], strides = [1, 1]} : vector<8x1152xf32> to vector<8x384xf32>
    %275 = tpu.concatenate %253, %253, %253 in 1 : vector<8x128xf32>, vector<8x128xf32>, vector<8x128xf32> -> vector<8x384xf32>
    %276 = arith.mulf %273, %275 : vector<8x384xf32>
    %277 = arith.mulf %272, %271 : vector<8x384xf32>
    %278 = arith.addf %276, %277 : vector<8x384xf32>
    %279 = math.tanh %278 : vector<8x384xf32>
    %280 = arith.mulf %274, %279 : vector<8x384xf32>
    %281 = arith.index_cast %c6_i32 : i32 to index
    %c0_58 = arith.constant 0 : index
    %c0_59 = arith.constant 0 : index
    %282 = vector.load %arg3[%281, %c0_58, %c0_59] : memref<8x8x384xf32, #tpu.memory_space<vmem>>, vector<1x8x384xf32>
    %283 = vector.shape_cast %282 : vector<1x8x384xf32> to vector<8x384xf32>
    %284 = arith.mulf %283, %280 : vector<8x384xf32>
    %285 = arith.mulf %283, %278 : vector<8x384xf32>
    %286 = vector.extract_strided_slice %284 {offsets = [0, 0], sizes = [8, 128], strides = [1, 1]} : vector<8x384xf32> to vector<8x128xf32>
    %287 = vector.extract_strided_slice %285 {offsets = [0, 0], sizes = [8, 128], strides = [1, 1]} : vector<8x384xf32> to vector<8x128xf32>
    %288 = vector.extract_strided_slice %284 {offsets = [0, 128], sizes = [8, 128], strides = [1, 1]} : vector<8x384xf32> to vector<8x128xf32>
    %289 = arith.addf %286, %288 : vector<8x128xf32>
    %290 = vector.extract_strided_slice %285 {offsets = [0, 128], sizes = [8, 128], strides = [1, 1]} : vector<8x384xf32> to vector<8x128xf32>
    %291 = arith.addf %287, %290 : vector<8x128xf32>
    %292 = vector.extract_strided_slice %284 {offsets = [0, 256], sizes = [8, 128], strides = [1, 1]} : vector<8x384xf32> to vector<8x128xf32>
    %293 = arith.addf %289, %292 : vector<8x128xf32>
    %294 = vector.extract_strided_slice %285 {offsets = [0, 256], sizes = [8, 128], strides = [1, 1]} : vector<8x384xf32> to vector<8x128xf32>
    %295 = arith.addf %291, %294 : vector<8x128xf32>
    %296 = arith.index_cast %c6_i32 : i32 to index
    %c0_60 = arith.constant 0 : index
    %c0_61 = arith.constant 0 : index
    %297 = vector.load %arg7[%296, %c0_60, %c0_61] : memref<8x8x128xf32, #tpu.memory_space<vmem>>, vector<1x8x128xf32>
    %298 = vector.shape_cast %297 : vector<1x8x128xf32> to vector<8x128xf32>
    %299 = vector.shape_cast %293 : vector<8x128xf32> to vector<1x8x128xf32>
    tpu.vector_store %arg7[%296, %c0_60, %c0_61], %299 {strides = array<i32>} : memref<8x8x128xf32, #tpu.memory_space<vmem>>, vector<1x8x128xf32>,
    %c7_i32 = arith.constant 7 : i32
    %300 = arith.index_cast %c7_i32 : i32 to index
    %c0_62 = arith.constant 0 : index
    %c0_63 = arith.constant 0 : index
    %301 = vector.load %arg2[%300, %c0_62, %c0_63] : memref<8x8x1536xf32, #tpu.memory_space<vmem>>, vector<1x8x1536xf32>
    %302 = vector.shape_cast %301 : vector<1x8x1536xf32> to vector<8x1536xf32>
    %303 = arith.truncf %293 : vector<8x128xf32> to vector<8x128xbf16>
    %cst_64 = arith.constant dense<0.000000e+00> : vector<8x1536xf32>
    %304 = tpu.matmul %303, %3, %cst_64 {dimension_numbers = #tpu.dot_dimension_numbers<[1], [0], [0], [1], [0, 0, 1, 1], [], []>} : vector<8x128xbf16>, vector<128x1536xbf16>, vector<8x1536xf32> -> vector<8x1536xf32>
    %305 = arith.addf %302, %304 : vector<8x1536xf32>
    %306 = vector.extract_strided_slice %305 {offsets = [0, 0], sizes = [8, 1152], strides = [1, 1]} : vector<8x1536xf32> to vector<8x1152xf32>
    %307 = arith.negf %306 : vector<8x1152xf32>
    %308 = math.exp %307 : vector<8x1152xf32>
    %cst_65 = arith.constant 1.000000e+00 : f32
    %309 = vector.broadcast %cst_65 : f32 to vector<8x1152xf32>
    %310 = arith.addf %309, %308 : vector<8x1152xf32>
    %311 = arith.divf %309, %310 : vector<8x1152xf32>
    %312 = vector.extract_strided_slice %305 {offsets = [0, 1152], sizes = [8, 384], strides = [1, 1]} : vector<8x1536xf32> to vector<8x384xf32>
    %313 = math.tanh %312 : vector<8x384xf32>
    %314 = vector.extract_strided_slice %311 {offsets = [0, 0], sizes = [8, 384], strides = [1, 1]} : vector<8x1152xf32> to vector<8x384xf32>
    %315 = vector.extract_strided_slice %311 {offsets = [0, 384], sizes = [8, 384], strides = [1, 1]} : vector<8x1152xf32> to vector<8x384xf32>
    %316 = vector.extract_strided_slice %311 {offsets = [0, 768], sizes = [8, 384], strides = [1, 1]} : vector<8x1152xf32> to vector<8x384xf32>
    %317 = tpu.concatenate %295, %295, %295 in 1 : vector<8x128xf32>, vector<8x128xf32>, vector<8x128xf32> -> vector<8x384xf32>
    %318 = arith.mulf %315, %317 : vector<8x384xf32>
    %319 = arith.mulf %314, %313 : vector<8x384xf32>
    %320 = arith.addf %318, %319 : vector<8x384xf32>
    %321 = math.tanh %320 : vector<8x384xf32>
    %322 = arith.mulf %316, %321 : vector<8x384xf32>
    %323 = arith.index_cast %c7_i32 : i32 to index
    %c0_66 = arith.constant 0 : index
    %c0_67 = arith.constant 0 : index
    %324 = vector.load %arg3[%323, %c0_66, %c0_67] : memref<8x8x384xf32, #tpu.memory_space<vmem>>, vector<1x8x384xf32>
    %325 = vector.shape_cast %324 : vector<1x8x384xf32> to vector<8x384xf32>
    %326 = arith.mulf %325, %322 : vector<8x384xf32>
    %327 = arith.mulf %325, %320 : vector<8x384xf32>
    %328 = vector.extract_strided_slice %326 {offsets = [0, 0], sizes = [8, 128], strides = [1, 1]} : vector<8x384xf32> to vector<8x128xf32>
    %329 = vector.extract_strided_slice %327 {offsets = [0, 0], sizes = [8, 128], strides = [1, 1]} : vector<8x384xf32> to vector<8x128xf32>
    %330 = vector.extract_strided_slice %326 {offsets = [0, 128], sizes = [8, 128], strides = [1, 1]} : vector<8x384xf32> to vector<8x128xf32>
    %331 = arith.addf %328, %330 : vector<8x128xf32>
    %332 = vector.extract_strided_slice %327 {offsets = [0, 128], sizes = [8, 128], strides = [1, 1]} : vector<8x384xf32> to vector<8x128xf32>
    %333 = arith.addf %329, %332 : vector<8x128xf32>
    %334 = vector.extract_strided_slice %326 {offsets = [0, 256], sizes = [8, 128], strides = [1, 1]} : vector<8x384xf32> to vector<8x128xf32>
    %335 = arith.addf %331, %334 : vector<8x128xf32>
    %336 = vector.extract_strided_slice %327 {offsets = [0, 256], sizes = [8, 128], strides = [1, 1]} : vector<8x384xf32> to vector<8x128xf32>
    %337 = arith.addf %333, %336 : vector<8x128xf32>
    %338 = arith.index_cast %c7_i32 : i32 to index
    %c0_68 = arith.constant 0 : index
    %c0_69 = arith.constant 0 : index
    %339 = vector.load %arg7[%338, %c0_68, %c0_69] : memref<8x8x128xf32, #tpu.memory_space<vmem>>, vector<1x8x128xf32>
    %340 = vector.shape_cast %339 : vector<1x8x128xf32> to vector<8x128xf32>
    %341 = vector.shape_cast %335 : vector<8x128xf32> to vector<1x8x128xf32>
    tpu.vector_store %arg7[%338, %c0_68, %c0_69], %341 {strides = array<i32>} : memref<8x8x128xf32, #tpu.memory_space<vmem>>, vector<1x8x128xf32>,
    %c8_i32 = arith.constant 8 : i32
    %c0_70 = arith.constant 0 : index
    %c0_71 = arith.constant 0 : index
    %342 = vector.load %arg10[%c0_70, %c0_71] : memref<8x128xf32, #tpu.memory_space<vmem>>, vector<8x128xf32>
    tpu.vector_store %arg10[%c0_70, %c0_71], %335 {strides = array<i32>} : memref<8x128xf32, #tpu.memory_space<vmem>>, vector<8x128xf32>,
    %c0_72 = arith.constant 0 : index
    %c0_73 = arith.constant 0 : index
    %343 = vector.load %arg11[%c0_72, %c0_73] : memref<8x128xf32, #tpu.memory_space<vmem>>, vector<8x128xf32>
    tpu.vector_store %arg11[%c0_72, %c0_73], %337 {strides = array<i32>} : memref<8x128xf32, #tpu.memory_space<vmem>>, vector<8x128xf32>,
    %c0_i32_74 = arith.constant 0 : i32
    %344 = arith.cmpi eq, %arg1, %c0_i32_74 : i32
    %345 = arith.extui %344 : i1 to i32
    %c0_i32_75 = arith.constant 0 : i32
    %346 = arith.cmpi ne, %345, %c0_i32_75 : i32
    scf.if %346 {
      %c0_76 = arith.constant 0 : index
      %c0_77 = arith.constant 0 : index
      %347 = vector.load %arg8[%c0_76, %c0_77] : memref<8x128xf32, #tpu.memory_space<vmem>>, vector<8x128xf32>
      tpu.vector_store %arg8[%c0_76, %c0_77], %335 {strides = array<i32>} : memref<8x128xf32, #tpu.memory_space<vmem>>, vector<8x128xf32>,
      %c0_78 = arith.constant 0 : index
      %c0_79 = arith.constant 0 : index
      %348 = vector.load %arg9[%c0_78, %c0_79] : memref<8x128xf32, #tpu.memory_space<vmem>>, vector<8x128xf32>
      tpu.vector_store %arg9[%c0_78, %c0_79], %337 {strides = array<i32>} : memref<8x128xf32, #tpu.memory_space<vmem>>, vector<8x128xf32>,
    } else {
    }
    return
  }
  func.func @transform_0(%arg0: i32, %arg1: i32) -> (i32, i32, i32) {
    %c0_i32 = arith.constant 0 : i32
    %c0_i32_0 = arith.constant 0 : i32
    return %arg1, %arg0, %c0_i32 : i32, i32, i32
  }
  func.func @transform_1(%arg0: i32, %arg1: i32) -> (i32, i32, i32) {
    %c0_i32 = arith.constant 0 : i32
    %c0_i32_0 = arith.constant 0 : i32
    return %arg1, %arg0, %c0_i32 : i32, i32, i32
  }
  func.func @transform_2(%arg0: i32, %arg1: i32) -> (i32, i32) {
    %c0_i32 = arith.constant 0 : i32
    %c0_i32_0 = arith.constant 0 : i32
    %c0_i32_1 = arith.constant 0 : i32
    return %c0_i32, %c0_i32_0 : i32, i32
  }
  func.func @transform_3(%arg0: i32, %arg1: i32) -> (i32, i32) {
    %c0_i32 = arith.constant 0 : i32
    %c0_i32_0 = arith.constant 0 : i32
    return %arg0, %c0_i32 : i32, i32
  }
  func.func @transform_4(%arg0: i32, %arg1: i32) -> (i32, i32) {
    %c0_i32 = arith.constant 0 : i32
    %c0_i32_0 = arith.constant 0 : i32
    return %arg0, %c0_i32 : i32, i32
  }
  func.func @transform_5(%arg0: i32, %arg1: i32) -> (i32, i32, i32) {
    %c0_i32 = arith.constant 0 : i32
    %c0_i32_0 = arith.constant 0 : i32
    return %arg1, %arg0, %c0_i32 : i32, i32, i32
  }
  func.func @transform_6(%arg0: i32, %arg1: i32) -> (i32, i32) {
    %c0_i32 = arith.constant 0 : i32
    %c0_i32_0 = arith.constant 0 : i32
    return %arg0, %c0_i32 : i32, i32
  }
  func.func @transform_7(%arg0: i32, %arg1: i32) -> (i32, i32) {
    %c0_i32 = arith.constant 0 : i32
    %c0_i32_0 = arith.constant 0 : i32
    return %arg0, %c0_i32 : i32, i32
  }
}

</mosaic_0001>

<bundles_post_ra>
// kernel: tpu_custom_call.1
= control target key start
LH: loop header
LB: loop body
LE: loop exit
PB: predicated region body
PF: predicated region fallthrough
CT: control target
= control target key end

     0   :  { %13 = vsyncpa [#allocation5], 0  ;;  %s6253_s0 = inlined_call_operand.hbm [shape: f32[8,8,1536], index: 0, kind: input, shape index: {}]   ;;  %s6254_s1 = inlined_call_operand.hbm [shape: f32[8,8,384], index: 1, kind: input, shape index: {}]   ;;  %s6255_s2 = inlined_call_operand.hbm [shape: bf16[128,1536], index: 2, kind: input, shape index: {}]   ;;  %s6256_s3 = inlined_call_operand.hbm [shape: f32[8,128], index: 3, kind: input, shape index: {}]   ;;  %s6257_s4 = inlined_call_operand.hbm [shape: f32[8,128], index: 4, kind: input, shape index: {}]   ;;  %s6258_s5 = inlined_call_operand.hbm [shape: f32[8,8,128], index: 5, kind: output, shape index: {0}]   ;;  %s6259_s6 = inlined_call_operand.hbm [shape: f32[8,128], index: 6, kind: output, shape index: {1}]   ;;  %s6260_s7 = inlined_call_operand.hbm [shape: f32[8,128], index: 7, kind: output, shape index: {2}]  }
   0x1   :  { %14 = vsyncpa [#allocation8], 0 }
   0x2   :  { %15 = vsyncpa [#allocation11], 0 }
   0x3   :  { %16 = vsyncpa [#allocation6], 0 }
   0x4   :  { %17 = vsyncpa [#allocation15], 0  ;;  %s4681_s24 = smov [#allocation7]  }
   0x5   :  { %s35_s25 = sshll.u32 %s4681_s24, 4  ;;  %s36_s25 = int_to_ptr.vmem [resolvable:$true] %s35_s25 }
   0x6   :  { %s4519_s26 = scalar_lea.vmem %s36_s25, 3072  ;;  %p4524_p1 = scmp.lt.s32.totalorder %s36_s25, %s36_s25 }
   0x7   :  { %p4520_p0 = scmp.ne.s32.totalorder %s36_s25, %s4519_s26  ;;  %p4525_p2 = scmp.lt.s32.totalorder %s4519_s26, %s4519_s26 }
   0x9   :  { %p4526_p3 = por %p4525_p2, %p4524_p1 }
   0xb   :  { %p4527_p4 = pnand %p4526_p3, %p4520_p0 }
   0xd   :  { %4530 = shalt.err (!%p4527_p4)
}
   0xe   :  { %s4682_s27 = smov 384   ;;  %s4683_s28 = smov 24  }
   0xf   :  { %41 = dma.hbm_to_vmem [thread:$0]  %s6254_s1, 3072, %s36_s25, [#allocation8], %s4682_s27, %s4682_s27, %s4683_s28  }
  0x10   :  { %s4684_s8 = smov [#allocation10]   ;;  %s4685_s10 = smov [#allocation4]  }
  0x11   :  { %s60_s9 = sshll.u32 %s4684_s8, 4  ;;  %s23_s11 = sshll.u32 %s4685_s10, 4  ;;  %s61_s9 = int_to_ptr.vmem [resolvable:$true] %s60_s9  ;;  %s24_s11 = int_to_ptr.vmem [resolvable:$true] %s23_s11 }
  0x12   :  { %s4539_s12 = scalar_lea.vmem %s61_s9, 128  ;;  %p4544_p6 = scmp.lt.s32.totalorder %s61_s9, %s61_s9 }
  0x13   :  { %p4540_p5 = scmp.ne.s32.totalorder %s61_s9, %s4539_s12  ;;  %p4545_p7 = scmp.lt.s32.totalorder %s4539_s12, %s4539_s12 }
  0x15   :  { %p4546_p8 = por %p4545_p7, %p4544_p6 }
  0x17   :  { %p4547_p9 = pnand %p4546_p8, %p4540_p5 }
  0x19   :  { %4550 = shalt.err (!%p4547_p9)
}
  0x1a   :  { %63 = dma.hbm_to_vmem [thread:$0]  %s6256_s3, 128, %s61_s9, [#allocation11]  }
  0x1b   :  { %s4559_s15 = scalar_lea.vmem %s24_s11, 12288  ;;  %p4564_p11 = scmp.lt.s32.totalorder %s24_s11, %s24_s11 }
  0x1c   :  { %p4560_p10 = scmp.ne.s32.totalorder %s24_s11, %s4559_s15  ;;  %p4565_p12 = scmp.lt.s32.totalorder %s4559_s15, %s4559_s15 }
  0x1e   :  { %p4566_p13 = por %p4565_p12, %p4564_p11 }
  0x20   :  { %p4567_p0 = pnand %p4566_p13, %p4560_p10 }
  0x22   :  { %4570 = shalt.err (!%p4567_p0)
}
  0x23   :  { %s4686_s1 = smov 1536   ;;  %s4687_s16 = smov 96  }
  0x24   :  { %29 = dma.hbm_to_vmem [thread:$0]  %s6253_s0, 12288, %s24_s11, [#allocation5], %s4686_s1, %s4686_s1, %s4687_s16  }
  0x25   :  { %s4688_s19 = smov [#allocation9]  }
  0x26   :  { %s47_s20 = sshll.u32 %s4688_s19, 4  ;;  %s48_s20 = int_to_ptr.vmem [resolvable:$true] %s47_s20 }
  0x27   :  { %s4579_s21 = scalar_lea.vmem %s48_s20, 12288  ;;  %p4584_p2 = scmp.lt.s32.totalorder %s48_s20, %s48_s20 }
  0x28   :  { %p4580_p1 = scmp.ne.s32.totalorder %s48_s20, %s4579_s21  ;;  %p4585_p3 = scmp.lt.s32.totalorder %s4579_s21, %s4579_s21 }
  0x2a   :  { %p4586_p4 = por %p4585_p3, %p4584_p2 }
  0x2c   :  { %p4587_p5 = pnand %p4586_p4, %p4580_p1 }
  0x2e   :  { %4590 = shalt.err (!%p4587_p5)
}
  0x2f   :  { %s4689_s3 = smov 768   ;;  %s4690_s22 = smov 48  }
  0x30   :  { %53 = dma.hbm_to_vmem [thread:$0]  %s6255_s2, 12288, %s48_s20, [#allocation8], %s4689_s3, %s4689_s3, %s4690_s22  }
  0x31   :  { %s4691_s25 = smov [#allocation12]  }
  0x32   :  { %s70_s26 = sshll.u32 %s4691_s25, 4  ;;  %s71_s26 = int_to_ptr.vmem [resolvable:$true] %s70_s26 }
  0x33   :  { %s4599_s0 = scalar_lea.vmem %s71_s26, 128  ;;  %p4604_p7 = scmp.lt.s32.totalorder %s71_s26, %s71_s26 }
  0x34   :  { %p4600_p6 = scmp.ne.s32.totalorder %s71_s26, %s4599_s0  ;;  %p4605_p8 = scmp.lt.s32.totalorder %s4599_s0, %s4599_s0 }
  0x36   :  { %p4606_p9 = por %p4605_p8, %p4604_p7 }
  0x38   :  { %p4607_p10 = pnand %p4606_p9, %p4600_p6 }
  0x3a   :  { %4610 = shalt.err (!%p4607_p10)
}
  0x3b   :  { %73 = dma.hbm_to_vmem [thread:$0]  %s6257_s4, 128, %s71_s26, [#allocation11]  }
  0x3c   :  { %4671 = dma.done.wait [#allocation5], 12288  }
  0x3d   :  { %4672 = vsyncadd [#allocation5], 4294955008 }
  0x3e   :  { %4673 = dma.done.wait [#allocation8], 15360  }
  0x3f   :  { %4674 = vsyncadd [#allocation8], 4294951936 }
  0x40   :  { %4675 = dma.done.wait [#allocation11], 256  }
  0x41   :  { %4676 = vsyncadd [#allocation11], 4294967040  ;;  %v6261_v0 = vmov 0   ;;  %v4755_v1 = vld [vmem:[#allocation9 + $0x2a4] ss:$48 sps:$4 sm:$0xff]   ;;  %s4693_s2 = smov [#allocation14]  }
  0x42   :  { %721 = vmatprep.mubr.bf16.mxu0 %v6261_v0  ;;  %762 = vmatprep.mubr.bf16.mxu1 %v6261_v0  ;;  %v4757_v2 = vld [vmem:[#allocation9 + $0x2ac] ss:$48 sps:$4 sm:$0xff]   ;;  %v4760_v3 = vld [vmem:[#allocation9 + $0x2a0] ss:$48 sps:$4 sm:$0xff]   ;;  %v4762_v4 = vld [vmem:[#allocation9 + $0x2a8] ss:$48 sps:$4 sm:$0xff]  }
  0x43   :  { %689 = vmatprep.subr.bf16.mxu0 %v4755_v1  ;;  %730 = vmatprep.subr.bf16.mxu1 %v4757_v2  ;;  %v4765_v5 = vld [vmem:[#allocation9 + $0x244] ss:$48 sps:$4 sm:$0xff]   ;;  %v4769_v6 = vld [vmem:[#allocation9 + $0x24c] ss:$48 sps:$4 sm:$0xff]   ;;  %v4771_v7 = vld [vmem:[#allocation9 + $0x240] ss:$48 sps:$4 sm:$0xff]  }
  0x44   :  { %690 = vmatpush1.bf16.msra.mxu0 %v4760_v3  ;;  %731 = vmatpush1.bf16.msra.mxu1 %v4762_v4  ;;  %v4774_v8 = vld [vmem:[#allocation9 + $0x248] ss:$48 sps:$4 sm:$0xff]   ;;  %v4777_v9 = vld [vmem:[#allocation9 + $0x1e4] ss:$48 sps:$4 sm:$0xff]   ;;  %v4779_v10 = vld [vmem:[#allocation9 + $0x1ec] ss:$48 sps:$4 sm:$0xff]  }
  0x45   :  { %691 = vmatprep.subr.bf16.mxu0 %v4765_v5  ;;  %732 = vmatprep.subr.bf16.mxu1 %v4769_v6  ;;  %v4781_v11 = vld [vmem:[#allocation9 + $0x1e0] ss:$48 sps:$4 sm:$0xff]   ;;  %v4783_v12 = vld [vmem:[#allocation9 + $0x1e8] ss:$48 sps:$4 sm:$0xff]   ;;  %v4787_v13 = vld [vmem:[#allocation9 + $0x184] ss:$48 sps:$4 sm:$0xff]  }
  0x46   :  { %v4791_v14 = vld [vmem:[#allocation9 + $0x18c] ss:$48 sps:$4 sm:$0xff]   ;;  %v4793_v15 = vld [vmem:[#allocation9 + $0x180] ss:$48 sps:$4 sm:$0xff]   ;;  %v4797_v16 = vld [vmem:[#allocation9 + $0x188] ss:$48 sps:$4 sm:$0xff]  }
  0x47   :  { %v4799_v17 = vld [vmem:[#allocation9 + $0x124] ss:$48 sps:$4 sm:$0xff]   ;;  %v4803_v18 = vld [vmem:[#allocation9 + $0x12c] ss:$48 sps:$4 sm:$0xff]   ;;  %v4805_v19 = vld [vmem:[#allocation9 + $0x120] ss:$48 sps:$4 sm:$0xff]  }
  0x48   :  { %692 = vmatpush1.bf16.msra.mxu0 %v4771_v7  ;;  %733 = vmatpush1.bf16.msra.mxu1 %v4774_v8  ;;  %v4807_v20 = vld [vmem:[#allocation9 + $0x128] ss:$48 sps:$4 sm:$0xff]   ;;  %v4811_v21 = vld [vmem:[#allocation9 + $0xc4] ss:$48 sps:$4 sm:$0xff]   ;;  %v4815_v22 = vld [vmem:[#allocation9 + $0xcc] ss:$48 sps:$4 sm:$0xff]  }
  0x49   :  { %693 = vmatprep.subr.bf16.mxu0 %v4777_v9  ;;  %734 = vmatprep.subr.bf16.mxu1 %v4779_v10  ;;  %v4819_v23 = vld [vmem:[#allocation9 + $0xc0] ss:$48 sps:$4 sm:$0xff]   ;;  %v4821_v24 = vld [vmem:[#allocation9 + $0xc8] ss:$48 sps:$4 sm:$0xff]   ;;  %v4825_v25 = vld [vmem:[#allocation9 + $0x64] ss:$48 sps:$4 sm:$0xff]  }
  0x4a   :  { %v4827_v26 = vld [vmem:[#allocation9 + $0x6c] ss:$48 sps:$4 sm:$0xff]   ;;  %v4829_v27 = vld [vmem:[#allocation9 + $0x60] ss:$48 sps:$4 sm:$0xff]   ;;  %v4831_v28 = vld [vmem:[#allocation9 + $0x68] ss:$48 sps:$4 sm:$0xff]  }
  0x4b   :  { %v4835_v29 = vld [vmem:[#allocation9 + $0x4] ss:$48 sps:$4 sm:$0xff]   ;;  %v4839_v30 = vld [vmem:[#allocation9 + $0xc] ss:$48 sps:$4 sm:$0xff]   ;;  %v4841_v31 = vld [vmem:[#allocation9] ss:$48 sps:$4 sm:$0xff]  }
  0x4c   :  { %694 = vmatpush1.bf16.msra.mxu0 %v4781_v11  ;;  %735 = vmatpush1.bf16.msra.mxu1 %v4783_v12  ;;  %6502 = vst [vmem:[#allocation22_spill] sm:$0xff] %v4839_v30  ;;  %6503 = vst [vmem:[#allocation23_spill] sm:$0xff] %v4841_v31  ;;  %v4843_v32 = vld [vmem:[#allocation9 + $0x8] ss:$48 sps:$4 sm:$0xff]   ;;  %v94_v33 = vld [vmem:[#allocation10] sm:$0xff]  ;;  %s3578_s4 = sshll.u32 %s4693_s2, 4  ;;  %s3579_s4 = int_to_ptr.vmem [resolvable:$true] %s3578_s4 }
  0x4d   :  { %695 = vmatprep.subr.bf16.mxu0 %v4787_v13  ;;  %736 = vmatprep.subr.bf16.mxu1 %v4791_v14  ;;  %6504 = vst [vmem:[#allocation24_spill] sm:$0xff] %v4843_v32  ;;  %v4849_v34 = vld [vmem:[#allocation9 + $0x2b4] ss:$48 sps:$4 sm:$0xff]   ;;  %v4851_v35 = vld [vmem:[#allocation9 + $0x2bc] ss:$48 sps:$4 sm:$0xff]   ;;  %v4853_v36 = vpack.c.bf16 %v94_v33, %v94_v33  ;;  %s4694_s29 = smov [#allocation13]   ;;  %p4616_p12 = scmp.lt.s32.totalorder %s3579_s4, %s3579_s4 }
  0x4e   :  { %6505 = vst [vmem:[#allocation25_spill] sm:$0xff] %v4849_v34  ;;  %6506 = vst [vmem:[#allocation26_spill] sm:$0xff] %v4851_v35  ;;  %v4855_v37 = vld [vmem:[#allocation9 + $0x2b0] ss:$48 sps:$4 sm:$0xff]   ;;  %v4857_v38 = vld [vmem:[#allocation9 + $0x2b8] ss:$48 sps:$4 sm:$0xff]  }
  0x4f   :  { %v4861_v39 = vld [vmem:[#allocation9 + $0x254] ss:$48 sps:$4 sm:$0xff]   ;;  %v4865_v40 = vld [vmem:[#allocation9 + $0x25c] ss:$48 sps:$4 sm:$0xff]   ;;  %v4869_v41 = vld [vmem:[#allocation9 + $0x250] ss:$48 sps:$4 sm:$0xff]  }
  0x50   :  { %696 = vmatpush1.bf16.msra.mxu0 %v4793_v15  ;;  %737 = vmatpush1.bf16.msra.mxu1 %v4797_v16  ;;  %v4873_v42 = vld [vmem:[#allocation9 + $0x258] ss:$48 sps:$4 sm:$0xff]   ;;  %v4877_v43 = vld [vmem:[#allocation9 + $0x1f4] ss:$48 sps:$4 sm:$0xff]   ;;  %v4879_v44 = vld [vmem:[#allocation9 + $0x1fc] ss:$48 sps:$4 sm:$0xff]  }
  0x51   :  { %697 = vmatprep.subr.bf16.mxu0 %v4799_v17  ;;  %738 = vmatprep.subr.bf16.mxu1 %v4803_v18  ;;  %v4883_v45 = vld [vmem:[#allocation9 + $0x1f0] ss:$48 sps:$4 sm:$0xff]   ;;  %v4885_v46 = vld [vmem:[#allocation9 + $0x1f8] ss:$48 sps:$4 sm:$0xff]   ;;  %v4889_v47 = vld [vmem:[#allocation9 + $0x194] ss:$48 sps:$4 sm:$0xff]  }
  0x52   :  { %v4893_v48 = vld [vmem:[#allocation9 + $0x19c] ss:$48 sps:$4 sm:$0xff]   ;;  %v4895_v49 = vld [vmem:[#allocation9 + $0x190] ss:$48 sps:$4 sm:$0xff]   ;;  %v4899_v50 = vld [vmem:[#allocation9 + $0x198] ss:$48 sps:$4 sm:$0xff]  }
  0x53   :  { %v4903_v51 = vld [vmem:[#allocation9 + $0x134] ss:$48 sps:$4 sm:$0xff]   ;;  %v4905_v52 = vld [vmem:[#allocation9 + $0x13c] ss:$48 sps:$4 sm:$0xff]   ;;  %v4907_v53 = vld [vmem:[#allocation9 + $0x130] ss:$48 sps:$4 sm:$0xff]  }
  0x54   :  { %698 = vmatpush1.bf16.msra.mxu0 %v4805_v19  ;;  %739 = vmatpush1.bf16.msra.mxu1 %v4807_v20  ;;  %v4909_v54 = vld [vmem:[#allocation9 + $0x138] ss:$48 sps:$4 sm:$0xff]   ;;  %v4913_v55 = vld [vmem:[#allocation9 + $0xd4] ss:$48 sps:$4 sm:$0xff]   ;;  %v4917_v56 = vld [vmem:[#allocation9 + $0xdc] ss:$48 sps:$4 sm:$0xff]  }
  0x55   :  { %699 = vmatprep.subr.bf16.mxu0 %v4811_v21  ;;  %740 = vmatprep.subr.bf16.mxu1 %v4815_v22  ;;  %6507 = vst [vmem:[#allocation27_spill] sm:$0xff] %v4917_v56  ;;  %v4919_v57 = vld [vmem:[#allocation9 + $0xd0] ss:$48 sps:$4 sm:$0xff]   ;;  %v4923_v58 = vld [vmem:[#allocation9 + $0xd8] ss:$48 sps:$4 sm:$0xff]   ;;  %s3565_s30 = sshll.u32 %s4694_s29, 4  ;;  %s3566_s30 = int_to_ptr.vmem [resolvable:$true] %s3565_s30 }
  0x56   :  { %6508 = vst [vmem:[#allocation28_spill] sm:$0xff] %v4919_v57  ;;  %6509 = vst [vmem:[#allocation29_spill] sm:$0xff] %v4923_v58  ;;  %v4927_v59 = vld [vmem:[#allocation9 + $0x74] ss:$48 sps:$4 sm:$0xff]   ;;  %v4929_v60 = vld [vmem:[#allocation9 + $0x7c] ss:$48 sps:$4 sm:$0xff]  }
  0x57   :  { %6510 = vst [vmem:[#allocation30_spill] sm:$0xff] %v4927_v59  ;;  %6511 = vst [vmem:[#allocation31_spill] sm:$0xff] %v4929_v60  ;;  %v4931_v61 = vld [vmem:[#allocation9 + $0x70] ss:$48 sps:$4 sm:$0xff]   ;;  %v4933_v62 = vld [vmem:[#allocation9 + $0x78] ss:$48 sps:$4 sm:$0xff]  }
  0x58   :  { %700 = vmatpush1.bf16.msra.mxu0 %v4819_v23  ;;  %741 = vmatpush1.bf16.msra.mxu1 %v4821_v24  ;;  %6512 = vst [vmem:[#allocation32_spill] sm:$0xff] %v4931_v61  ;;  %6513 = vst [vmem:[#allocation33_spill] sm:$0xff] %v4933_v62  ;;  %v4937_v63 = vld [vmem:[#allocation9 + $0x14] ss:$48 sps:$4 sm:$0xff]   ;;  %v4941_v33 = vld [vmem:[#allocation9 + $0x1c] ss:$48 sps:$4 sm:$0xff]  }
  0x59   :  { %701 = vmatprep.subr.bf16.mxu0 %v4825_v25  ;;  %742 = vmatprep.subr.bf16.mxu1 %v4827_v26  ;;  %6514 = vst [vmem:[#allocation34_spill] sm:$0xff] %v4937_v63  ;;  %6515 = vst [vmem:[#allocation35_spill] sm:$0xff] %v4941_v33  ;;  %s4695_s8 = smov [#allocation16]   ;;  %s4611_s10 = scalar_lea.vmem %s3579_s4, 128 }
  0x5a   :  { %s3588_s9 = sshll.u32 %s4695_s8, 4  ;;  %p4612_p11 = scmp.ne.s32.totalorder %s3579_s4, %s4611_s10  ;;  %s3589_s9 = int_to_ptr.vmem [resolvable:$true] %s3588_s9 }
  0x5b   :  { %p4617_p13 = scmp.lt.s32.totalorder %s4611_s10, %s4611_s10 }
  0x5c   :  { %702 = vmatpush1.bf16.msra.mxu0 %v4829_v27  ;;  %743 = vmatpush1.bf16.msra.mxu1 %v4831_v28 }
  0x5d   :  { %703 = vmatprep.subr.bf16.mxu0 %v4835_v29  ;;  %744 = vmatprep.subr.bf16.mxu1 %v4839_v30  ;;  %p4618_p0 = por %p4617_p13, %p4616_p12 }
  0x5f   :  { %p4619_p1 = pnand %p4618_p0, %p4612_p11 }
  0x60   :  { %704 = vmatpush1.bf16.msra.mxu0 %v4841_v31  ;;  %745 = vmatpush1.bf16.msra.mxu1 %v4843_v32 }
  0x61   :  { %771 = vmatprep.subr.bf16.mxu0 %v4849_v34  ;;  %812 = vmatprep.subr.bf16.mxu1 %v4851_v35 }
  0x63   :  { %722 = vmatmul.mubr.bf16.vlgmr.msra.gmra.mxu0 %v4853_v36  ;;  %763 = vmatmul.mubr.bf16.vlgmr.msra.gmra.mxu1 %v4853_v36 }
  0x64   :  { %772 = vmatpush1.bf16.msra.mxu0 %v4855_v37  ;;  %813 = vmatpush1.bf16.msra.mxu1 %v4857_v38 }
  0x65   :  { %773 = vmatprep.subr.bf16.mxu0 %v4861_v39  ;;  %814 = vmatprep.subr.bf16.mxu1 %v4865_v40 }
  0x66   :  { %803 = vmatprep.mubr.bf16.mxu0 %v6261_v0  ;;  %844 = vmatprep.mubr.bf16.mxu1 %v6261_v0  ;;  %v4943_v0 = vld [vmem:[#allocation9 + $0x10] ss:$48 sps:$4 sm:$0xff]  }
  0x67   :  { %6516 = vst [vmem:[#allocation36_spill] sm:$0xff] %v4943_v0 }
  0x68   :  { %774 = vmatpush1.bf16.msra.mxu0 %v4869_v41  ;;  %815 = vmatpush1.bf16.msra.mxu1 %v4873_v42 }
  0x69   :  { %775 = vmatprep.subr.bf16.mxu0 %v4877_v43  ;;  %816 = vmatprep.subr.bf16.mxu1 %v4879_v44 }
  0x6c   :  { %776 = vmatpush1.bf16.msra.mxu0 %v4883_v45  ;;  %817 = vmatpush1.bf16.msra.mxu1 %v4885_v46 }
  0x6d   :  { %777 = vmatprep.subr.bf16.mxu0 %v4889_v47  ;;  %818 = vmatprep.subr.bf16.mxu1 %v4893_v48 }
  0x70   :  { %778 = vmatpush1.bf16.msra.mxu0 %v4895_v49  ;;  %819 = vmatpush1.bf16.msra.mxu1 %v4899_v50 }
  0x71   :  { %779 = vmatprep.subr.bf16.mxu0 %v4903_v51  ;;  %820 = vmatprep.subr.bf16.mxu1 %v4905_v52 }
  0x74   :  { %780 = vmatpush1.bf16.msra.mxu0 %v4907_v53  ;;  %821 = vmatpush1.bf16.msra.mxu1 %v4909_v54 }
  0x75   :  { %781 = vmatprep.subr.bf16.mxu0 %v4913_v55  ;;  %822 = vmatprep.subr.bf16.mxu1 %v4917_v56  ;;  %v4947_v56 = vld [vmem:[#allocation9 + $0x18] ss:$48 sps:$4 sm:$0xff]  }
  0x76   :  { %6517 = vst [vmem:[#allocation37_spill] sm:$0xff] %v4947_v56 }
  0x78   :  { %782 = vmatpush1.bf16.msra.mxu0 %v4919_v57  ;;  %823 = vmatpush1.bf16.msra.mxu1 %v4923_v58  ;;  %v4951_v58 = vld [vmem:[#allocation9 + $0x2c4] ss:$48 sps:$4 sm:$0xff]   ;;  %v4953_v57 = vld [vmem:[#allocation9 + $0x2cc] ss:$48 sps:$4 sm:$0xff]  }
  0x79   :  { %783 = vmatprep.subr.bf16.mxu0 %v4927_v59  ;;  %824 = vmatprep.subr.bf16.mxu1 %v4929_v60  ;;  %6518 = vst [vmem:[#allocation38_spill] sm:$0xff] %v4951_v58  ;;  %6519 = vst [vmem:[#allocation39_spill] sm:$0xff] %v4953_v57  ;;  %v4957_v60 = vld [vmem:[#allocation9 + $0x2c0] ss:$48 sps:$4 sm:$0xff]   ;;  %v4959_v59 = vld [vmem:[#allocation9 + $0x2c8] ss:$48 sps:$4 sm:$0xff]  }
  0x7a   :  { %6520 = vst [vmem:[#allocation40_spill] sm:$0xff] %v4957_v60  ;;  %6521 = vst [vmem:[#allocation41_spill] sm:$0xff] %v4959_v59 }
  0x7c   :  { %784 = vmatpush1.bf16.msra.mxu0 %v4931_v61  ;;  %825 = vmatpush1.bf16.msra.mxu1 %v4933_v62  ;;  %v4963_v62 = vld [vmem:[#allocation9 + $0x264] ss:$48 sps:$4 sm:$0xff]   ;;  %v4997_v61 = vld [vmem:[#allocation9 + $0x1a0] ss:$48 sps:$4 sm:$0xff]  }
  0x7d   :  { %785 = vmatprep.subr.bf16.mxu0 %v4937_v63  ;;  %826 = vmatprep.subr.bf16.mxu1 %v4941_v33  ;;  %6522 = vst [vmem:[#allocation42_spill] sm:$0xff] %v4963_v62  ;;  %v4965_v63 = vld [vmem:[#allocation9 + $0x26c] ss:$48 sps:$4 sm:$0xff]   ;;  %v6528_v33 = vmov 0   ;;  %6533 = vst [vmem:[#allocation52_spill] sm:$0xff] %v4997_v61 }
  0x7e   :  { %6523 = vst [vmem:[#allocation43_spill] sm:$0xff] %v4965_v63 }
  0x80   :  { %786 = vmatpush1.bf16.msra.mxu0 %v4943_v0  ;;  %827 = vmatpush1.bf16.msra.mxu1 %v4947_v56  ;;  %v4971_v56 = vld [vmem:[#allocation9 + $0x260] ss:$48 sps:$4 sm:$0xff]   ;;  %v4973_v0 = vld [vmem:[#allocation9 + $0x268] ss:$48 sps:$4 sm:$0xff]  }
  0x81   :  { %853 = vmatprep.subr.bf16.mxu0 %v4951_v58  ;;  %894 = vmatprep.subr.bf16.mxu1 %v4953_v57  ;;  %6524 = vst [vmem:[#allocation44_spill] sm:$0xff] %v4971_v56  ;;  %6525 = vst [vmem:[#allocation45_spill] sm:$0xff] %v4973_v0  ;;  %v4977_v57 = vld [vmem:[#allocation9 + $0x204] ss:$48 sps:$4 sm:$0xff]   ;;  %v4979_v58 = vld [vmem:[#allocation9 + $0x20c] ss:$48 sps:$4 sm:$0xff]  }
  0x82   :  { %6526 = vst [vmem:[#allocation46_spill] sm:$0xff] %v4977_v57  ;;  %6527 = vst [vmem:[#allocation47_spill] sm:$0xff] %v4979_v58 }
  0x83   :  { %804 = vmatmul.mubr.bf16.vlgmr.msra.gmra.mxu0 %v4853_v36  ;;  %845 = vmatmul.mubr.bf16.vlgmr.msra.gmra.mxu1 %v4853_v36 }
  0x84   :  { %854 = vmatpush1.bf16.msra.mxu0 %v4957_v60  ;;  %895 = vmatpush1.bf16.msra.mxu1 %v4959_v59  ;;  %v4985_v59 = vld [vmem:[#allocation9 + $0x200] ss:$48 sps:$4 sm:$0xff]   ;;  %v4987_v60 = vld [vmem:[#allocation9 + $0x208] ss:$48 sps:$4 sm:$0xff]  }
  0x85   :  { %855 = vmatprep.subr.bf16.mxu0 %v4963_v62  ;;  %896 = vmatprep.subr.bf16.mxu1 %v4965_v63  ;;  %6529 = vst [vmem:[#allocation48_spill] sm:$0xff] %v4985_v59  ;;  %6530 = vst [vmem:[#allocation49_spill] sm:$0xff] %v4987_v60  ;;  %v4991_v63 = vld [vmem:[#allocation9 + $0x1a4] ss:$48 sps:$4 sm:$0xff]   ;;  %v4993_v62 = vld [vmem:[#allocation9 + $0x1ac] ss:$48 sps:$4 sm:$0xff]  }
  0x86   :  { %885 = vmatprep.mubr.bf16.mxu0 %v6528_v33  ;;  %926 = vmatprep.mubr.bf16.mxu1 %v6528_v33  ;;  %6531 = vst [vmem:[#allocation50_spill] sm:$0xff] %v4991_v63  ;;  %6532 = vst [vmem:[#allocation51_spill] sm:$0xff] %v4993_v62 }
  0x88   :  { %856 = vmatpush1.bf16.msra.mxu0 %v4971_v56  ;;  %897 = vmatpush1.bf16.msra.mxu1 %v4973_v0  ;;  %v4999_v56 = vld [vmem:[#allocation9 + $0x1a8] ss:$48 sps:$4 sm:$0xff]   ;;  %v5003_v0 = vld [vmem:[#allocation9 + $0x144] ss:$48 sps:$4 sm:$0xff]  }
  0x89   :  { %857 = vmatprep.subr.bf16.mxu0 %v4977_v57  ;;  %898 = vmatprep.subr.bf16.mxu1 %v4979_v58  ;;  %6534 = vst [vmem:[#allocation53_spill] sm:$0xff] %v4999_v56  ;;  %6535 = vst [vmem:[#allocation54_spill] sm:$0xff] %v5003_v0  ;;  %v5005_v57 = vld [vmem:[#allocation9 + $0x14c] ss:$48 sps:$4 sm:$0xff]   ;;  %v5009_v58 = vld [vmem:[#allocation9 + $0x140] ss:$48 sps:$4 sm:$0xff]  }
  0x8a   :  { %6536 = vst [vmem:[#allocation55_spill] sm:$0xff] %v5005_v57  ;;  %6537 = vst [vmem:[#allocation56_spill] sm:$0xff] %v5009_v58 }
  0x8c   :  { %858 = vmatpush1.bf16.msra.mxu0 %v4985_v59  ;;  %899 = vmatpush1.bf16.msra.mxu1 %v4987_v60  ;;  %v5011_v59 = vld [vmem:[#allocation9 + $0x148] ss:$48 sps:$4 sm:$0xff]   ;;  %v5015_v60 = vld [vmem:[#allocation9 + $0xe4] ss:$48 sps:$4 sm:$0xff]  }
  0x8d   :  { %859 = vmatprep.subr.bf16.mxu0 %v4991_v63  ;;  %900 = vmatprep.subr.bf16.mxu1 %v4993_v62  ;;  %6538 = vst [vmem:[#allocation57_spill] sm:$0xff] %v5011_v59  ;;  %6539 = vst [vmem:[#allocation58_spill] sm:$0xff] %v5015_v60  ;;  %v5017_v63 = vld [vmem:[#allocation9 + $0xec] ss:$48 sps:$4 sm:$0xff]   ;;  %v5021_v62 = vld [vmem:[#allocation9 + $0xe0] ss:$48 sps:$4 sm:$0xff]  }
  0x8e   :  { %6540 = vst [vmem:[#allocation59_spill] sm:$0xff] %v5017_v63  ;;  %6541 = vst [vmem:[#allocation60_spill] sm:$0xff] %v5021_v62 }
  0x90   :  { %860 = vmatpush1.bf16.msra.mxu0 %v4997_v61  ;;  %901 = vmatpush1.bf16.msra.mxu1 %v4999_v56  ;;  %v5023_v61 = vld [vmem:[#allocation9 + $0xe8] ss:$48 sps:$4 sm:$0xff]   ;;  %v5027_v56 = vld [vmem:[#allocation9 + $0x84] ss:$48 sps:$4 sm:$0xff]  }
  0x91   :  { %861 = vmatprep.subr.bf16.mxu0 %v5003_v0  ;;  %902 = vmatprep.subr.bf16.mxu1 %v5005_v57  ;;  %v5029_v0 = vld [vmem:[#allocation9 + $0x8c] ss:$48 sps:$4 sm:$0xff]   ;;  %v5033_v57 = vld [vmem:[#allocation9 + $0x80] ss:$48 sps:$4 sm:$0xff]  }
  0x94   :  { %862 = vmatpush1.bf16.msra.mxu0 %v5009_v58  ;;  %903 = vmatpush1.bf16.msra.mxu1 %v5011_v59  ;;  %v5035_v58 = vld [vmem:[#allocation9 + $0x88] ss:$48 sps:$4 sm:$0xff]   ;;  %v5039_v59 = vld [vmem:[#allocation9 + $0x24] ss:$48 sps:$4 sm:$0xff]  }
  0x95   :  { %863 = vmatprep.subr.bf16.mxu0 %v5015_v60  ;;  %904 = vmatprep.subr.bf16.mxu1 %v5017_v63  ;;  %v5041_v60 = vld [vmem:[#allocation9 + $0x2c] ss:$48 sps:$4 sm:$0xff]   ;;  %v5045_v63 = vld [vmem:[#allocation9 + $0x20] ss:$48 sps:$4 sm:$0xff]  }
  0x98   :  { %864 = vmatpush1.bf16.msra.mxu0 %v5021_v62  ;;  %905 = vmatpush1.bf16.msra.mxu1 %v5023_v61  ;;  %v5047_v62 = vld [vmem:[#allocation9 + $0x28] ss:$48 sps:$4 sm:$0xff]  }
  0x99   :  { %865 = vmatprep.subr.bf16.mxu0 %v5027_v56  ;;  %906 = vmatprep.subr.bf16.mxu1 %v5029_v0 }
  0x9c   :  { %866 = vmatpush1.bf16.msra.mxu0 %v5033_v57  ;;  %907 = vmatpush1.bf16.msra.mxu1 %v5035_v58 }
  0x9d   :  { %867 = vmatprep.subr.bf16.mxu0 %v5039_v59  ;;  %908 = vmatprep.subr.bf16.mxu1 %v5041_v60 }
  0xa0   :  { %868 = vmatpush1.bf16.msra.mxu0 %v5045_v63  ;;  %909 = vmatpush1.bf16.msra.mxu1 %v5047_v62 }
  0xa1   :  { %1047 = vmatprep.subr.bf16.mxu0 %v4755_v1  ;;  %1088 = vmatprep.subr.bf16.mxu1 %v4757_v2 }
  0xa3   :  { %886 = vmatmul.mubr.bf16.vlgmr.msra.gmra.mxu0 %v4853_v36  ;;  %927 = vmatmul.mubr.bf16.vlgmr.msra.gmra.mxu1 %v4853_v36 }
  0xa4   :  { %1048 = vmatpush1.bf16.msra.mxu0 %v4760_v3  ;;  %1089 = vmatpush1.bf16.msra.mxu1 %v4762_v4 }
  0xa5   :  { %1049 = vmatprep.subr.bf16.mxu0 %v4765_v5  ;;  %1090 = vmatprep.subr.bf16.mxu1 %v4769_v6 }
  0xa6   :  { %1079 = vmatprep.mubr.bf16.mxu0 %v6528_v33  ;;  %1120 = vmatprep.mubr.bf16.mxu1 %v6528_v33 }
  0xa8   :  { %1050 = vmatpush1.bf16.msra.mxu0 %v4771_v7  ;;  %1091 = vmatpush1.bf16.msra.mxu1 %v4774_v8 }
  0xa9   :  { %1051 = vmatprep.subr.bf16.mxu0 %v4777_v9  ;;  %1092 = vmatprep.subr.bf16.mxu1 %v4779_v10  ;;  %v196_v9 = vld [vmem:[#allocation4] sm:$0xff]  ;;  %v198_v10 = vld [vmem:[#allocation4 + $0x10] sm:$0xff] }
  0xac   :  { %1052 = vmatpush1.bf16.msra.mxu0 %v4781_v11  ;;  %1093 = vmatpush1.bf16.msra.mxu1 %v4783_v12  ;;  %v197_v11 = vld [vmem:[#allocation4 + $0x8] sm:$0xff] }
  0xad   :  { %1053 = vmatprep.subr.bf16.mxu0 %v4787_v13  ;;  %1094 = vmatprep.subr.bf16.mxu1 %v4791_v14 }
  0xb0   :  { %1054 = vmatpush1.bf16.msra.mxu0 %v4793_v15  ;;  %1095 = vmatpush1.bf16.msra.mxu1 %v4797_v16 }
  0xb1   :  { %1055 = vmatprep.subr.bf16.mxu0 %v4799_v17  ;;  %1096 = vmatprep.subr.bf16.mxu1 %v4803_v18  ;;  %v200_v17 = vld [vmem:[#allocation4 + $0x20] sm:$0xff] }
  0xb4   :  { %1056 = vmatpush1.bf16.msra.mxu0 %v4805_v19  ;;  %1097 = vmatpush1.bf16.msra.mxu1 %v4807_v20  ;;  %v199_v20 = vld [vmem:[#allocation4 + $0x18] sm:$0xff] }
  0xb5   :  { %1057 = vmatprep.subr.bf16.mxu0 %v4811_v21  ;;  %1098 = vmatprep.subr.bf16.mxu1 %v4815_v22 }
  0xb8   :  { %1058 = vmatpush1.bf16.msra.mxu0 %v4819_v23  ;;  %1099 = vmatpush1.bf16.msra.mxu1 %v4821_v24 }
  0xb9   :  { %1059 = vmatprep.subr.bf16.mxu0 %v4825_v25  ;;  %1100 = vmatprep.subr.bf16.mxu1 %v4827_v26 }
  0xbc   :  { %1060 = vmatpush1.bf16.msra.mxu0 %v4829_v27  ;;  %1101 = vmatpush1.bf16.msra.mxu1 %v4831_v28 }
  0xbd   :  { %1061 = vmatprep.subr.bf16.mxu0 %v4835_v29  ;;  %1102 = vmatprep.subr.bf16.mxu1 %v4839_v30  ;;  %v1021_v30 = vld [vmem:[#allocation7 + $0x10] sm:$0xff] }
  0xc0   :  { %1062 = vmatpush1.bf16.msra.mxu0 %v4841_v31  ;;  %1103 = vmatpush1.bf16.msra.mxu1 %v4843_v32 }
  0xc1   :  { %1129 = vmatprep.subr.bf16.mxu0 %v4849_v34  ;;  %1170 = vmatprep.subr.bf16.mxu1 %v4851_v35 }
 0x123   :  { %v723_v1 = vpop.f32.mrf.mxu0  ;;  %v764_v2 = vpop.f32.mrf.mxu1 }
 0x124   :  { %v935_v12 = vadd.f32 %v723_v1, %v196_v9  ;;  %v937_v15 = vadd.f32 %v764_v2, %v198_v10  ;;  %v202_v10 = vld [vmem:[#allocation4 + $0x30] sm:$0xff] }
 0x125   :  { %v725_v3 = vpop.f32.mrf.mxu0  ;;  %v766_v4 = vpop.f32.mrf.mxu1 }
 0x126   :  { %v936_v16 = vadd.f32 %v725_v3, %v197_v11  ;;  %v3702_v21 = vmul.f32 -1.442695, %v935_v12  ;;  %v3704_v34 = vmul.f32 -1.442695, %v937_v15 }
 0x127   :  { %v727_v5 = vpop.f32.mrf.mxu0  ;;  %v768_v6 = vpop.f32.mrf.mxu1 }
 0x128   :  { %v201_v6 = vld [vmem:[#allocation4 + $0x28] sm:$0xff]  ;;  %3935 = vpow2.f32 %v3702_v21 }
 0x129   :  { %v728_v7 = vpop.f32.mrf.mxu0  ;;  %v769_v8 = vpop.f32.mrf.mxu1  ;;  %3937 = vpow2.f32 %v3704_v34 }
 0x12a   :  { %v3703_v7 = vmul.f32 -1.442695, %v936_v16  ;;  %v938_v8 = vadd.f32 %v766_v4, %v199_v20 }
 0x12c   :  { %3939 = vpow2.f32 %v3703_v7  ;;  %v3705_v2 = vmul.f32 -1.442695, %v938_v8  ;;  %v206_v7 = vld [vmem:[#allocation4 + $0x50] sm:$0xff] }
 0x135   :  { %v3936_v11 = vpop.eup %3935 }
 0x136   :  { %v3938_v12 = vpop.eup %3937  ;;  %v974_v16 = vadd.f32 1.0, %v3936_v11 }
 0x143   :  { %v805_v13 = vpop.f32.mrf.mxu0  ;;  %v846_v14 = vpop.f32.mrf.mxu1 }
 0x144   :  { %v939_v5 = vadd.f32 %v805_v13, %v200_v17  ;;  %v3940_v13 = vpop.eup %3939  ;;  %v941_v15 = vadd.f32 %v846_v14, %v202_v10 }
 0x145   :  { %v807_v18 = vpop.f32.mrf.mxu0  ;;  %v848_v19 = vpop.f32.mrf.mxu1  ;;  %v975_v17 = vadd.f32 1.0, %v3940_v13 }
 0x146   :  { %v940_v1 = vadd.f32 %v807_v18, %v201_v6  ;;  %v3706_v9 = vmul.f32 -1.442695, %v939_v5  ;;  %v3708_v34 = vmul.f32 -1.442695, %v941_v15  ;;  %v204_v6 = vld [vmem:[#allocation4 + $0x40] sm:$0xff] }
 0x147   :  { %v809_v36 = vpop.f32.mrf.mxu0  ;;  %v850_v35 = vpop.f32.mrf.mxu1 }
 0x148   :  { %v3707_v3 = vmul.f32 -1.442695, %v940_v1  ;;  %3941 = vpow2.f32 %v3706_v9  ;;  %v203_v35 = vld [vmem:[#allocation4 + $0x38] sm:$0xff] }
 0x149   :  { %v810_v32 = vpop.f32.mrf.mxu0  ;;  %v851_v31 = vpop.f32.mrf.mxu1  ;;  %3943 = vpow2.f32 %v3705_v2  ;;  %v942_v4 = vadd.f32 %v848_v19, %v203_v35  ;;  %v205_v19 = vld [vmem:[#allocation4 + $0x48] sm:$0xff] }
 0x14a   :  { %3945 = vpow2.f32 %v3707_v3  ;;  %v976_v32 = vadd.f32 1.0, %v3938_v12  ;;  %v207_v3 = vld [vmem:[#allocation4 + $0x58] sm:$0xff] }
 0x14b   :  { %3947 = vrcp.f32 %v974_v16  ;;  %v3709_v20 = vmul.f32 -1.442695, %v942_v4 }
 0x14c   :  { %3949 = vrcp.f32 %v976_v32 }
 0x14d   :  { %3951 = vrcp.f32 %v975_v17 }
 0x14e   :  { %3953 = vpow2.f32 %v3708_v34 }
 0x14f   :  { %3955 = vpow2.f32 %v3709_v20 }
 0x155   :  { %v3942_v31 = vpop.eup %3941 }
 0x156   :  { %v3944_v18 = vpop.eup %3943  ;;  %v978_v36 = vadd.f32 1.0, %v3942_v31 }
 0x157   :  { %v3946_v21 = vpop.eup %3945  ;;  %v977_v5 = vadd.f32 1.0, %v3944_v18 }
 0x158   :  { %v979_v8 = vadd.f32 1.0, %v3946_v21  ;;  %3957 = vrcp.f32 %v978_v36  ;;  %v3948_v31 = vpop.eup %3947 }
 0x159   :  { %3959 = vrcp.f32 %v977_v5  ;;  %v3950_v17 = vpop.eup %3949 }
 0x15a   :  { %v3952_v18 = vpop.eup %3951 }
 0x15b   :  { %v3954_v34 = vpop.eup %3953 }
 0x15c   :  { %v3956_v20 = vpop.eup %3955 }
 0x163   :  { %v887_v14 = vpop.f32.mrf.mxu0  ;;  %v928_v1 = vpop.f32.mrf.mxu1 }
 0x164   :  { %v943_v9 = vadd.f32 %v887_v14, %v204_v6  ;;  %v945_v2 = vadd.f32 %v928_v1, %v206_v7  ;;  %v980_v6 = vadd.f32 1.0, %v3954_v34  ;;  %v96_v7 = vld [vmem:[#allocation12] sm:$0xff] }
 0x165   :  { %v889_v10 = vpop.f32.mrf.mxu0  ;;  %v930_v11 = vpop.f32.mrf.mxu1 }
 0x166   :  { %v3710_v35 = vmul.f32 -1.442695, %v943_v9  ;;  %3961 = vtanh.f32 %v945_v2  ;;  %v944_v12 = vadd.f32 %v889_v10, %v205_v19  ;;  %v946_v13 = vadd.f32 %v930_v11, %v207_v3  ;;  %v3958_v21 = vpop.eup %3957  ;;  %v1020_v2 = vld [vmem:[#allocation7 + $0x8] sm:$0xff] }
 0x167   :  { %3963 = vrcp.f32 %v979_v8  ;;  %v891_v15 = vpop.f32.mrf.mxu0  ;;  %v932_v16 = vpop.f32.mrf.mxu1  ;;  %v981_v8 = vadd.f32 1.0, %v3956_v20  ;;  %v1005_v1 = vmul.f32 %v3958_v21, %v96_v7 }
 0x168   :  { %3965 = vpow2.f32 %v3710_v35  ;;  %v3960_v36 = vpop.eup %3959  ;;  %v1019_v16 = vld [vmem:[#allocation7] sm:$0xff] }
 0x169   :  { %3967 = vtanh.f32 %v944_v12  ;;  %v892_v4 = vpop.f32.mrf.mxu0  ;;  %v933_v32 = vpop.f32.mrf.mxu1  ;;  %v1004_v12 = vmul.f32 %v3960_v36, %v96_v7 }
 0x16a   :  { %3969 = vtanh.f32 %v946_v13 }
 0x16b   :  { %3971 = vrcp.f32 %v980_v6 }
 0x16c   :  { %3973 = vrcp.f32 %v981_v8 }
 0x173   :  { %v3962_v5 = vpop.eup %3961 }
 0x174   :  { %v3964_v14 = vpop.eup %3963  ;;  %v1008_v19 = vmul.f32 %v3962_v5, %v3952_v18 }
 0x175   :  { %v3966_v9 = vpop.eup %3965  ;;  %v1006_v4 = vmul.f32 %v3964_v14, %v96_v7 }
 0x176   :  { %v3968_v3 = vpop.eup %3967  ;;  %v982_v10 = vadd.f32 1.0, %v3966_v9  ;;  %v1011_v11 = vadd.f32 %v1008_v19, %v1005_v1 }
 0x177   :  { %v3970_v35 = vpop.eup %3969  ;;  %v1007_v13 = vmul.f32 %v3968_v3, %v3948_v31 }
 0x178   :  { %v1026_v15 = vmul.f32 %v1020_v2, %v1011_v11  ;;  %v1009_v32 = vmul.f32 %v3970_v35, %v3950_v17  ;;  %3975 = vtanh.f32 %v1011_v11  ;;  %v3972_v6 = vpop.eup %3971 }
 0x179   :  { %v1010_v34 = vadd.f32 %v1007_v13, %v1004_v12  ;;  %3977 = vrcp.f32 %v982_v10  ;;  %v3974_v36 = vpop.eup %3973 }
 0x17a   :  { %v1012_v20 = vadd.f32 %v1009_v32, %v1006_v4  ;;  %v6565_v4 = vld [vmem:[#allocation50_spill] sm:$0xff]  ;;  %v6566_v32 = vld [vmem:[#allocation51_spill] sm:$0xff] }
 0x17b   :  { %3979 = vtanh.f32 %v1010_v34  ;;  %v1025_v18 = vmul.f32 %v1019_v16, %v1010_v34  ;;  %v6567_v34 = vld [vmem:[#allocation52_spill] sm:$0xff] }
 0x17c   :  { %3981 = vtanh.f32 %v1012_v20  ;;  %v1027_v21 = vmul.f32 %v1021_v30, %v1012_v20  ;;  %v6568_v20 = vld [vmem:[#allocation53_spill] sm:$0xff] }
 0x17d   :  { %v1029_v5 = vadd.f32 %v1026_v15, %v1025_v18  ;;  %v6563_v15 = vld [vmem:[#allocation48_spill] sm:$0xff]  ;;  %v6569_v18 = vld [vmem:[#allocation54_spill] sm:$0xff] }
 0x17f   :  { %v5091_v1 = vadd.f32 %v1029_v5, %v1027_v21  ;;  %v6570_v21 = vld [vmem:[#allocation55_spill] sm:$0xff]  ;;  %v6571_v5 = vld [vmem:[#allocation56_spill] sm:$0xff] }
 0x185   :  { %v3976_v31 = vpop.eup %3975 }
 0x186   :  { %v3978_v8 = vpop.eup %3977  ;;  %v1017_v19 = vmul.f32 %v3976_v31, %v3974_v36  ;;  %v6573_v36 = vld [vmem:[#allocation58_spill] sm:$0xff]  ;;  %v6574_v31 = vld [vmem:[#allocation59_spill] sm:$0xff] }
 0x188   :  { %v3980_v9 = vpop.eup %3979  ;;  %v1023_v3 = vmul.f32 %v1020_v2, %v1017_v19  ;;  %v6562_v2 = vld [vmem:[#allocation47_spill] sm:$0xff]  ;;  %v5165_v19 = vld [vmem:[#allocation9 + $0x2a4] ss:$48 sps:$4 sm:$0xff]  }
 0x189   :  { %v3982_v7 = vpop.eup %3981  ;;  %v1016_v17 = vmul.f32 %v3980_v9, %v3972_v6  ;;  %v6572_v6 = vld [vmem:[#allocation57_spill] sm:$0xff] }
 0x18a   :  { %v1018_v14 = vmul.f32 %v3982_v7, %v3978_v8  ;;  %v6575_v8 = vld [vmem:[#allocation60_spill] sm:$0xff]  ;;  %v5168_v9 = vld [vmem:[#allocation9 + $0x2ac] ss:$48 sps:$4 sm:$0xff]  }
 0x18b   :  { %v1022_v11 = vmul.f32 %v1019_v16, %v1016_v17  ;;  %v6564_v16 = vld [vmem:[#allocation49_spill] sm:$0xff]  ;;  %v5173_v7 = vld [vmem:[#allocation9 + $0x2a0] ss:$48 sps:$4 sm:$0xff]  }
 0x18c   :  { %v1024_v10 = vmul.f32 %v1021_v30, %v1018_v14  ;;  %v6542_v30 = vld [vmem:[#allocation27_spill] sm:$0xff]  ;;  %v5179_v14 = vld [vmem:[#allocation9 + $0x244] ss:$48 sps:$4 sm:$0xff]  }
 0x18d   :  { %v1028_v35 = vadd.f32 %v1023_v3, %v1022_v11  ;;  %v5176_v17 = vld [vmem:[#allocation9 + $0x2a8] ss:$48 sps:$4 sm:$0xff]   ;;  %v5182_v3 = vld [vmem:[#allocation9 + $0x24c] ss:$48 sps:$4 sm:$0xff]   ;;  %v5187_v11 = vld [vmem:[#allocation9 + $0x240] ss:$48 sps:$4 sm:$0xff]  }
 0x18e   :  { %6576 = vst [vmem:[#allocation27_spill] sm:$0xff] %v5187_v11 }
 0x18f   :  { %v1030_v12 = vadd.f32 %v1028_v35, %v1024_v10  ;;  %v5190_v10 = vld [vmem:[#allocation9 + $0x248] ss:$48 sps:$4 sm:$0xff]   ;;  %v5193_v35 = vld [vmem:[#allocation9 + $0x1e4] ss:$48 sps:$4 sm:$0xff]  }
 0x191   :  { %1032 = vst [vmem:[#allocation13] sm:$0xff] %v1030_v12  ;;  %v5093_v13 = vpack.c.bf16 %v1030_v12, %v1030_v12  ;;  %v5196_v12 = vld [vmem:[#allocation9 + $0x1ec] ss:$48 sps:$4 sm:$0xff]  }
 0x193   :  { %1080 = vmatmul.mubr.bf16.vlgmr.msra.gmra.mxu0 %v5093_v13  ;;  %1121 = vmatmul.mubr.bf16.vlgmr.msra.gmra.mxu1 %v5093_v13 }
 0x194   :  { %1130 = vmatpush1.bf16.msra.mxu0 %v4855_v37  ;;  %1171 = vmatpush1.bf16.msra.mxu1 %v4857_v38  ;;  %v6543_v37 = vld [vmem:[#allocation28_spill] sm:$0xff]  ;;  %v6544_v38 = vld [vmem:[#allocation29_spill] sm:$0xff] }
 0x195   :  { %1131 = vmatprep.subr.bf16.mxu0 %v4861_v39  ;;  %1172 = vmatprep.subr.bf16.mxu1 %v4865_v40  ;;  %v6545_v39 = vld [vmem:[#allocation30_spill] sm:$0xff]  ;;  %v6546_v40 = vld [vmem:[#allocation31_spill] sm:$0xff]  ;;  %6577 = vst [vmem:[#allocation28_spill] sm:$0xff] %v5190_v10  ;;  %6578 = vst [vmem:[#allocation29_spill] sm:$0xff] %v5193_v35 }
 0x196   :  { %1161 = vmatprep.mubr.bf16.mxu0 %v6528_v33  ;;  %1202 = vmatprep.mubr.bf16.mxu1 %v6528_v33  ;;  %6579 = vst [vmem:[#allocation30_spill] sm:$0xff] %v5196_v12 }
 0x198   :  { %1132 = vmatpush1.bf16.msra.mxu0 %v4869_v41  ;;  %1173 = vmatpush1.bf16.msra.mxu1 %v4873_v42  ;;  %v6547_v41 = vld [vmem:[#allocation32_spill] sm:$0xff]  ;;  %v6548_v42 = vld [vmem:[#allocation33_spill] sm:$0xff] }
 0x199   :  { %1133 = vmatprep.subr.bf16.mxu0 %v4877_v43  ;;  %1174 = vmatprep.subr.bf16.mxu1 %v4879_v44  ;;  %v6549_v43 = vld [vmem:[#allocation34_spill] sm:$0xff]  ;;  %v6550_v44 = vld [vmem:[#allocation35_spill] sm:$0xff] }
 0x19c   :  { %1134 = vmatpush1.bf16.msra.mxu0 %v4883_v45  ;;  %1175 = vmatpush1.bf16.msra.mxu1 %v4885_v46  ;;  %v6551_v45 = vld [vmem:[#allocation36_spill] sm:$0xff]  ;;  %v6552_v46 = vld [vmem:[#allocation37_spill] sm:$0xff] }
 0x19d   :  { %1135 = vmatprep.subr.bf16.mxu0 %v4889_v47  ;;  %1176 = vmatprep.subr.bf16.mxu1 %v4893_v48  ;;  %v6553_v47 = vld [vmem:[#allocation38_spill] sm:$0xff]  ;;  %v6554_v48 = vld [vmem:[#allocation39_spill] sm:$0xff] }
 0x1a0   :  { %1136 = vmatpush1.bf16.msra.mxu0 %v4895_v49  ;;  %1177 = vmatpush1.bf16.msra.mxu1 %v4899_v50  ;;  %v6555_v49 = vld [vmem:[#allocation40_spill] sm:$0xff]  ;;  %v6556_v50 = vld [vmem:[#allocation41_spill] sm:$0xff] }
 0x1a1   :  { %1137 = vmatprep.subr.bf16.mxu0 %v4903_v51  ;;  %1178 = vmatprep.subr.bf16.mxu1 %v4905_v52  ;;  %v6557_v51 = vld [vmem:[#allocation42_spill] sm:$0xff]  ;;  %v6558_v52 = vld [vmem:[#allocation43_spill] sm:$0xff] }
 0x1a4   :  { %1138 = vmatpush1.bf16.msra.mxu0 %v4907_v53  ;;  %1179 = vmatpush1.bf16.msra.mxu1 %v4909_v54  ;;  %v6559_v53 = vld [vmem:[#allocation44_spill] sm:$0xff]  ;;  %v6560_v54 = vld [vmem:[#allocation45_spill] sm:$0xff] }
 0x1a5   :  { %1139 = vmatprep.subr.bf16.mxu0 %v4913_v55  ;;  %1180 = vmatprep.subr.bf16.mxu1 %v6542_v30  ;;  %v6561_v55 = vld [vmem:[#allocation46_spill] sm:$0xff]  ;;  %v5202_v30 = vld [vmem:[#allocation9 + $0x1e8] ss:$48 sps:$4 sm:$0xff]  }
 0x1a6   :  { %6581 = vst [vmem:[#allocation32_spill] sm:$0xff] %v5202_v30 }
 0x1a8   :  { %1140 = vmatpush1.bf16.msra.mxu0 %v6543_v37  ;;  %1181 = vmatpush1.bf16.msra.mxu1 %v6544_v38  ;;  %v5205_v37 = vld [vmem:[#allocation9 + $0x184] ss:$48 sps:$4 sm:$0xff]   ;;  %v5208_v38 = vld [vmem:[#allocation9 + $0x18c] ss:$48 sps:$4 sm:$0xff]  }
 0x1a9   :  { %1141 = vmatprep.subr.bf16.mxu0 %v6545_v39  ;;  %1182 = vmatprep.subr.bf16.mxu1 %v6546_v40  ;;  %6582 = vst [vmem:[#allocation33_spill] sm:$0xff] %v5205_v37  ;;  %6583 = vst [vmem:[#allocation34_spill] sm:$0xff] %v5208_v38  ;;  %v5211_v39 = vld [vmem:[#allocation9 + $0x180] ss:$48 sps:$4 sm:$0xff]   ;;  %v5214_v40 = vld [vmem:[#allocation9 + $0x188] ss:$48 sps:$4 sm:$0xff]  }
 0x1aa   :  { %6584 = vst [vmem:[#allocation35_spill] sm:$0xff] %v5211_v39  ;;  %6585 = vst [vmem:[#allocation36_spill] sm:$0xff] %v5214_v40 }
 0x1ac   :  { %1142 = vmatpush1.bf16.msra.mxu0 %v6547_v41  ;;  %1183 = vmatpush1.bf16.msra.mxu1 %v6548_v42  ;;  %v5217_v41 = vld [vmem:[#allocation9 + $0x124] ss:$48 sps:$4 sm:$0xff]   ;;  %v5220_v42 = vld [vmem:[#allocation9 + $0x12c] ss:$48 sps:$4 sm:$0xff]  }
 0x1ad   :  { %1143 = vmatprep.subr.bf16.mxu0 %v6549_v43  ;;  %1184 = vmatprep.subr.bf16.mxu1 %v6550_v44  ;;  %6586 = vst [vmem:[#allocation37_spill] sm:$0xff] %v5217_v41  ;;  %6587 = vst [vmem:[#allocation38_spill] sm:$0xff] %v5220_v42  ;;  %v5223_v43 = vld [vmem:[#allocation9 + $0x120] ss:$48 sps:$4 sm:$0xff]   ;;  %v5226_v44 = vld [vmem:[#allocation9 + $0x128] ss:$48 sps:$4 sm:$0xff]  }
 0x1ae   :  { %6588 = vst [vmem:[#allocation39_spill] sm:$0xff] %v5223_v43  ;;  %6589 = vst [vmem:[#allocation40_spill] sm:$0xff] %v5226_v44 }
 0x1b0   :  { %1144 = vmatpush1.bf16.msra.mxu0 %v6551_v45  ;;  %1185 = vmatpush1.bf16.msra.mxu1 %v6552_v46  ;;  %v5229_v45 = vld [vmem:[#allocation9 + $0xc4] ss:$48 sps:$4 sm:$0xff]  }
 0x1b1   :  { %1211 = vmatprep.subr.bf16.mxu0 %v6553_v47  ;;  %1252 = vmatprep.subr.bf16.mxu1 %v6554_v48  ;;  %6590 = vst [vmem:[#allocation41_spill] sm:$0xff] %v5229_v45  ;;  %v6591_v46 = vld [vmem:[#allocation22_spill] sm:$0xff]  ;;  %v6592_v47 = vld [vmem:[#allocation23_spill] sm:$0xff]  ;;  %v6593_v48 = vld [vmem:[#allocation24_spill] sm:$0xff] }
 0x1b3   :  { %1162 = vmatmul.mubr.bf16.vlgmr.msra.gmra.mxu0 %v5093_v13  ;;  %1203 = vmatmul.mubr.bf16.vlgmr.msra.gmra.mxu1 %v5093_v13 }
 0x1b4   :  { %1212 = vmatpush1.bf16.msra.mxu0 %v6555_v49  ;;  %1253 = vmatpush1.bf16.msra.mxu1 %v6556_v50 }
 0x1b5   :  { %1213 = vmatprep.subr.bf16.mxu0 %v6557_v51  ;;  %1254 = vmatprep.subr.bf16.mxu1 %v6558_v52  ;;  %v1034_v52 = vld [vmem:[#allocation4 + $0x60] sm:$0xff] }
 0x1b6   :  { %1243 = vmatprep.mubr.bf16.mxu0 %v6528_v33  ;;  %1284 = vmatprep.mubr.bf16.mxu1 %v6528_v33 }
 0x1b8   :  { %1214 = vmatpush1.bf16.msra.mxu0 %v6559_v53  ;;  %1255 = vmatpush1.bf16.msra.mxu1 %v6560_v54  ;;  %v1035_v53 = vld [vmem:[#allocation4 + $0x68] sm:$0xff] }
 0x1b9   :  { %1215 = vmatprep.subr.bf16.mxu0 %v6561_v55  ;;  %1256 = vmatprep.subr.bf16.mxu1 %v6562_v2 }
 0x1bc   :  { %1216 = vmatpush1.bf16.msra.mxu0 %v6563_v15  ;;  %1257 = vmatpush1.bf16.msra.mxu1 %v6564_v16 }
 0x1bd   :  { %1217 = vmatprep.subr.bf16.mxu0 %v6565_v4  ;;  %1258 = vmatprep.subr.bf16.mxu1 %v6566_v32  ;;  %v1038_v4 = vld [vmem:[#allocation4 + $0x80] sm:$0xff] }
 0x1c0   :  { %1218 = vmatpush1.bf16.msra.mxu0 %v6567_v34  ;;  %1259 = vmatpush1.bf16.msra.mxu1 %v6568_v20  ;;  %v1037_v20 = vld [vmem:[#allocation4 + $0x78] sm:$0xff] }
 0x1c1   :  { %1219 = vmatprep.subr.bf16.mxu0 %v6569_v18  ;;  %1260 = vmatprep.subr.bf16.mxu1 %v6570_v21 }
 0x1c4   :  { %1220 = vmatpush1.bf16.msra.mxu0 %v6571_v5  ;;  %1261 = vmatpush1.bf16.msra.mxu1 %v6572_v6 }
 0x1c5   :  { %1221 = vmatprep.subr.bf16.mxu0 %v6573_v36  ;;  %1262 = vmatprep.subr.bf16.mxu1 %v6574_v31  ;;  %v1039_v31 = vld [vmem:[#allocation4 + $0x88] sm:$0xff] }
 0x1c8   :  { %1222 = vmatpush1.bf16.msra.mxu0 %v6575_v8  ;;  %1263 = vmatpush1.bf16.msra.mxu1 %v5023_v61 }
 0x1c9   :  { %1223 = vmatprep.subr.bf16.mxu0 %v5027_v56  ;;  %1264 = vmatprep.subr.bf16.mxu1 %v5029_v0 }
 0x1cc   :  { %1224 = vmatpush1.bf16.msra.mxu0 %v5033_v57  ;;  %1265 = vmatpush1.bf16.msra.mxu1 %v5035_v58 }
 0x1cd   :  { %1225 = vmatprep.subr.bf16.mxu0 %v5039_v59  ;;  %1266 = vmatprep.subr.bf16.mxu1 %v5041_v60 }
 0x1d0   :  { %1226 = vmatpush1.bf16.msra.mxu0 %v5045_v63  ;;  %1267 = vmatpush1.bf16.msra.mxu1 %v5047_v62 }
 0x1d1   :  { %1407 = vmatprep.subr.bf16.mxu0 %v5165_v19  ;;  %1448 = vmatprep.subr.bf16.mxu1 %v5168_v9 }
 0x1d3   :  { %1244 = vmatmul.mubr.bf16.vlgmr.msra.gmra.mxu0 %v5093_v13  ;;  %1285 = vmatmul.mubr.bf16.vlgmr.msra.gmra.mxu1 %v5093_v13  ;;  %v5199_v13 = vld [vmem:[#allocation9 + $0x1e0] ss:$48 sps:$4 sm:$0xff]  }
 0x1d4   :  { %1408 = vmatpush1.bf16.msra.mxu0 %v5173_v7  ;;  %1449 = vmatpush1.bf16.msra.mxu1 %v5176_v17  ;;  %6580 = vst [vmem:[#allocation31_spill] sm:$0xff] %v5199_v13 }
 0x1d5   :  { %1409 = vmatprep.subr.bf16.mxu0 %v5179_v14  ;;  %1450 = vmatprep.subr.bf16.mxu1 %v5182_v3 }
 0x1d6   :  { %1439 = vmatprep.mubr.bf16.mxu0 %v6528_v33  ;;  %1480 = vmatprep.mubr.bf16.mxu1 %v6528_v33 }
 0x1d8   :  { %1410 = vmatpush1.bf16.msra.mxu0 %v5187_v11  ;;  %1451 = vmatpush1.bf16.msra.mxu1 %v5190_v10 }
 0x1d9   :  { %1411 = vmatprep.subr.bf16.mxu0 %v5193_v35  ;;  %1452 = vmatprep.subr.bf16.mxu1 %v5196_v12 }
 0x1dc   :  { %1412 = vmatpush1.bf16.msra.mxu0 %v5199_v13  ;;  %1453 = vmatpush1.bf16.msra.mxu1 %v5202_v30 }
 0x1dd   :  { %1413 = vmatprep.subr.bf16.mxu0 %v5205_v37  ;;  %1454 = vmatprep.subr.bf16.mxu1 %v5208_v38 }
 0x1e0   :  { %1414 = vmatpush1.bf16.msra.mxu0 %v5211_v39  ;;  %1455 = vmatpush1.bf16.msra.mxu1 %v5214_v40 }
 0x1e1   :  { %1415 = vmatprep.subr.bf16.mxu0 %v5217_v41  ;;  %1456 = vmatprep.subr.bf16.mxu1 %v5220_v42 }
 0x1e4   :  { %1416 = vmatpush1.bf16.msra.mxu0 %v5223_v43  ;;  %1457 = vmatpush1.bf16.msra.mxu1 %v5226_v44 }
 0x1e5   :  { %1417 = vmatprep.subr.bf16.mxu0 %v5229_v45  ;;  %1458 = vmatprep.subr.bf16.mxu1 %v4815_v22  ;;  %v6594_v22 = vld [vmem:[#allocation25_spill] sm:$0xff] }
 0x1e8   :  { %1418 = vmatpush1.bf16.msra.mxu0 %v4819_v23  ;;  %1459 = vmatpush1.bf16.msra.mxu1 %v4821_v24  ;;  %v6595_v23 = vld [vmem:[#allocation26_spill] sm:$0xff] }
 0x1e9   :  { %1419 = vmatprep.subr.bf16.mxu0 %v4825_v25  ;;  %1460 = vmatprep.subr.bf16.mxu1 %v4827_v26 }
 0x1ec   :  { %1420 = vmatpush1.bf16.msra.mxu0 %v4829_v27  ;;  %1461 = vmatpush1.bf16.msra.mxu1 %v4831_v28 }
 0x1ed   :  { %1421 = vmatprep.subr.bf16.mxu0 %v4835_v29  ;;  %1462 = vmatprep.subr.bf16.mxu1 %v6591_v46  ;;  %v1036_v29 = vld [vmem:[#allocation4 + $0x70] sm:$0xff] }
 0x1f0   :  { %1422 = vmatpush1.bf16.msra.mxu0 %v6592_v47  ;;  %1463 = vmatpush1.bf16.msra.mxu1 %v6593_v48 }
 0x1f1   :  { %1489 = vmatprep.subr.bf16.mxu0 %v6594_v22  ;;  %1530 = vmatprep.subr.bf16.mxu1 %v6595_v23 }
 0x253   :  { %v1081_v24 = vpop.f32.mrf.mxu0  ;;  %v1122_v25 = vpop.f32.mrf.mxu1 }
 0x254   :  { %v1293_v54 = vadd.f32 %v1081_v24, %v1034_v52  ;;  %v1295_v15 = vadd.f32 %v1122_v25, %v1036_v29 }
 0x255   :  { %v1083_v49 = vpop.f32.mrf.mxu0  ;;  %v1124_v26 = vpop.f32.mrf.mxu1 }
 0x256   :  { %v1294_v16 = vadd.f32 %v1083_v49, %v1035_v53  ;;  %v3711_v18 = vmul.f32 -1.442695, %v1293_v54  ;;  %v3713_v6 = vmul.f32 -1.442695, %v1295_v15  ;;  %v1296_v47 = vadd.f32 %v1124_v26, %v1037_v20 }
 0x257   :  { %v1085_v50 = vpop.f32.mrf.mxu0  ;;  %v1126_v27 = vpop.f32.mrf.mxu1 }
 0x258   :  { %v3712_v46 = vmul.f32 -1.442695, %v1294_v16  ;;  %3983 = vpow2.f32 %v3711_v18  ;;  %v3714_v25 = vmul.f32 -1.442695, %v1296_v47  ;;  %v1040_v50 = vld [vmem:[#allocation4 + $0x90] sm:$0xff] }
 0x259   :  { %v1086_v51 = vpop.f32.mrf.mxu0  ;;  %v1127_v28 = vpop.f32.mrf.mxu1  ;;  %3985 = vpow2.f32 %v3713_v6  ;;  %v1044_v6 = vld [vmem:[#allocation4 + $0xb0] sm:$0xff] }
 0x25a   :  { %3987 = vpow2.f32 %v3712_v46  ;;  %v1041_v51 = vld [vmem:[#allocation4 + $0x98] sm:$0xff] }
 0x265   :  { %v3984_v27 = vpop.eup %3983 }
 0x266   :  { %v3986_v28 = vpop.eup %3985  ;;  %v1332_v53 = vadd.f32 1.0, %v3984_v27 }
 0x267   :  { %v3988_v52 = vpop.eup %3987  ;;  %v1334_v54 = vadd.f32 1.0, %v3986_v28 }
 0x268   :  { %v1333_v15 = vadd.f32 1.0, %v3988_v52 }
 0x273   :  { %v1163_v55 = vpop.f32.mrf.mxu0  ;;  %v1204_v2 = vpop.f32.mrf.mxu1 }
 0x274   :  { %v1297_v36 = vadd.f32 %v1163_v55, %v1038_v4  ;;  %v1299_v29 = vadd.f32 %v1204_v2, %v1040_v50 }
 0x275   :  { %v1165_v32 = vpop.f32.mrf.mxu0  ;;  %v1206_v34 = vpop.f32.mrf.mxu1 }
 0x276   :  { %v1298_v23 = vadd.f32 %v1165_v32, %v1039_v31  ;;  %v3715_v24 = vmul.f32 -1.442695, %v1297_v36  ;;  %v1300_v26 = vadd.f32 %v1206_v34, %v1041_v51  ;;  %v3717_v4 = vmul.f32 -1.442695, %v1299_v29  ;;  %v1043_v34 = vld [vmem:[#allocation4 + $0xa8] sm:$0xff] }
 0x277   :  { %v1167_v21 = vpop.f32.mrf.mxu0  ;;  %v1208_v5 = vpop.f32.mrf.mxu1 }
 0x278   :  { %v3716_v49 = vmul.f32 -1.442695, %v1298_v23  ;;  %3989 = vpow2.f32 %v3715_v24  ;;  %v3718_v32 = vmul.f32 -1.442695, %v1300_v26  ;;  %v1042_v5 = vld [vmem:[#allocation4 + $0xa0] sm:$0xff] }
 0x279   :  { %v1168_v48 = vpop.f32.mrf.mxu0  ;;  %v1209_v22 = vpop.f32.mrf.mxu1  ;;  %3991 = vpow2.f32 %v3714_v25 }
 0x27a   :  { %3993 = vpow2.f32 %v3716_v49  ;;  %v1045_v48 = vld [vmem:[#allocation4 + $0xb8] sm:$0xff] }
 0x27b   :  { %3995 = vrcp.f32 %v1332_v53 }
 0x27c   :  { %3997 = vrcp.f32 %v1334_v54 }
 0x27d   :  { %3999 = vrcp.f32 %v1333_v15 }
 0x27e   :  { %4001 = vpow2.f32 %v3717_v4 }
 0x27f   :  { %4003 = vpow2.f32 %v3718_v32 }
 0x285   :  { %v3990_v55 = vpop.eup %3989 }
 0x286   :  { %v3992_v16 = vpop.eup %3991  ;;  %v1336_v18 = vadd.f32 1.0, %v3990_v55 }
 0x287   :  { %v3994_v20 = vpop.eup %3993  ;;  %v1335_v21 = vadd.f32 1.0, %v3992_v16 }
 0x288   :  { %v1337_v36 = vadd.f32 1.0, %v3994_v20  ;;  %4005 = vrcp.f32 %v1336_v18  ;;  %v3996_v52 = vpop.eup %3995 }
 0x289   :  { %4007 = vrcp.f32 %v1335_v21  ;;  %v3998_v29 = vpop.eup %3997 }
 0x28a   :  { %v4000_v53 = vpop.eup %3999 }
 0x28b   :  { %v4002_v26 = vpop.eup %4001 }
 0x28c   :  { %v4004_v54 = vpop.eup %4003  ;;  %v1338_v4 = vadd.f32 1.0, %v4002_v26 }
 0x28d   :  { %v1339_v20 = vadd.f32 1.0, %v4004_v54 }
 0x293   :  { %v1245_v2 = vpop.f32.mrf.mxu0  ;;  %v1286_v31 = vpop.f32.mrf.mxu1 }
 0x294   :  { %v1301_v46 = vadd.f32 %v1245_v2, %v1042_v5  ;;  %v1303_v47 = vadd.f32 %v1286_v31, %v1044_v6  ;;  %v1379_v6 = vld [vmem:[#allocation7 + $0x20] sm:$0xff] }
 0x295   :  { %v1247_v22 = vpop.f32.mrf.mxu0  ;;  %v1288_v23 = vpop.f32.mrf.mxu1 }
 0x296   :  { %v3719_v24 = vmul.f32 -1.442695, %v1301_v46  ;;  %4009 = vtanh.f32 %v1303_v47  ;;  %v1302_v25 = vadd.f32 %v1247_v22, %v1043_v34  ;;  %v1304_v49 = vadd.f32 %v1288_v23, %v1045_v48  ;;  %v4006_v55 = vpop.eup %4005  ;;  %v1378_v22 = vld [vmem:[#allocation7 + $0x18] sm:$0xff] }
 0x297   :  { %4011 = vrcp.f32 %v1337_v36  ;;  %v1249_v50 = vpop.f32.mrf.mxu0  ;;  %v1290_v27 = vpop.f32.mrf.mxu1  ;;  %v1363_v18 = vmul.f32 %v4006_v55, %v5091_v1 }
 0x298   :  { %4013 = vpow2.f32 %v3719_v24  ;;  %v4008_v15 = vpop.eup %4007 }
 0x299   :  { %4015 = vtanh.f32 %v1302_v25  ;;  %v1250_v51 = vpop.f32.mrf.mxu0  ;;  %v1291_v28 = vpop.f32.mrf.mxu1  ;;  %v1362_v46 = vmul.f32 %v4008_v15, %v5091_v1 }
 0x29a   :  { %4017 = vtanh.f32 %v1304_v49  ;;  %v1380_v49 = vld [vmem:[#allocation7 + $0x28] sm:$0xff] }
 0x29b   :  { %4019 = vrcp.f32 %v1338_v4 }
 0x29c   :  { %4021 = vrcp.f32 %v1339_v20 }
 0x2a3   :  { %v4010_v16 = vpop.eup %4009 }
 0x2a4   :  { %v4012_v32 = vpop.eup %4011  ;;  %v1366_v21 = vmul.f32 %v4010_v16, %v4000_v53 }
 0x2a5   :  { %v4014_v5 = vpop.eup %4013  ;;  %v1364_v23 = vmul.f32 %v4012_v32, %v5091_v1 }
 0x2a6   :  { %v4016_v36 = vpop.eup %4015  ;;  %v1340_v2 = vadd.f32 1.0, %v4014_v5  ;;  %v1369_v31 = vadd.f32 %v1366_v21, %v1363_v18 }
 0x2a7   :  { %v4018_v34 = vpop.eup %4017  ;;  %v1365_v47 = vmul.f32 %v4016_v36, %v3996_v52 }
 0x2a8   :  { %v1385_v48 = vmul.f32 %v1379_v6, %v1369_v31  ;;  %v1367_v24 = vmul.f32 %v4018_v34, %v3998_v29  ;;  %4023 = vtanh.f32 %v1369_v31  ;;  %v4020_v26 = vpop.eup %4019  ;;  %v5257_v31 = vld [vmem:[#allocation9 + $0x2b8] ss:$48 sps:$4 sm:$0xff]   ;;  %v5263_v34 = vld [vmem:[#allocation9 + $0x25c] ss:$48 sps:$4 sm:$0xff]  }
 0x2a9   :  { %v1368_v25 = vadd.f32 %v1365_v47, %v1362_v46  ;;  %4025 = vrcp.f32 %v1340_v2  ;;  %v4022_v52 = vpop.eup %4021  ;;  %v5254_v2 = vld [vmem:[#allocation9 + $0x2b0] ss:$48 sps:$4 sm:$0xff]   ;;  %v5271_v47 = vld [vmem:[#allocation9 + $0x258] ss:$48 sps:$4 sm:$0xff]  }
 0x2aa   :  { %v1370_v50 = vadd.f32 %v1367_v24, %v1364_v23  ;;  %v5268_v46 = vld [vmem:[#allocation9 + $0x250] ss:$48 sps:$4 sm:$0xff]   ;;  %v5283_v24 = vld [vmem:[#allocation9 + $0x1f8] ss:$48 sps:$4 sm:$0xff]  }
 0x2ab   :  { %4027 = vtanh.f32 %v1368_v25  ;;  %v1384_v27 = vmul.f32 %v1378_v22, %v1368_v25  ;;  %v5280_v23 = vld [vmem:[#allocation9 + $0x1f0] ss:$48 sps:$4 sm:$0xff]   ;;  %v5286_v25 = vld [vmem:[#allocation9 + $0x194] ss:$48 sps:$4 sm:$0xff]  }
 0x2ac   :  { %4029 = vtanh.f32 %v1370_v50  ;;  %v1386_v51 = vmul.f32 %v1380_v49, %v1370_v50  ;;  %v5292_v50 = vld [vmem:[#allocation9 + $0x190] ss:$48 sps:$4 sm:$0xff]  }
 0x2ad   :  { %v1388_v28 = vadd.f32 %v1385_v48, %v1384_v27  ;;  %v5274_v48 = vld [vmem:[#allocation9 + $0x1f4] ss:$48 sps:$4 sm:$0xff]   ;;  %v5295_v27 = vld [vmem:[#allocation9 + $0x198] ss:$48 sps:$4 sm:$0xff]  }
 0x2af   :  { %v5248_v53 = vadd.f32 %v1388_v28, %v1386_v51  ;;  %v5298_v51 = vld [vmem:[#allocation9 + $0x134] ss:$48 sps:$4 sm:$0xff]   ;;  %v5301_v28 = vld [vmem:[#allocation9 + $0x13c] ss:$48 sps:$4 sm:$0xff]  }
 0x2b5   :  { %v4024_v54 = vpop.eup %4023 }
 0x2b6   :  { %v4026_v55 = vpop.eup %4025  ;;  %v1375_v15 = vmul.f32 %v4024_v54, %v4022_v52  ;;  %v5307_v52 = vld [vmem:[#allocation9 + $0x138] ss:$48 sps:$4 sm:$0xff]   ;;  %v5310_v54 = vld [vmem:[#allocation9 + $0xd4] ss:$48 sps:$4 sm:$0xff]  }
 0x2b8   :  { %v4028_v16 = vpop.eup %4027  ;;  %v1382_v32 = vmul.f32 %v1379_v6, %v1375_v15  ;;  %v5260_v6 = vld [vmem:[#allocation9 + $0x254] ss:$48 sps:$4 sm:$0xff]   ;;  %v5316_v15 = vld [vmem:[#allocation9 + $0xd0] ss:$48 sps:$4 sm:$0xff]  }
 0x2b9   :  { %v4030_v1 = vpop.eup %4029  ;;  %v1374_v29 = vmul.f32 %v4028_v16, %v4020_v26  ;;  %v5304_v26 = vld [vmem:[#allocation9 + $0x130] ss:$48 sps:$4 sm:$0xff]   ;;  %v5319_v16 = vld [vmem:[#allocation9 + $0xd8] ss:$48 sps:$4 sm:$0xff]  }
 0x2ba   :  { %v1376_v4 = vmul.f32 %v4030_v1, %v4026_v55  ;;  %v5313_v55 = vld [vmem:[#allocation9 + $0xdc] ss:$48 sps:$4 sm:$0xff]   ;;  %v5322_v1 = vld [vmem:[#allocation9 + $0x74] ss:$48 sps:$4 sm:$0xff]  }
 0x2bb   :  { %v1381_v20 = vmul.f32 %v1378_v22, %v1374_v29  ;;  %v5277_v22 = vld [vmem:[#allocation9 + $0x1fc] ss:$48 sps:$4 sm:$0xff]  }
 0x2bc   :  { %v1383_v18 = vmul.f32 %v1380_v49, %v1376_v4  ;;  %v5289_v49 = vld [vmem:[#allocation9 + $0x19c] ss:$48 sps:$4 sm:$0xff]   ;;  %v5328_v4 = vld [vmem:[#allocation9 + $0x70] ss:$48 sps:$4 sm:$0xff]  }
 0x2bd   :  { %v1387_v21 = vadd.f32 %v1382_v32, %v1381_v20  ;;  %v5325_v29 = vld [vmem:[#allocation9 + $0x7c] ss:$48 sps:$4 sm:$0xff]   ;;  %6596 = vst [vmem:[#allocation42_spill] sm:$0xff] %v5328_v4  ;;  %v5331_v32 = vld [vmem:[#allocation9 + $0x78] ss:$48 sps:$4 sm:$0xff]  }
 0x2be   :  { %6597 = vst [vmem:[#allocation43_spill] sm:$0xff] %v5331_v32  ;;  %v5334_v20 = vld [vmem:[#allocation9 + $0x14] ss:$48 sps:$4 sm:$0xff]  }
 0x2bf   :  { %v1389_v5 = vadd.f32 %v1387_v21, %v1383_v18  ;;  %6598 = vst [vmem:[#allocation44_spill] sm:$0xff] %v5334_v20  ;;  %v5337_v18 = vld [vmem:[#allocation9 + $0x1c] ss:$48 sps:$4 sm:$0xff]   ;;  %v5340_v21 = vld [vmem:[#allocation9 + $0x10] ss:$48 sps:$4 sm:$0xff]  }
 0x2c0   :  { %6599 = vst [vmem:[#allocation45_spill] sm:$0xff] %v5337_v18  ;;  %6600 = vst [vmem:[#allocation46_spill] sm:$0xff] %v5340_v21 }
 0x2c1   :  { %1392 = vst [vmem:[#allocation13 + $0x8] sm:$0xff] %v1389_v5  ;;  %v5250_v36 = vpack.c.bf16 %v1389_v5, %v1389_v5  ;;  %v5343_v5 = vld [vmem:[#allocation9 + $0x18] ss:$48 sps:$4 sm:$0xff]  }
 0x2c2   :  { %6601 = vst [vmem:[#allocation47_spill] sm:$0xff] %v5343_v5 }
 0x2c3   :  { %1440 = vmatmul.mubr.bf16.vlgmr.msra.gmra.mxu0 %v5250_v36  ;;  %1481 = vmatmul.mubr.bf16.vlgmr.msra.gmra.mxu1 %v5250_v36 }
 0x2c4   :  { %1490 = vmatpush1.bf16.msra.mxu0 %v5254_v2  ;;  %1531 = vmatpush1.bf16.msra.mxu1 %v5257_v31 }
 0x2c5   :  { %1491 = vmatprep.subr.bf16.mxu0 %v5260_v6  ;;  %1532 = vmatprep.subr.bf16.mxu1 %v5263_v34 }
 0x2c6   :  { %1521 = vmatprep.mubr.bf16.mxu0 %v6528_v33  ;;  %1562 = vmatprep.mubr.bf16.mxu1 %v6528_v33 }
 0x2c8   :  { %1492 = vmatpush1.bf16.msra.mxu0 %v5268_v46  ;;  %1533 = vmatpush1.bf16.msra.mxu1 %v5271_v47 }
 0x2c9   :  { %1493 = vmatprep.subr.bf16.mxu0 %v5274_v48  ;;  %1534 = vmatprep.subr.bf16.mxu1 %v5277_v22 }
 0x2cc   :  { %1494 = vmatpush1.bf16.msra.mxu0 %v5280_v23  ;;  %1535 = vmatpush1.bf16.msra.mxu1 %v5283_v24 }
 0x2cd   :  { %1495 = vmatprep.subr.bf16.mxu0 %v5286_v25  ;;  %1536 = vmatprep.subr.bf16.mxu1 %v5289_v49 }
 0x2d0   :  { %1496 = vmatpush1.bf16.msra.mxu0 %v5292_v50  ;;  %1537 = vmatpush1.bf16.msra.mxu1 %v5295_v27 }
 0x2d1   :  { %1497 = vmatprep.subr.bf16.mxu0 %v5298_v51  ;;  %1538 = vmatprep.subr.bf16.mxu1 %v5301_v28 }
 0x2d4   :  { %1498 = vmatpush1.bf16.msra.mxu0 %v5304_v26  ;;  %1539 = vmatpush1.bf16.msra.mxu1 %v5307_v52 }
 0x2d5   :  { %1499 = vmatprep.subr.bf16.mxu0 %v5310_v54  ;;  %1540 = vmatprep.subr.bf16.mxu1 %v5313_v55 }
 0x2d8   :  { %1500 = vmatpush1.bf16.msra.mxu0 %v5316_v15  ;;  %1541 = vmatpush1.bf16.msra.mxu1 %v5319_v16 }
 0x2d9   :  { %1501 = vmatprep.subr.bf16.mxu0 %v5322_v1  ;;  %1542 = vmatprep.subr.bf16.mxu1 %v5325_v29 }
 0x2dc   :  { %1502 = vmatpush1.bf16.msra.mxu0 %v5328_v4  ;;  %1543 = vmatpush1.bf16.msra.mxu1 %v5331_v32  ;;  %v5346_v4 = vld [vmem:[#allocation9 + $0x2c4] ss:$48 sps:$4 sm:$0xff]   ;;  %v5349_v32 = vld [vmem:[#allocation9 + $0x2cc] ss:$48 sps:$4 sm:$0xff]  }
 0x2dd   :  { %1503 = vmatprep.subr.bf16.mxu0 %v5334_v20  ;;  %1544 = vmatprep.subr.bf16.mxu1 %v5337_v18  ;;  %6602 = vst [vmem:[#allocation48_spill] sm:$0xff] %v5346_v4  ;;  %6603 = vst [vmem:[#allocation49_spill] sm:$0xff] %v5349_v32  ;;  %v5354_v18 = vld [vmem:[#allocation9 + $0x2c0] ss:$48 sps:$4 sm:$0xff]   ;;  %v5383_v20 = vld [vmem:[#allocation9 + $0x208] ss:$48 sps:$4 sm:$0xff]  }
 0x2de   :  { %6604 = vst [vmem:[#allocation50_spill] sm:$0xff] %v5354_v18  ;;  %6613 = vst [vmem:[#allocation59_spill] sm:$0xff] %v5383_v20 }
 0x2e0   :  { %1504 = vmatpush1.bf16.msra.mxu0 %v5340_v21  ;;  %1545 = vmatpush1.bf16.msra.mxu1 %v5343_v5  ;;  %v5357_v21 = vld [vmem:[#allocation9 + $0x2c8] ss:$48 sps:$4 sm:$0xff]   ;;  %v5360_v5 = vld [vmem:[#allocation9 + $0x264] ss:$48 sps:$4 sm:$0xff]  }
 0x2e1   :  { %1571 = vmatprep.subr.bf16.mxu0 %v5346_v4  ;;  %1612 = vmatprep.subr.bf16.mxu1 %v5349_v32  ;;  %6605 = vst [vmem:[#allocation51_spill] sm:$0xff] %v5357_v21  ;;  %6606 = vst [vmem:[#allocation52_spill] sm:$0xff] %v5360_v5  ;;  %v5363_v4 = vld [vmem:[#allocation9 + $0x26c] ss:$48 sps:$4 sm:$0xff]   ;;  %v5368_v32 = vld [vmem:[#allocation9 + $0x260] ss:$48 sps:$4 sm:$0xff]  }
 0x2e2   :  { %6607 = vst [vmem:[#allocation53_spill] sm:$0xff] %v5363_v4  ;;  %6608 = vst [vmem:[#allocation54_spill] sm:$0xff] %v5368_v32 }
 0x2e3   :  { %1522 = vmatmul.mubr.bf16.vlgmr.msra.gmra.mxu0 %v5250_v36  ;;  %1563 = vmatmul.mubr.bf16.vlgmr.msra.gmra.mxu1 %v5250_v36 }
 0x2e4   :  { %1572 = vmatpush1.bf16.msra.mxu0 %v5354_v18  ;;  %1613 = vmatpush1.bf16.msra.mxu1 %v5357_v21  ;;  %v5371_v18 = vld [vmem:[#allocation9 + $0x268] ss:$48 sps:$4 sm:$0xff]   ;;  %v5374_v21 = vld [vmem:[#allocation9 + $0x204] ss:$48 sps:$4 sm:$0xff]  }
 0x2e5   :  { %1573 = vmatprep.subr.bf16.mxu0 %v5360_v5  ;;  %1614 = vmatprep.subr.bf16.mxu1 %v5363_v4  ;;  %6609 = vst [vmem:[#allocation55_spill] sm:$0xff] %v5371_v18  ;;  %6610 = vst [vmem:[#allocation56_spill] sm:$0xff] %v5374_v21  ;;  %v5377_v5 = vld [vmem:[#allocation9 + $0x20c] ss:$48 sps:$4 sm:$0xff]   ;;  %v5380_v4 = vld [vmem:[#allocation9 + $0x200] ss:$48 sps:$4 sm:$0xff]  }
 0x2e6   :  { %1603 = vmatprep.mubr.bf16.mxu0 %v6528_v33  ;;  %1644 = vmatprep.mubr.bf16.mxu1 %v6528_v33  ;;  %6611 = vst [vmem:[#allocation57_spill] sm:$0xff] %v5377_v5  ;;  %6612 = vst [vmem:[#allocation58_spill] sm:$0xff] %v5380_v4 }
 0x2e8   :  { %1574 = vmatpush1.bf16.msra.mxu0 %v5368_v32  ;;  %1615 = vmatpush1.bf16.msra.mxu1 %v5371_v18  ;;  %v5386_v32 = vld [vmem:[#allocation9 + $0x1a4] ss:$48 sps:$4 sm:$0xff]   ;;  %v5389_v18 = vld [vmem:[#allocation9 + $0x1ac] ss:$48 sps:$4 sm:$0xff]  }
 0x2e9   :  { %1575 = vmatprep.subr.bf16.mxu0 %v5374_v21  ;;  %1616 = vmatprep.subr.bf16.mxu1 %v5377_v5  ;;  %6614 = vst [vmem:[#allocation60_spill] sm:$0xff] %v5386_v32  ;;  %6615 = vst [vmem:[#allocation22_spill] sm:$0xff] %v5389_v18  ;;  %v5392_v21 = vld [vmem:[#allocation9 + $0x1a0] ss:$48 sps:$4 sm:$0xff]   ;;  %v5395_v5 = vld [vmem:[#allocation9 + $0x1a8] ss:$48 sps:$4 sm:$0xff]  }
 0x2ea   :  { %6616 = vst [vmem:[#allocation23_spill] sm:$0xff] %v5392_v21  ;;  %6617 = vst [vmem:[#allocation24_spill] sm:$0xff] %v5395_v5 }
 0x2ec   :  { %1576 = vmatpush1.bf16.msra.mxu0 %v5380_v4  ;;  %1617 = vmatpush1.bf16.msra.mxu1 %v5383_v20  ;;  %v5398_v4 = vld [vmem:[#allocation9 + $0x144] ss:$48 sps:$4 sm:$0xff]   ;;  %v5401_v20 = vld [vmem:[#allocation9 + $0x14c] ss:$48 sps:$4 sm:$0xff]  }
 0x2ed   :  { %1577 = vmatprep.subr.bf16.mxu0 %v5386_v32  ;;  %1618 = vmatprep.subr.bf16.mxu1 %v5389_v18  ;;  %6618 = vst [vmem:[#allocation25_spill] sm:$0xff] %v5398_v4  ;;  %6619 = vst [vmem:[#allocation26_spill] sm:$0xff] %v5401_v20  ;;  %v5404_v32 = vld [vmem:[#allocation9 + $0x140] ss:$48 sps:$4 sm:$0xff]   ;;  %v5407_v18 = vld [vmem:[#allocation9 + $0x148] ss:$48 sps:$4 sm:$0xff]  }
 0x2ee   :  { %6620 = vst [vmem:[#allocation61_spill] sm:$0xff] %v5404_v32  ;;  %6621 = vst [vmem:[#allocation62_spill] sm:$0xff] %v5407_v18 }
 0x2f0   :  { %1578 = vmatpush1.bf16.msra.mxu0 %v5392_v21  ;;  %1619 = vmatpush1.bf16.msra.mxu1 %v5395_v5  ;;  %v5410_v21 = vld [vmem:[#allocation9 + $0xe4] ss:$48 sps:$4 sm:$0xff]   ;;  %v5413_v5 = vld [vmem:[#allocation9 + $0xec] ss:$48 sps:$4 sm:$0xff]  }
 0x2f1   :  { %1579 = vmatprep.subr.bf16.mxu0 %v5398_v4  ;;  %1620 = vmatprep.subr.bf16.mxu1 %v5401_v20  ;;  %6622 = vst [vmem:[#allocation63_spill] sm:$0xff] %v5410_v21  ;;  %6623 = vst [vmem:[#allocation64_spill] sm:$0xff] %v5413_v5 }
 0x2f4   :  { %1580 = vmatpush1.bf16.msra.mxu0 %v5404_v32  ;;  %1621 = vmatpush1.bf16.msra.mxu1 %v5407_v18 }
 0x2f5   :  { %1581 = vmatprep.subr.bf16.mxu0 %v5410_v21  ;;  %1622 = vmatprep.subr.bf16.mxu1 %v5413_v5 }
 0x2f8   :  { %1582 = vmatpush1.bf16.msra.mxu0 %v6575_v8  ;;  %1623 = vmatpush1.bf16.msra.mxu1 %v5023_v61  ;;  %v5469_v61 = vld [vmem:[#allocation9 + $0x68] ss:$48 sps:$4 sm:$0xff]   ;;  %v5478_v8 = vld [vmem:[#allocation9] ss:$48 sps:$4 sm:$0xff]  }
 0x2f9   :  { %1583 = vmatprep.subr.bf16.mxu0 %v5027_v56  ;;  %1624 = vmatprep.subr.bf16.mxu1 %v5029_v0  ;;  %v5451_v0 = vld [vmem:[#allocation9 + $0xcc] ss:$48 sps:$4 sm:$0xff]   ;;  %v5454_v56 = vld [vmem:[#allocation9 + $0xc0] ss:$48 sps:$4 sm:$0xff]   ;;  %6630 = vst [vmem:[#allocation71_spill] sm:$0xff] %v5469_v61  ;;  %6633 = vst [vmem:[#allocation74_spill] sm:$0xff] %v5478_v8 }
 0x2fa   :  { %6624 = vst [vmem:[#allocation65_spill] sm:$0xff] %v5451_v0  ;;  %6625 = vst [vmem:[#allocation66_spill] sm:$0xff] %v5454_v56 }
 0x2fc   :  { %1584 = vmatpush1.bf16.msra.mxu0 %v5033_v57  ;;  %1625 = vmatpush1.bf16.msra.mxu1 %v5035_v58  ;;  %v5457_v57 = vld [vmem:[#allocation9 + $0xc8] ss:$48 sps:$4 sm:$0xff]   ;;  %v5460_v58 = vld [vmem:[#allocation9 + $0x64] ss:$48 sps:$4 sm:$0xff]  }
 0x2fd   :  { %1585 = vmatprep.subr.bf16.mxu0 %v5039_v59  ;;  %1626 = vmatprep.subr.bf16.mxu1 %v5041_v60  ;;  %6626 = vst [vmem:[#allocation67_spill] sm:$0xff] %v5457_v57  ;;  %6627 = vst [vmem:[#allocation68_spill] sm:$0xff] %v5460_v58  ;;  %v5463_v59 = vld [vmem:[#allocation9 + $0x6c] ss:$48 sps:$4 sm:$0xff]   ;;  %v5466_v60 = vld [vmem:[#allocation9 + $0x60] ss:$48 sps:$4 sm:$0xff]  }
 0x2fe   :  { %6628 = vst [vmem:[#allocation69_spill] sm:$0xff] %v5463_v59  ;;  %6629 = vst [vmem:[#allocation70_spill] sm:$0xff] %v5466_v60 }
 0x300   :  { %1586 = vmatpush1.bf16.msra.mxu0 %v5045_v63  ;;  %1627 = vmatpush1.bf16.msra.mxu1 %v5047_v62  ;;  %v5472_v62 = vld [vmem:[#allocation9 + $0x4] ss:$48 sps:$4 sm:$0xff]   ;;  %v5475_v63 = vld [vmem:[#allocation9 + $0xc] ss:$48 sps:$4 sm:$0xff]  }
 0x301   :  { %1767 = vmatprep.subr.bf16.mxu0 %v5165_v19  ;;  %1808 = vmatprep.subr.bf16.mxu1 %v5168_v9  ;;  %6631 = vst [vmem:[#allocation72_spill] sm:$0xff] %v5472_v62  ;;  %6632 = vst [vmem:[#allocation73_spill] sm:$0xff] %v5475_v63 }
 0x303   :  { %1604 = vmatmul.mubr.bf16.vlgmr.msra.gmra.mxu0 %v5250_v36  ;;  %1645 = vmatmul.mubr.bf16.vlgmr.msra.gmra.mxu1 %v5250_v36  ;;  %v5481_v36 = vld [vmem:[#allocation9 + $0x8] ss:$48 sps:$4 sm:$0xff]  }
 0x304   :  { %1768 = vmatpush1.bf16.msra.mxu0 %v5173_v7  ;;  %1809 = vmatpush1.bf16.msra.mxu1 %v5176_v17  ;;  %6634 = vst [vmem:[#allocation75_spill] sm:$0xff] %v5481_v36 }
 0x305   :  { %1769 = vmatprep.subr.bf16.mxu0 %v5179_v14  ;;  %1810 = vmatprep.subr.bf16.mxu1 %v5182_v3 }
 0x306   :  { %1799 = vmatprep.mubr.bf16.mxu0 %v6528_v33  ;;  %1840 = vmatprep.mubr.bf16.mxu1 %v6528_v33 }
 0x308   :  { %1770 = vmatpush1.bf16.msra.mxu0 %v5187_v11  ;;  %1811 = vmatpush1.bf16.msra.mxu1 %v5190_v10 }
 0x309   :  { %1771 = vmatprep.subr.bf16.mxu0 %v5193_v35  ;;  %1812 = vmatprep.subr.bf16.mxu1 %v5196_v12 }
 0x30c   :  { %1772 = vmatpush1.bf16.msra.mxu0 %v5199_v13  ;;  %1813 = vmatpush1.bf16.msra.mxu1 %v5202_v30 }
 0x30d   :  { %1773 = vmatprep.subr.bf16.mxu0 %v5205_v37  ;;  %1814 = vmatprep.subr.bf16.mxu1 %v5208_v38 }
 0x310   :  { %1774 = vmatpush1.bf16.msra.mxu0 %v5211_v39  ;;  %1815 = vmatpush1.bf16.msra.mxu1 %v5214_v40  ;;  %v1398_v39 = vld [vmem:[#allocation4 + $0xe0] sm:$0xff] }
 0x311   :  { %1775 = vmatprep.subr.bf16.mxu0 %v5217_v41  ;;  %1816 = vmatprep.subr.bf16.mxu1 %v5220_v42 }
 0x314   :  { %1776 = vmatpush1.bf16.msra.mxu0 %v5223_v43  ;;  %1817 = vmatpush1.bf16.msra.mxu1 %v5226_v44  ;;  %v1396_v44 = vld [vmem:[#allocation4 + $0xd0] sm:$0xff]  ;;  %v1395_v43 = vld [vmem:[#allocation4 + $0xc8] sm:$0xff] }
 0x315   :  { %1777 = vmatprep.subr.bf16.mxu0 %v5229_v45  ;;  %1818 = vmatprep.subr.bf16.mxu1 %v5451_v0  ;;  %v1394_v45 = vld [vmem:[#allocation4 + $0xc0] sm:$0xff] }
 0x318   :  { %1778 = vmatpush1.bf16.msra.mxu0 %v5454_v56  ;;  %1819 = vmatpush1.bf16.msra.mxu1 %v5457_v57 }
 0x319   :  { %1779 = vmatprep.subr.bf16.mxu0 %v5460_v58  ;;  %1820 = vmatprep.subr.bf16.mxu1 %v5463_v59 }
 0x31c   :  { %1780 = vmatpush1.bf16.msra.mxu0 %v5466_v60  ;;  %1821 = vmatpush1.bf16.msra.mxu1 %v5469_v61  ;;  %v5484_v60 = vld [vmem:[#allocation9 + $0x2b4] ss:$48 sps:$4 sm:$0xff]   ;;  %v5487_v61 = vld [vmem:[#allocation9 + $0x2bc] ss:$48 sps:$4 sm:$0xff]  }
 0x31d   :  { %1781 = vmatprep.subr.bf16.mxu0 %v5472_v62  ;;  %1822 = vmatprep.subr.bf16.mxu1 %v5475_v63  ;;  %6635 = vst [vmem:[#allocation76_spill] sm:$0xff] %v5484_v60  ;;  %6636 = vst [vmem:[#allocation77_spill] sm:$0xff] %v5487_v61 }
 0x320   :  { %1782 = vmatpush1.bf16.msra.mxu0 %v5478_v8  ;;  %1823 = vmatpush1.bf16.msra.mxu1 %v5481_v36 }
 0x321   :  { %1849 = vmatprep.subr.bf16.mxu0 %v5484_v60  ;;  %1890 = vmatprep.subr.bf16.mxu1 %v5487_v61  ;;  %v1397_v61 = vld [vmem:[#allocation4 + $0xd8] sm:$0xff] }
 0x383   :  { %v1441_v62 = vpop.f32.mrf.mxu0  ;;  %v1482_v59 = vpop.f32.mrf.mxu1 }
 0x384   :  { %v1653_v36 = vadd.f32 %v1441_v62, %v1394_v45  ;;  %v1655_v40 = vadd.f32 %v1482_v59, %v1396_v44 }
 0x385   :  { %v1443_v58 = vpop.f32.mrf.mxu0  ;;  %v1484_v63 = vpop.f32.mrf.mxu1 }
 0x386   :  { %v1654_v60 = vadd.f32 %v1443_v58, %v1395_v43  ;;  %v3720_v30 = vmul.f32 -1.442695, %v1653_v36  ;;  %v3722_v35 = vmul.f32 -1.442695, %v1655_v40  ;;  %v1400_v58 = vld [vmem:[#allocation4 + $0xf0] sm:$0xff] }
 0x387   :  { %v1445_v57 = vpop.f32.mrf.mxu0  ;;  %v1486_v56 = vpop.f32.mrf.mxu1 }
 0x388   :  { %v1399_v56 = vld [vmem:[#allocation4 + $0xe8] sm:$0xff]  ;;  %4031 = vpow2.f32 %v3720_v30 }
 0x389   :  { %v1446_v0 = vpop.f32.mrf.mxu0  ;;  %v1487_v8 = vpop.f32.mrf.mxu1  ;;  %4033 = vpow2.f32 %v3722_v35 }
 0x38a   :  { %v3721_v0 = vmul.f32 -1.442695, %v1654_v60  ;;  %v1656_v8 = vadd.f32 %v1484_v63, %v1397_v61 }
 0x38c   :  { %4035 = vpow2.f32 %v3721_v0  ;;  %v3723_v43 = vmul.f32 -1.442695, %v1656_v8  ;;  %v1404_v0 = vld [vmem:[#allocation4 + $0x110] sm:$0xff] }
 0x3a3   :  { %v1523_v42 = vpop.f32.mrf.mxu0  ;;  %v1564_v41 = vpop.f32.mrf.mxu1 }
 0x3a4   :  { %v1657_v57 = vadd.f32 %v1523_v42, %v1398_v39  ;;  %v1659_v42 = vadd.f32 %v1564_v41, %v1400_v58 }
 0x3a5   :  { %v1525_v38 = vpop.f32.mrf.mxu0  ;;  %v1566_v37 = vpop.f32.mrf.mxu1 }
 0x3a6   :  { %v1658_v45 = vadd.f32 %v1525_v38, %v1399_v56  ;;  %v3724_v62 = vmul.f32 -1.442695, %v1657_v57  ;;  %v3726_v35 = vmul.f32 -1.442695, %v1659_v42  ;;  %v1402_v56 = vld [vmem:[#allocation4 + $0x100] sm:$0xff] }
 0x3a7   :  { %v1527_v13 = vpop.f32.mrf.mxu0  ;;  %v1568_v12 = vpop.f32.mrf.mxu1 }
 0x3a8   :  { %v3725_v44 = vmul.f32 -1.442695, %v1658_v45  ;;  %4037 = vpow2.f32 %v3724_v62  ;;  %v4032_v13 = vpop.eup %4031  ;;  %v1401_v12 = vld [vmem:[#allocation4 + $0xf8] sm:$0xff] }
 0x3a9   :  { %v1528_v10 = vpop.f32.mrf.mxu0  ;;  %v1569_v11 = vpop.f32.mrf.mxu1  ;;  %4039 = vpow2.f32 %v3723_v43  ;;  %v1692_v59 = vadd.f32 1.0, %v4032_v13  ;;  %v1660_v60 = vadd.f32 %v1566_v37, %v1401_v12  ;;  %v1403_v37 = vld [vmem:[#allocation4 + $0x108] sm:$0xff] }
 0x3aa   :  { %4041 = vpow2.f32 %v3725_v44  ;;  %v4034_v40 = vpop.eup %4033  ;;  %v1405_v44 = vld [vmem:[#allocation4 + $0x118] sm:$0xff] }
 0x3ab   :  { %v4036_v39 = vpop.eup %4035  ;;  %v1694_v10 = vadd.f32 1.0, %v4034_v40  ;;  %4043 = vrcp.f32 %v1692_v59  ;;  %v3727_v61 = vmul.f32 -1.442695, %v1660_v60 }
 0x3ac   :  { %v1693_v30 = vadd.f32 1.0, %v4036_v39 }
 0x3ad   :  { %4045 = vrcp.f32 %v1694_v10 }
 0x3ae   :  { %4047 = vrcp.f32 %v1693_v30 }
 0x3af   :  { %4049 = vpow2.f32 %v3726_v35 }
 0x3b0   :  { %4051 = vpow2.f32 %v3727_v61 }
 0x3b5   :  { %v4038_v11 = vpop.eup %4037 }
 0x3b6   :  { %v4040_v38 = vpop.eup %4039  ;;  %v1696_v36 = vadd.f32 1.0, %v4038_v11 }
 0x3b7   :  { %v4042_v63 = vpop.eup %4041  ;;  %v1695_v57 = vadd.f32 1.0, %v4040_v38 }
 0x3b8   :  { %v1697_v8 = vadd.f32 1.0, %v4042_v63  ;;  %4053 = vrcp.f32 %v1696_v36  ;;  %v4044_v11 = vpop.eup %4043 }
 0x3b9   :  { %4055 = vrcp.f32 %v1695_v57 }
 0x3ba   :  { %v4046_v30 = vpop.eup %4045 }
 0x3bb   :  { %v4048_v38 = vpop.eup %4047 }
 0x3bc   :  { %v4050_v35 = vpop.eup %4049 }
 0x3bd   :  { %v4052_v61 = vpop.eup %4051 }
 0x3c3   :  { %v1605_v41 = vpop.f32.mrf.mxu0  ;;  %v1646_v45 = vpop.f32.mrf.mxu1 }
 0x3c4   :  { %v1661_v62 = vadd.f32 %v1605_v41, %v1402_v56  ;;  %v1663_v43 = vadd.f32 %v1646_v45, %v1404_v0  ;;  %v1698_v56 = vadd.f32 1.0, %v4050_v35  ;;  %v1699_v41 = vadd.f32 1.0, %v4052_v61  ;;  %v1740_v35 = vld [vmem:[#allocation7 + $0x40] sm:$0xff] }
 0x3c5   :  { %v1607_v58 = vpop.f32.mrf.mxu0  ;;  %v1648_v13 = vpop.f32.mrf.mxu1 }
 0x3c6   :  { %v3728_v12 = vmul.f32 -1.442695, %v1661_v62  ;;  %4057 = vtanh.f32 %v1663_v43  ;;  %v1662_v40 = vadd.f32 %v1607_v58, %v1403_v37  ;;  %v1664_v39 = vadd.f32 %v1648_v13, %v1405_v44  ;;  %v4054_v63 = vpop.eup %4053  ;;  %v1739_v62 = vld [vmem:[#allocation7 + $0x38] sm:$0xff] }
 0x3c7   :  { %4059 = vrcp.f32 %v1697_v8  ;;  %v1609_v42 = vpop.f32.mrf.mxu0  ;;  %v1650_v59 = vpop.f32.mrf.mxu1  ;;  %v1723_v8 = vmul.f32 %v4054_v63, %v5248_v53 }
 0x3c8   :  { %4061 = vpow2.f32 %v3728_v12  ;;  %v4056_v36 = vpop.eup %4055  ;;  %v1738_v42 = vld [vmem:[#allocation7 + $0x30] sm:$0xff] }
 0x3c9   :  { %4063 = vtanh.f32 %v1662_v40  ;;  %v1610_v60 = vpop.f32.mrf.mxu0  ;;  %v1651_v10 = vpop.f32.mrf.mxu1  ;;  %v1722_v12 = vmul.f32 %v4056_v36, %v5248_v53 }
 0x3ca   :  { %4065 = vtanh.f32 %v1664_v39 }
 0x3cb   :  { %4067 = vrcp.f32 %v1698_v56 }
 0x3cc   :  { %4069 = vrcp.f32 %v1699_v41 }
 0x3d3   :  { %v4058_v57 = vpop.eup %4057 }
 0x3d4   :  { %v4060_v0 = vpop.eup %4059  ;;  %v1726_v45 = vmul.f32 %v4058_v57, %v4048_v38 }
 0x3d5   :  { %v4062_v37 = vpop.eup %4061  ;;  %v1724_v59 = vmul.f32 %v4060_v0, %v5248_v53 }
 0x3d6   :  { %v4064_v43 = vpop.eup %4063  ;;  %v1700_v44 = vadd.f32 1.0, %v4062_v37  ;;  %v1729_v58 = vadd.f32 %v1726_v45, %v1723_v8 }
 0x3d7   :  { %v4066_v13 = vpop.eup %4065  ;;  %v1725_v40 = vmul.f32 %v4064_v43, %v4044_v11 }
 0x3d8   :  { %v1745_v39 = vmul.f32 %v1739_v62, %v1729_v58  ;;  %v1727_v60 = vmul.f32 %v4066_v13, %v4046_v30  ;;  %4071 = vtanh.f32 %v1729_v58  ;;  %v4068_v36 = vpop.eup %4067 }
 0x3d9   :  { %v1728_v10 = vadd.f32 %v1725_v40, %v1722_v12  ;;  %4073 = vrcp.f32 %v1700_v44  ;;  %v4070_v11 = vpop.eup %4069 }
 0x3da   :  { %v1730_v38 = vadd.f32 %v1727_v60, %v1724_v59  ;;  %v6640_v59 = vld [vmem:[#allocation45_spill] sm:$0xff]  ;;  %v6641_v60 = vld [vmem:[#allocation46_spill] sm:$0xff] }
 0x3db   :  { %4075 = vtanh.f32 %v1728_v10  ;;  %v1744_v61 = vmul.f32 %v1738_v42, %v1728_v10  ;;  %v6642_v10 = vld [vmem:[#allocation47_spill] sm:$0xff] }
 0x3dc   :  { %4077 = vtanh.f32 %v1730_v38  ;;  %v1746_v63 = vmul.f32 %v1740_v35, %v1730_v38  ;;  %v6644_v38 = vld [vmem:[#allocation49_spill] sm:$0xff] }
 0x3dd   :  { %v1748_v57 = vadd.f32 %v1745_v39, %v1744_v61  ;;  %v6638_v39 = vld [vmem:[#allocation43_spill] sm:$0xff]  ;;  %v6645_v61 = vld [vmem:[#allocation50_spill] sm:$0xff] }
 0x3df   :  { %v5493_v56 = vadd.f32 %v1748_v57, %v1746_v63  ;;  %v6646_v63 = vld [vmem:[#allocation51_spill] sm:$0xff]  ;;  %v6647_v57 = vld [vmem:[#allocation52_spill] sm:$0xff] }
 0x3e5   :  { %v4072_v41 = vpop.eup %4071 }
 0x3e6   :  { %v4074_v8 = vpop.eup %4073  ;;  %v1735_v45 = vmul.f32 %v4072_v41, %v4070_v11  ;;  %v6649_v11 = vld [vmem:[#allocation54_spill] sm:$0xff]  ;;  %v6650_v41 = vld [vmem:[#allocation55_spill] sm:$0xff] }
 0x3e8   :  { %v4076_v37 = vpop.eup %4075  ;;  %v1742_v43 = vmul.f32 %v1739_v62, %v1735_v45  ;;  %v6637_v62 = vld [vmem:[#allocation42_spill] sm:$0xff]  ;;  %v6652_v45 = vld [vmem:[#allocation57_spill] sm:$0xff] }
 0x3e9   :  { %v4078_v53 = vpop.eup %4077  ;;  %v1734_v30 = vmul.f32 %v4076_v37, %v4068_v36  ;;  %v6648_v36 = vld [vmem:[#allocation53_spill] sm:$0xff]  ;;  %v6653_v37 = vld [vmem:[#allocation58_spill] sm:$0xff] }
 0x3ea   :  { %v1736_v0 = vmul.f32 %v4078_v53, %v4074_v8  ;;  %v6651_v8 = vld [vmem:[#allocation56_spill] sm:$0xff]  ;;  %v6654_v53 = vld [vmem:[#allocation59_spill] sm:$0xff] }
 0x3eb   :  { %v1741_v58 = vmul.f32 %v1738_v42, %v1734_v30  ;;  %v6639_v42 = vld [vmem:[#allocation44_spill] sm:$0xff] }
 0x3ec   :  { %v1743_v44 = vmul.f32 %v1740_v35, %v1736_v0  ;;  %v6643_v35 = vld [vmem:[#allocation48_spill] sm:$0xff]  ;;  %v6656_v0 = vld [vmem:[#allocation22_spill] sm:$0xff] }
 0x3ed   :  { %v1747_v13 = vadd.f32 %v1742_v43, %v1741_v58  ;;  %v6655_v30 = vld [vmem:[#allocation60_spill] sm:$0xff]  ;;  %v6657_v43 = vld [vmem:[#allocation23_spill] sm:$0xff] }
 0x3ee   :  { %v6658_v58 = vld [vmem:[#allocation24_spill] sm:$0xff] }
 0x3ef   :  { %v1749_v12 = vadd.f32 %v1747_v13, %v1743_v44  ;;  %v5557_v44 = vld [vmem:[#allocation9 + $0xe0] ss:$48 sps:$4 sm:$0xff]   ;;  %v5560_v13 = vld [vmem:[#allocation9 + $0xe8] ss:$48 sps:$4 sm:$0xff]  }
 0x3f0   :  { %6659 = vst [vmem:[#allocation42_spill] sm:$0xff] %v5557_v44  ;;  %6660 = vst [vmem:[#allocation43_spill] sm:$0xff] %v5560_v13 }
 0x3f1   :  { %1752 = vst [vmem:[#allocation13 + $0x10] sm:$0xff] %v1749_v12  ;;  %v5495_v40 = vpack.c.bf16 %v1749_v12, %v1749_v12  ;;  %v5563_v12 = vld [vmem:[#allocation9 + $0x84] ss:$48 sps:$4 sm:$0xff]  }
 0x3f2   :  { %6661 = vst [vmem:[#allocation44_spill] sm:$0xff] %v5563_v12 }
 0x3f3   :  { %1800 = vmatmul.mubr.bf16.vlgmr.msra.gmra.mxu0 %v5495_v40  ;;  %1841 = vmatmul.mubr.bf16.vlgmr.msra.gmra.mxu1 %v5495_v40 }
 0x3f4   :  { %1850 = vmatpush1.bf16.msra.mxu0 %v5254_v2  ;;  %1891 = vmatpush1.bf16.msra.mxu1 %v5257_v31 }
 0x3f5   :  { %1851 = vmatprep.subr.bf16.mxu0 %v5260_v6  ;;  %1892 = vmatprep.subr.bf16.mxu1 %v5263_v34 }
 0x3f6   :  { %1881 = vmatprep.mubr.bf16.mxu0 %v6528_v33  ;;  %1922 = vmatprep.mubr.bf16.mxu1 %v6528_v33 }
 0x3f8   :  { %1852 = vmatpush1.bf16.msra.mxu0 %v5268_v46  ;;  %1893 = vmatpush1.bf16.msra.mxu1 %v5271_v47 }
 0x3f9   :  { %1853 = vmatprep.subr.bf16.mxu0 %v5274_v48  ;;  %1894 = vmatprep.subr.bf16.mxu1 %v5277_v22 }
 0x3fc   :  { %1854 = vmatpush1.bf16.msra.mxu0 %v5280_v23  ;;  %1895 = vmatpush1.bf16.msra.mxu1 %v5283_v24 }
 0x3fd   :  { %1855 = vmatprep.subr.bf16.mxu0 %v5286_v25  ;;  %1896 = vmatprep.subr.bf16.mxu1 %v5289_v49 }
 0x400   :  { %1856 = vmatpush1.bf16.msra.mxu0 %v5292_v50  ;;  %1897 = vmatpush1.bf16.msra.mxu1 %v5295_v27 }
 0x401   :  { %1857 = vmatprep.subr.bf16.mxu0 %v5298_v51  ;;  %1898 = vmatprep.subr.bf16.mxu1 %v5301_v28 }
 0x404   :  { %1858 = vmatpush1.bf16.msra.mxu0 %v5304_v26  ;;  %1899 = vmatpush1.bf16.msra.mxu1 %v5307_v52 }
 0x405   :  { %1859 = vmatprep.subr.bf16.mxu0 %v5310_v54  ;;  %1900 = vmatprep.subr.bf16.mxu1 %v5313_v55 }
 0x408   :  { %1860 = vmatpush1.bf16.msra.mxu0 %v5316_v15  ;;  %1901 = vmatpush1.bf16.msra.mxu1 %v5319_v16 }
 0x409   :  { %1861 = vmatprep.subr.bf16.mxu0 %v5322_v1  ;;  %1902 = vmatprep.subr.bf16.mxu1 %v5325_v29 }
 0x40c   :  { %1862 = vmatpush1.bf16.msra.mxu0 %v6637_v62  ;;  %1903 = vmatpush1.bf16.msra.mxu1 %v6638_v39 }
 0x40d   :  { %1863 = vmatprep.subr.bf16.mxu0 %v6639_v42  ;;  %1904 = vmatprep.subr.bf16.mxu1 %v6640_v59 }
 0x410   :  { %1864 = vmatpush1.bf16.msra.mxu0 %v6641_v60  ;;  %1905 = vmatpush1.bf16.msra.mxu1 %v6642_v10 }
 0x411   :  { %1931 = vmatprep.subr.bf16.mxu0 %v6643_v35  ;;  %1972 = vmatprep.subr.bf16.mxu1 %v6644_v38 }
 0x413   :  { %1882 = vmatmul.mubr.bf16.vlgmr.msra.gmra.mxu0 %v5495_v40  ;;  %1923 = vmatmul.mubr.bf16.vlgmr.msra.gmra.mxu1 %v5495_v40 }
 0x414   :  { %1932 = vmatpush1.bf16.msra.mxu0 %v6645_v61  ;;  %1973 = vmatpush1.bf16.msra.mxu1 %v6646_v63 }
 0x415   :  { %1933 = vmatprep.subr.bf16.mxu0 %v6647_v57  ;;  %1974 = vmatprep.subr.bf16.mxu1 %v6648_v36 }
 0x416   :  { %1963 = vmatprep.mubr.bf16.mxu0 %v6528_v33  ;;  %2004 = vmatprep.mubr.bf16.mxu1 %v6528_v33 }
 0x418   :  { %1934 = vmatpush1.bf16.msra.mxu0 %v6649_v11  ;;  %1975 = vmatpush1.bf16.msra.mxu1 %v6650_v41 }
 0x419   :  { %1935 = vmatprep.subr.bf16.mxu0 %v6651_v8  ;;  %1976 = vmatprep.subr.bf16.mxu1 %v6652_v45 }
 0x41c   :  { %1936 = vmatpush1.bf16.msra.mxu0 %v6653_v37  ;;  %1977 = vmatpush1.bf16.msra.mxu1 %v6654_v53 }
 0x41d   :  { %1937 = vmatprep.subr.bf16.mxu0 %v6655_v30  ;;  %1978 = vmatprep.subr.bf16.mxu1 %v6656_v0  ;;  %v1758_v0 = vld [vmem:[#allocation4 + $0x140] sm:$0xff] }
 0x420   :  { %1938 = vmatpush1.bf16.msra.mxu0 %v6657_v43  ;;  %1979 = vmatpush1.bf16.msra.mxu1 %v6658_v58 }
 0x421   :  { %1939 = vmatprep.subr.bf16.mxu0 %v5398_v4  ;;  %1980 = vmatprep.subr.bf16.mxu1 %v5401_v20  ;;  %v5566_v20 = vld [vmem:[#allocation9 + $0x8c] ss:$48 sps:$4 sm:$0xff]  }
 0x422   :  { %6662 = vst [vmem:[#allocation45_spill] sm:$0xff] %v5566_v20  ;;  %v1755_v4 = vld [vmem:[#allocation4 + $0x128] sm:$0xff] }
 0x424   :  { %1940 = vmatpush1.bf16.msra.mxu0 %v5404_v32  ;;  %1981 = vmatpush1.bf16.msra.mxu1 %v5407_v18  ;;  %v5569_v18 = vld [vmem:[#allocation9 + $0x80] ss:$48 sps:$4 sm:$0xff]  }
 0x425   :  { %1941 = vmatprep.subr.bf16.mxu0 %v5410_v21  ;;  %1982 = vmatprep.subr.bf16.mxu1 %v5413_v5  ;;  %6663 = vst [vmem:[#allocation46_spill] sm:$0xff] %v5569_v18  ;;  %v5572_v5 = vld [vmem:[#allocation9 + $0x88] ss:$48 sps:$4 sm:$0xff]   ;;  %v1754_v32 = vld [vmem:[#allocation4 + $0x120] sm:$0xff] }
 0x426   :  { %6664 = vst [vmem:[#allocation47_spill] sm:$0xff] %v5572_v5 }
 0x428   :  { %1942 = vmatpush1.bf16.msra.mxu0 %v5557_v44  ;;  %1983 = vmatpush1.bf16.msra.mxu1 %v5560_v13  ;;  %v5575_v44 = vld [vmem:[#allocation9 + $0x24] ss:$48 sps:$4 sm:$0xff]   ;;  %v5578_v13 = vld [vmem:[#allocation9 + $0x2c] ss:$48 sps:$4 sm:$0xff]  }
 0x429   :  { %1943 = vmatprep.subr.bf16.mxu0 %v5563_v12  ;;  %1984 = vmatprep.subr.bf16.mxu1 %v5566_v20  ;;  %6665 = vst [vmem:[#allocation48_spill] sm:$0xff] %v5575_v44  ;;  %6666 = vst [vmem:[#allocation49_spill] sm:$0xff] %v5578_v13  ;;  %v5581_v12 = vld [vmem:[#allocation9 + $0x20] ss:$48 sps:$4 sm:$0xff]   ;;  %v5584_v20 = vld [vmem:[#allocation9 + $0x28] ss:$48 sps:$4 sm:$0xff]  }
 0x42a   :  { %6667 = vst [vmem:[#allocation50_spill] sm:$0xff] %v5581_v12  ;;  %6668 = vst [vmem:[#allocation51_spill] sm:$0xff] %v5584_v20 }
 0x42c   :  { %1944 = vmatpush1.bf16.msra.mxu0 %v5569_v18  ;;  %1985 = vmatpush1.bf16.msra.mxu1 %v5572_v5 }
 0x42d   :  { %1945 = vmatprep.subr.bf16.mxu0 %v5575_v44  ;;  %1986 = vmatprep.subr.bf16.mxu1 %v5578_v13  ;;  %v6678_v13 = vld [vmem:[#allocation36_spill] sm:$0xff]  ;;  %v6679_v44 = vld [vmem:[#allocation37_spill] sm:$0xff] }
 0x430   :  { %1946 = vmatpush1.bf16.msra.mxu0 %v5581_v12  ;;  %1987 = vmatpush1.bf16.msra.mxu1 %v5584_v20  ;;  %v6669_v20 = vld [vmem:[#allocation27_spill] sm:$0xff]  ;;  %v6672_v12 = vld [vmem:[#allocation30_spill] sm:$0xff] }
 0x431   :  { %2127 = vmatprep.subr.bf16.mxu0 %v5165_v19  ;;  %2168 = vmatprep.subr.bf16.mxu1 %v5168_v9  ;;  %v6670_v19 = vld [vmem:[#allocation28_spill] sm:$0xff]  ;;  %v6671_v9 = vld [vmem:[#allocation29_spill] sm:$0xff] }
 0x433   :  { %1964 = vmatmul.mubr.bf16.vlgmr.msra.gmra.mxu0 %v5495_v40  ;;  %2005 = vmatmul.mubr.bf16.vlgmr.msra.gmra.mxu1 %v5495_v40  ;;  %v6673_v40 = vld [vmem:[#allocation31_spill] sm:$0xff] }
 0x434   :  { %2128 = vmatpush1.bf16.msra.mxu0 %v5173_v7  ;;  %2169 = vmatpush1.bf16.msra.mxu1 %v5176_v17  ;;  %v6674_v7 = vld [vmem:[#allocation32_spill] sm:$0xff]  ;;  %v6675_v17 = vld [vmem:[#allocation33_spill] sm:$0xff] }
 0x435   :  { %2129 = vmatprep.subr.bf16.mxu0 %v5179_v14  ;;  %2170 = vmatprep.subr.bf16.mxu1 %v5182_v3  ;;  %v6676_v14 = vld [vmem:[#allocation34_spill] sm:$0xff]  ;;  %v6677_v3 = vld [vmem:[#allocation35_spill] sm:$0xff] }
 0x436   :  { %2159 = vmatprep.mubr.bf16.mxu0 %v6528_v33  ;;  %2200 = vmatprep.mubr.bf16.mxu1 %v6528_v33 }
 0x438   :  { %2130 = vmatpush1.bf16.msra.mxu0 %v6669_v20  ;;  %2171 = vmatpush1.bf16.msra.mxu1 %v6670_v19  ;;  %v6680_v20 = vld [vmem:[#allocation38_spill] sm:$0xff]  ;;  %v6681_v19 = vld [vmem:[#allocation39_spill] sm:$0xff] }
 0x439   :  { %2131 = vmatprep.subr.bf16.mxu0 %v6671_v9  ;;  %2172 = vmatprep.subr.bf16.mxu1 %v6672_v12  ;;  %v6682_v9 = vld [vmem:[#allocation40_spill] sm:$0xff]  ;;  %v6683_v12 = vld [vmem:[#allocation41_spill] sm:$0xff] }
 0x43c   :  { %2132 = vmatpush1.bf16.msra.mxu0 %v6673_v40  ;;  %2173 = vmatpush1.bf16.msra.mxu1 %v6674_v7  ;;  %v6684_v40 = vld [vmem:[#allocation65_spill] sm:$0xff]  ;;  %v6685_v7 = vld [vmem:[#allocation66_spill] sm:$0xff] }
 0x43d   :  { %2133 = vmatprep.subr.bf16.mxu0 %v6675_v17  ;;  %2174 = vmatprep.subr.bf16.mxu1 %v6676_v14  ;;  %v6686_v17 = vld [vmem:[#allocation67_spill] sm:$0xff]  ;;  %v6687_v14 = vld [vmem:[#allocation68_spill] sm:$0xff] }
 0x440   :  { %2134 = vmatpush1.bf16.msra.mxu0 %v6677_v3  ;;  %2175 = vmatpush1.bf16.msra.mxu1 %v6678_v13  ;;  %v6688_v3 = vld [vmem:[#allocation69_spill] sm:$0xff]  ;;  %v6689_v13 = vld [vmem:[#allocation70_spill] sm:$0xff] }
 0x441   :  { %2135 = vmatprep.subr.bf16.mxu0 %v6679_v44  ;;  %2176 = vmatprep.subr.bf16.mxu1 %v6680_v20  ;;  %v6690_v44 = vld [vmem:[#allocation71_spill] sm:$0xff]  ;;  %v6691_v20 = vld [vmem:[#allocation72_spill] sm:$0xff] }
 0x444   :  { %2136 = vmatpush1.bf16.msra.mxu0 %v6681_v19  ;;  %2177 = vmatpush1.bf16.msra.mxu1 %v6682_v9  ;;  %v6692_v19 = vld [vmem:[#allocation73_spill] sm:$0xff]  ;;  %v6693_v9 = vld [vmem:[#allocation74_spill] sm:$0xff] }
 0x445   :  { %2137 = vmatprep.subr.bf16.mxu0 %v6683_v12  ;;  %2178 = vmatprep.subr.bf16.mxu1 %v6684_v40  ;;  %v6694_v12 = vld [vmem:[#allocation75_spill] sm:$0xff]  ;;  %v6695_v40 = vld [vmem:[#allocation76_spill] sm:$0xff] }
 0x448   :  { %2138 = vmatpush1.bf16.msra.mxu0 %v6685_v7  ;;  %2179 = vmatpush1.bf16.msra.mxu1 %v6686_v17  ;;  %v6696_v7 = vld [vmem:[#allocation77_spill] sm:$0xff] }
 0x449   :  { %2139 = vmatprep.subr.bf16.mxu0 %v6687_v14  ;;  %2180 = vmatprep.subr.bf16.mxu1 %v6688_v3 }
 0x44c   :  { %2140 = vmatpush1.bf16.msra.mxu0 %v6689_v13  ;;  %2181 = vmatpush1.bf16.msra.mxu1 %v6690_v44 }
 0x44d   :  { %2141 = vmatprep.subr.bf16.mxu0 %v6691_v20  ;;  %2182 = vmatprep.subr.bf16.mxu1 %v6692_v19  ;;  %v1756_v20 = vld [vmem:[#allocation4 + $0x130] sm:$0xff] }
 0x450   :  { %2142 = vmatpush1.bf16.msra.mxu0 %v6693_v9  ;;  %2183 = vmatpush1.bf16.msra.mxu1 %v6694_v12 }
 0x451   :  { %2209 = vmatprep.subr.bf16.mxu0 %v6695_v40  ;;  %2250 = vmatprep.subr.bf16.mxu1 %v6696_v7  ;;  %v1757_v7 = vld [vmem:[#allocation4 + $0x138] sm:$0xff] }
 0x4b3   :  { %v1801_v17 = vpop.f32.mrf.mxu0  ;;  %v1842_v14 = vpop.f32.mrf.mxu1 }
 0x4b4   :  { %v2013_v19 = vadd.f32 %v1801_v17, %v1754_v32  ;;  %v2015_v43 = vadd.f32 %v1842_v14, %v1756_v20  ;;  %v1760_v14 = vld [vmem:[#allocation4 + $0x150] sm:$0xff] }
 0x4b5   :  { %v1803_v5 = vpop.f32.mrf.mxu0  ;;  %v1844_v3 = vpop.f32.mrf.mxu1 }
 0x4b6   :  { %v2014_v12 = vadd.f32 %v1803_v5, %v1755_v4  ;;  %v3729_v53 = vmul.f32 -1.442695, %v2013_v19  ;;  %v3731_v8 = vmul.f32 -1.442695, %v2015_v43 }
 0x4b7   :  { %v1805_v18 = vpop.f32.mrf.mxu0  ;;  %v1846_v13 = vpop.f32.mrf.mxu1 }
 0x4b8   :  { %v1759_v13 = vld [vmem:[#allocation4 + $0x148] sm:$0xff]  ;;  %4079 = vpow2.f32 %v3729_v53 }
 0x4b9   :  { %v1806_v21 = vpop.f32.mrf.mxu0  ;;  %v1847_v44 = vpop.f32.mrf.mxu1  ;;  %4081 = vpow2.f32 %v3731_v8 }
 0x4ba   :  { %v3730_v21 = vmul.f32 -1.442695, %v2014_v12  ;;  %v2016_v44 = vadd.f32 %v1844_v3, %v1757_v7 }
 0x4bc   :  { %4083 = vpow2.f32 %v3730_v21  ;;  %v3732_v4 = vmul.f32 -1.442695, %v2016_v44  ;;  %v1764_v21 = vld [vmem:[#allocation4 + $0x170] sm:$0xff] }
 0x4d3   :  { %v1883_v58 = vpop.f32.mrf.mxu0  ;;  %v1924_v9 = vpop.f32.mrf.mxu1 }
 0x4d4   :  { %v2017_v18 = vadd.f32 %v1883_v58, %v1758_v0  ;;  %v2019_v58 = vadd.f32 %v1924_v9, %v1760_v14 }
 0x4d5   :  { %v1885_v40 = vpop.f32.mrf.mxu0  ;;  %v1926_v30 = vpop.f32.mrf.mxu1 }
 0x4d6   :  { %v2018_v32 = vadd.f32 %v1885_v40, %v1759_v13  ;;  %v3733_v17 = vmul.f32 -1.442695, %v2017_v18  ;;  %v3735_v8 = vmul.f32 -1.442695, %v2019_v58  ;;  %v1762_v13 = vld [vmem:[#allocation4 + $0x160] sm:$0xff] }
 0x4d7   :  { %v1887_v37 = vpop.f32.mrf.mxu0  ;;  %v1928_v45 = vpop.f32.mrf.mxu1 }
 0x4d8   :  { %v3734_v5 = vmul.f32 -1.442695, %v2018_v32  ;;  %4085 = vpow2.f32 %v3733_v17  ;;  %v4080_v37 = vpop.eup %4079  ;;  %v1761_v45 = vld [vmem:[#allocation4 + $0x158] sm:$0xff] }
 0x4d9   :  { %v1888_v41 = vpop.f32.mrf.mxu0  ;;  %v1929_v11 = vpop.f32.mrf.mxu1  ;;  %4087 = vpow2.f32 %v3732_v4  ;;  %v2052_v20 = vadd.f32 1.0, %v4080_v37  ;;  %v2020_v7 = vadd.f32 %v1926_v30, %v1761_v45  ;;  %v1763_v30 = vld [vmem:[#allocation4 + $0x168] sm:$0xff] }
 0x4da   :  { %4089 = vpow2.f32 %v3734_v5  ;;  %v4082_v43 = vpop.eup %4081  ;;  %v1765_v5 = vld [vmem:[#allocation4 + $0x178] sm:$0xff] }
 0x4db   :  { %v4084_v0 = vpop.eup %4083  ;;  %v2054_v41 = vadd.f32 1.0, %v4082_v43  ;;  %4091 = vrcp.f32 %v2052_v20  ;;  %v3736_v3 = vmul.f32 -1.442695, %v2020_v7 }
 0x4dc   :  { %v2053_v53 = vadd.f32 1.0, %v4084_v0 }
 0x4dd   :  { %4093 = vrcp.f32 %v2054_v41 }
 0x4de   :  { %4095 = vrcp.f32 %v2053_v53 }
 0x4df   :  { %4097 = vpow2.f32 %v3735_v8 }
 0x4e0   :  { %4099 = vpow2.f32 %v3736_v3 }
 0x4e5   :  { %v4086_v11 = vpop.eup %4085 }
 0x4e6   :  { %v4088_v40 = vpop.eup %4087  ;;  %v2056_v12 = vadd.f32 1.0, %v4086_v11 }
 0x4e7   :  { %v4090_v19 = vpop.eup %4089  ;;  %v2055_v18 = vadd.f32 1.0, %v4088_v40 }
 0x4e8   :  { %v2057_v44 = vadd.f32 1.0, %v4090_v19  ;;  %4101 = vrcp.f32 %v2056_v12  ;;  %v4092_v11 = vpop.eup %4091 }
 0x4e9   :  { %4103 = vrcp.f32 %v2055_v18 }
 0x4ea   :  { %v4094_v53 = vpop.eup %4093 }
 0x4eb   :  { %v4096_v40 = vpop.eup %4095 }
 0x4ec   :  { %v4098_v8 = vpop.eup %4097 }
 0x4ed   :  { %v4100_v3 = vpop.eup %4099 }
 0x4f3   :  { %v1965_v9 = vpop.f32.mrf.mxu0  ;;  %v2006_v32 = vpop.f32.mrf.mxu1 }
 0x4f4   :  { %v2021_v17 = vadd.f32 %v1965_v9, %v1762_v13  ;;  %v2023_v4 = vadd.f32 %v2006_v32, %v1764_v21  ;;  %v2058_v13 = vadd.f32 1.0, %v4098_v8  ;;  %v2059_v9 = vadd.f32 1.0, %v4100_v3  ;;  %v2100_v8 = vld [vmem:[#allocation7 + $0x58] sm:$0xff] }
 0x4f5   :  { %v1967_v14 = vpop.f32.mrf.mxu0  ;;  %v2008_v37 = vpop.f32.mrf.mxu1 }
 0x4f6   :  { %v3737_v45 = vmul.f32 -1.442695, %v2021_v17  ;;  %4105 = vtanh.f32 %v2023_v4  ;;  %v2022_v43 = vadd.f32 %v1967_v14, %v1763_v30  ;;  %v2024_v0 = vadd.f32 %v2008_v37, %v1765_v5  ;;  %v4102_v19 = vpop.eup %4101  ;;  %v2099_v17 = vld [vmem:[#allocation7 + $0x50] sm:$0xff] }
 0x4f7   :  { %4107 = vrcp.f32 %v2057_v44  ;;  %v1969_v58 = vpop.f32.mrf.mxu0  ;;  %v2010_v20 = vpop.f32.mrf.mxu1  ;;  %v2083_v44 = vmul.f32 %v4102_v19, %v5493_v56 }
 0x4f8   :  { %4109 = vpow2.f32 %v3737_v45  ;;  %v4104_v12 = vpop.eup %4103  ;;  %v2098_v58 = vld [vmem:[#allocation7 + $0x48] sm:$0xff] }
 0x4f9   :  { %4111 = vtanh.f32 %v2022_v43  ;;  %v1970_v7 = vpop.f32.mrf.mxu0  ;;  %v2011_v41 = vpop.f32.mrf.mxu1  ;;  %v2082_v45 = vmul.f32 %v4104_v12, %v5493_v56 }
 0x4fa   :  { %4113 = vtanh.f32 %v2024_v0 }
 0x4fb   :  { %4115 = vrcp.f32 %v2058_v13 }
 0x4fc   :  { %4117 = vrcp.f32 %v2059_v9 }
 0x503   :  { %v4106_v18 = vpop.eup %4105 }
 0x504   :  { %v4108_v21 = vpop.eup %4107  ;;  %v2086_v32 = vmul.f32 %v4106_v18, %v4096_v40 }
 0x505   :  { %v4110_v30 = vpop.eup %4109  ;;  %v2084_v20 = vmul.f32 %v4108_v21, %v5493_v56 }
 0x506   :  { %v4112_v4 = vpop.eup %4111  ;;  %v2060_v5 = vadd.f32 1.0, %v4110_v30  ;;  %v2089_v14 = vadd.f32 %v2086_v32, %v2083_v44 }
 0x507   :  { %v4114_v37 = vpop.eup %4113  ;;  %v2085_v43 = vmul.f32 %v4112_v4, %v4092_v11 }
 0x508   :  { %v2105_v0 = vmul.f32 %v2099_v17, %v2089_v14  ;;  %v2087_v7 = vmul.f32 %v4114_v37, %v4094_v53  ;;  %4119 = vtanh.f32 %v2089_v14  ;;  %v4116_v12 = vpop.eup %4115 }
 0x509   :  { %v2088_v41 = vadd.f32 %v2085_v43, %v2082_v45  ;;  %4121 = vrcp.f32 %v2060_v5  ;;  %v4118_v11 = vpop.eup %4117 }
 0x50a   :  { %v2090_v40 = vadd.f32 %v2087_v7, %v2084_v20  ;;  %v5745_v20 = vld [vmem:[#allocation9 + $0x18c] ss:$48 sps:$4 sm:$0xff]   ;;  %v5748_v7 = vld [vmem:[#allocation9 + $0x180] ss:$48 sps:$4 sm:$0xff]  }
 0x50b   :  { %4123 = vtanh.f32 %v2088_v41  ;;  %v2104_v3 = vmul.f32 %v2098_v58, %v2088_v41  ;;  %6730 = vst [vmem:[#allocation32_spill] sm:$0xff] %v5745_v20  ;;  %6731 = vst [vmem:[#allocation33_spill] sm:$0xff] %v5748_v7  ;;  %v5751_v41 = vld [vmem:[#allocation9 + $0x188] ss:$48 sps:$4 sm:$0xff]  }
 0x50c   :  { %4125 = vtanh.f32 %v2090_v40  ;;  %v2106_v19 = vmul.f32 %v2100_v8, %v2090_v40  ;;  %6732 = vst [vmem:[#allocation34_spill] sm:$0xff] %v5751_v41  ;;  %v5757_v40 = vld [vmem:[#allocation9 + $0x12c] ss:$48 sps:$4 sm:$0xff]  }
 0x50d   :  { %v2108_v18 = vadd.f32 %v2105_v0, %v2104_v3  ;;  %v5739_v0 = vld [vmem:[#allocation9 + $0x1e8] ss:$48 sps:$4 sm:$0xff]   ;;  %6734 = vst [vmem:[#allocation36_spill] sm:$0xff] %v5757_v40  ;;  %v5760_v3 = vld [vmem:[#allocation9 + $0x120] ss:$48 sps:$4 sm:$0xff]  }
 0x50e   :  { %6728 = vst [vmem:[#allocation30_spill] sm:$0xff] %v5739_v0  ;;  %6735 = vst [vmem:[#allocation37_spill] sm:$0xff] %v5760_v3 }
 0x50f   :  { %v5628_v13 = vadd.f32 %v2108_v18, %v2106_v19  ;;  %v5763_v19 = vld [vmem:[#allocation9 + $0x128] ss:$48 sps:$4 sm:$0xff]   ;;  %v5766_v18 = vld [vmem:[#allocation9 + $0xc4] ss:$48 sps:$4 sm:$0xff]  }
 0x510   :  { %6736 = vst [vmem:[#allocation38_spill] sm:$0xff] %v5763_v19  ;;  %6737 = vst [vmem:[#allocation39_spill] sm:$0xff] %v5766_v18 }
 0x515   :  { %v4120_v9 = vpop.eup %4119 }
 0x516   :  { %v4122_v44 = vpop.eup %4121  ;;  %v2095_v32 = vmul.f32 %v4120_v9, %v4118_v11  ;;  %v6739_v11 = vld [vmem:[#allocation66_spill] sm:$0xff]  ;;  %v6740_v9 = vld [vmem:[#allocation67_spill] sm:$0xff] }
 0x518   :  { %v4124_v30 = vpop.eup %4123  ;;  %v2102_v4 = vmul.f32 %v2099_v17, %v2095_v32  ;;  %v5736_v17 = vld [vmem:[#allocation9 + $0x1e0] ss:$48 sps:$4 sm:$0xff]   ;;  %v6742_v32 = vld [vmem:[#allocation69_spill] sm:$0xff] }
 0x519   :  { %v4126_v56 = vpop.eup %4125  ;;  %v2094_v53 = vmul.f32 %v4124_v30, %v4116_v12  ;;  %6727 = vst [vmem:[#allocation29_spill] sm:$0xff] %v5736_v17  ;;  %v6738_v12 = vld [vmem:[#allocation65_spill] sm:$0xff]  ;;  %v6743_v30 = vld [vmem:[#allocation70_spill] sm:$0xff] }
 0x51a   :  { %v2096_v21 = vmul.f32 %v4126_v56, %v4122_v44  ;;  %v6741_v44 = vld [vmem:[#allocation68_spill] sm:$0xff]  ;;  %v6744_v56 = vld [vmem:[#allocation71_spill] sm:$0xff] }
 0x51b   :  { %v2101_v14 = vmul.f32 %v2098_v58, %v2094_v53  ;;  %v5742_v58 = vld [vmem:[#allocation9 + $0x184] ss:$48 sps:$4 sm:$0xff]  }
 0x51c   :  { %v2103_v5 = vmul.f32 %v2100_v8, %v2096_v21  ;;  %6729 = vst [vmem:[#allocation31_spill] sm:$0xff] %v5742_v58  ;;  %v5754_v8 = vld [vmem:[#allocation9 + $0x124] ss:$48 sps:$4 sm:$0xff]   ;;  %v6746_v21 = vld [vmem:[#allocation73_spill] sm:$0xff] }
 0x51d   :  { %v2107_v37 = vadd.f32 %v2102_v4, %v2101_v14  ;;  %6733 = vst [vmem:[#allocation35_spill] sm:$0xff] %v5754_v8  ;;  %v6745_v53 = vld [vmem:[#allocation72_spill] sm:$0xff]  ;;  %v6747_v4 = vld [vmem:[#allocation74_spill] sm:$0xff]  ;;  %v6748_v14 = vld [vmem:[#allocation75_spill] sm:$0xff] }
 0x51f   :  { %v2109_v45 = vadd.f32 %v2107_v37, %v2103_v5  ;;  %v6749_v5 = vld [vmem:[#allocation76_spill] sm:$0xff]  ;;  %v6750_v37 = vld [vmem:[#allocation77_spill] sm:$0xff] }
 0x521   :  { %2112 = vst [vmem:[#allocation13 + $0x18] sm:$0xff] %v2109_v45  ;;  %v5630_v43 = vpack.c.bf16 %v2109_v45, %v2109_v45 }
 0x523   :  { %2160 = vmatmul.mubr.bf16.vlgmr.msra.gmra.mxu0 %v5630_v43  ;;  %2201 = vmatmul.mubr.bf16.vlgmr.msra.gmra.mxu1 %v5630_v43 }
 0x524   :  { %2210 = vmatpush1.bf16.msra.mxu0 %v5254_v2  ;;  %2251 = vmatpush1.bf16.msra.mxu1 %v5257_v31  ;;  %v6697_v2 = vld [vmem:[#allocation54_spill] sm:$0xff]  ;;  %v6698_v31 = vld [vmem:[#allocation55_spill] sm:$0xff] }
 0x525   :  { %2211 = vmatprep.subr.bf16.mxu0 %v5260_v6  ;;  %2252 = vmatprep.subr.bf16.mxu1 %v5263_v34  ;;  %v6699_v6 = vld [vmem:[#allocation56_spill] sm:$0xff]  ;;  %v6700_v34 = vld [vmem:[#allocation57_spill] sm:$0xff] }
 0x526   :  { %2241 = vmatprep.mubr.bf16.mxu0 %v6528_v33  ;;  %2282 = vmatprep.mubr.bf16.mxu1 %v6528_v33 }
 0x528   :  { %2212 = vmatpush1.bf16.msra.mxu0 %v5268_v46  ;;  %2253 = vmatpush1.bf16.msra.mxu1 %v5271_v47  ;;  %v6701_v46 = vld [vmem:[#allocation58_spill] sm:$0xff]  ;;  %v6702_v47 = vld [vmem:[#allocation59_spill] sm:$0xff] }
 0x529   :  { %2213 = vmatprep.subr.bf16.mxu0 %v5274_v48  ;;  %2254 = vmatprep.subr.bf16.mxu1 %v5277_v22  ;;  %v6703_v48 = vld [vmem:[#allocation60_spill] sm:$0xff]  ;;  %v6704_v22 = vld [vmem:[#allocation22_spill] sm:$0xff] }
 0x52c   :  { %2214 = vmatpush1.bf16.msra.mxu0 %v5280_v23  ;;  %2255 = vmatpush1.bf16.msra.mxu1 %v5283_v24  ;;  %v6705_v23 = vld [vmem:[#allocation23_spill] sm:$0xff]  ;;  %v6706_v24 = vld [vmem:[#allocation24_spill] sm:$0xff] }
 0x52d   :  { %2215 = vmatprep.subr.bf16.mxu0 %v5286_v25  ;;  %2256 = vmatprep.subr.bf16.mxu1 %v5289_v49  ;;  %v6707_v25 = vld [vmem:[#allocation25_spill] sm:$0xff]  ;;  %v6708_v49 = vld [vmem:[#allocation26_spill] sm:$0xff] }
 0x530   :  { %2216 = vmatpush1.bf16.msra.mxu0 %v5292_v50  ;;  %2257 = vmatpush1.bf16.msra.mxu1 %v5295_v27  ;;  %v6709_v50 = vld [vmem:[#allocation61_spill] sm:$0xff]  ;;  %v6710_v27 = vld [vmem:[#allocation62_spill] sm:$0xff] }
 0x531   :  { %2217 = vmatprep.subr.bf16.mxu0 %v5298_v51  ;;  %2258 = vmatprep.subr.bf16.mxu1 %v5301_v28  ;;  %v6711_v51 = vld [vmem:[#allocation63_spill] sm:$0xff]  ;;  %v6712_v28 = vld [vmem:[#allocation64_spill] sm:$0xff] }
 0x534   :  { %2218 = vmatpush1.bf16.msra.mxu0 %v5304_v26  ;;  %2259 = vmatpush1.bf16.msra.mxu1 %v5307_v52  ;;  %v6713_v26 = vld [vmem:[#allocation42_spill] sm:$0xff]  ;;  %v6714_v52 = vld [vmem:[#allocation43_spill] sm:$0xff] }
 0x535   :  { %2219 = vmatprep.subr.bf16.mxu0 %v5310_v54  ;;  %2260 = vmatprep.subr.bf16.mxu1 %v5313_v55  ;;  %v6715_v54 = vld [vmem:[#allocation44_spill] sm:$0xff]  ;;  %v6716_v55 = vld [vmem:[#allocation45_spill] sm:$0xff] }
 0x538   :  { %2220 = vmatpush1.bf16.msra.mxu0 %v5316_v15  ;;  %2261 = vmatpush1.bf16.msra.mxu1 %v5319_v16  ;;  %v6717_v15 = vld [vmem:[#allocation46_spill] sm:$0xff]  ;;  %v6718_v16 = vld [vmem:[#allocation47_spill] sm:$0xff] }
 0x539   :  { %2221 = vmatprep.subr.bf16.mxu0 %v5322_v1  ;;  %2262 = vmatprep.subr.bf16.mxu1 %v5325_v29  ;;  %v6719_v1 = vld [vmem:[#allocation48_spill] sm:$0xff]  ;;  %v6720_v29 = vld [vmem:[#allocation49_spill] sm:$0xff] }
 0x53c   :  { %2222 = vmatpush1.bf16.msra.mxu0 %v6637_v62  ;;  %2263 = vmatpush1.bf16.msra.mxu1 %v6638_v39  ;;  %v6721_v62 = vld [vmem:[#allocation50_spill] sm:$0xff]  ;;  %v6722_v39 = vld [vmem:[#allocation51_spill] sm:$0xff] }
 0x53d   :  { %2223 = vmatprep.subr.bf16.mxu0 %v6639_v42  ;;  %2264 = vmatprep.subr.bf16.mxu1 %v6640_v59  ;;  %v5702_v42 = vld [vmem:[#allocation9 + $0x2a4] ss:$48 sps:$4 sm:$0xff]   ;;  %v5705_v59 = vld [vmem:[#allocation9 + $0x2ac] ss:$48 sps:$4 sm:$0xff]  }
 0x540   :  { %2224 = vmatpush1.bf16.msra.mxu0 %v6641_v60  ;;  %2265 = vmatpush1.bf16.msra.mxu1 %v6642_v10  ;;  %v5710_v60 = vld [vmem:[#allocation9 + $0x2a0] ss:$48 sps:$4 sm:$0xff]   ;;  %v5713_v10 = vld [vmem:[#allocation9 + $0x2a8] ss:$48 sps:$4 sm:$0xff]  }
 0x541   :  { %2291 = vmatprep.subr.bf16.mxu0 %v6643_v35  ;;  %2332 = vmatprep.subr.bf16.mxu1 %v6644_v38  ;;  %v5716_v35 = vld [vmem:[#allocation9 + $0x244] ss:$48 sps:$4 sm:$0xff]   ;;  %v5719_v38 = vld [vmem:[#allocation9 + $0x24c] ss:$48 sps:$4 sm:$0xff]  }
 0x543   :  { %2242 = vmatmul.mubr.bf16.vlgmr.msra.gmra.mxu0 %v5630_v43  ;;  %2283 = vmatmul.mubr.bf16.vlgmr.msra.gmra.mxu1 %v5630_v43 }
 0x544   :  { %2292 = vmatpush1.bf16.msra.mxu0 %v6645_v61  ;;  %2333 = vmatpush1.bf16.msra.mxu1 %v6646_v63  ;;  %v5724_v61 = vld [vmem:[#allocation9 + $0x240] ss:$48 sps:$4 sm:$0xff]   ;;  %v5727_v63 = vld [vmem:[#allocation9 + $0x248] ss:$48 sps:$4 sm:$0xff]  }
 0x545   :  { %2293 = vmatprep.subr.bf16.mxu0 %v6647_v57  ;;  %2334 = vmatprep.subr.bf16.mxu1 %v6648_v36  ;;  %6723 = vst [vmem:[#allocation52_spill] sm:$0xff] %v5724_v61  ;;  %6724 = vst [vmem:[#allocation53_spill] sm:$0xff] %v5727_v63  ;;  %v5730_v57 = vld [vmem:[#allocation9 + $0x1e4] ss:$48 sps:$4 sm:$0xff]   ;;  %v5733_v36 = vld [vmem:[#allocation9 + $0x1ec] ss:$48 sps:$4 sm:$0xff]  }
 0x546   :  { %2323 = vmatprep.mubr.bf16.mxu0 %v6528_v33  ;;  %2364 = vmatprep.mubr.bf16.mxu1 %v6528_v33  ;;  %6725 = vst [vmem:[#allocation27_spill] sm:$0xff] %v5730_v57  ;;  %6726 = vst [vmem:[#allocation28_spill] sm:$0xff] %v5733_v36 }
 0x548   :  { %2294 = vmatpush1.bf16.msra.mxu0 %v6697_v2  ;;  %2335 = vmatpush1.bf16.msra.mxu1 %v6698_v31 }
 0x549   :  { %2295 = vmatprep.subr.bf16.mxu0 %v6699_v6  ;;  %2336 = vmatprep.subr.bf16.mxu1 %v6700_v34 }
 0x54c   :  { %2296 = vmatpush1.bf16.msra.mxu0 %v6701_v46  ;;  %2337 = vmatpush1.bf16.msra.mxu1 %v6702_v47 }
 0x54d   :  { %2297 = vmatprep.subr.bf16.mxu0 %v6703_v48  ;;  %2338 = vmatprep.subr.bf16.mxu1 %v6704_v22  ;;  %v2114_v48 = vld [vmem:[#allocation4 + $0x180] sm:$0xff]  ;;  %v2116_v22 = vld [vmem:[#allocation4 + $0x190] sm:$0xff] }
 0x550   :  { %2298 = vmatpush1.bf16.msra.mxu0 %v6705_v23  ;;  %2339 = vmatpush1.bf16.msra.mxu1 %v6706_v24  ;;  %v2115_v23 = vld [vmem:[#allocation4 + $0x188] sm:$0xff] }
 0x551   :  { %2299 = vmatprep.subr.bf16.mxu0 %v6707_v25  ;;  %2340 = vmatprep.subr.bf16.mxu1 %v6708_v49 }
 0x554   :  { %2300 = vmatpush1.bf16.msra.mxu0 %v6709_v50  ;;  %2341 = vmatpush1.bf16.msra.mxu1 %v6710_v27 }
 0x555   :  { %2301 = vmatprep.subr.bf16.mxu0 %v6711_v51  ;;  %2342 = vmatprep.subr.bf16.mxu1 %v6712_v28  ;;  %v2118_v51 = vld [vmem:[#allocation4 + $0x1a0] sm:$0xff] }
 0x558   :  { %2302 = vmatpush1.bf16.msra.mxu0 %v6713_v26  ;;  %2343 = vmatpush1.bf16.msra.mxu1 %v6714_v52 }
 0x559   :  { %2303 = vmatprep.subr.bf16.mxu0 %v6715_v54  ;;  %2344 = vmatprep.subr.bf16.mxu1 %v6716_v55 }
 0x55c   :  { %2304 = vmatpush1.bf16.msra.mxu0 %v6717_v15  ;;  %2345 = vmatpush1.bf16.msra.mxu1 %v6718_v16 }
 0x55d   :  { %2305 = vmatprep.subr.bf16.mxu0 %v6719_v1  ;;  %2346 = vmatprep.subr.bf16.mxu1 %v6720_v29 }
 0x560   :  { %2306 = vmatpush1.bf16.msra.mxu0 %v6721_v62  ;;  %2347 = vmatpush1.bf16.msra.mxu1 %v6722_v39 }
 0x561   :  { %2487 = vmatprep.subr.bf16.mxu0 %v5702_v42  ;;  %2528 = vmatprep.subr.bf16.mxu1 %v5705_v59 }
 0x563   :  { %2324 = vmatmul.mubr.bf16.vlgmr.msra.gmra.mxu0 %v5630_v43  ;;  %2365 = vmatmul.mubr.bf16.vlgmr.msra.gmra.mxu1 %v5630_v43 }
 0x564   :  { %2488 = vmatpush1.bf16.msra.mxu0 %v5710_v60  ;;  %2529 = vmatpush1.bf16.msra.mxu1 %v5713_v10 }
 0x565   :  { %2489 = vmatprep.subr.bf16.mxu0 %v5716_v35  ;;  %2530 = vmatprep.subr.bf16.mxu1 %v5719_v38 }
 0x566   :  { %2519 = vmatprep.mubr.bf16.mxu0 %v6528_v33  ;;  %2560 = vmatprep.mubr.bf16.mxu1 %v6528_v33 }
 0x568   :  { %2490 = vmatpush1.bf16.msra.mxu0 %v5724_v61  ;;  %2531 = vmatpush1.bf16.msra.mxu1 %v5727_v63 }
 0x569   :  { %2491 = vmatprep.subr.bf16.mxu0 %v5730_v57  ;;  %2532 = vmatprep.subr.bf16.mxu1 %v5733_v36 }
 0x56c   :  { %2492 = vmatpush1.bf16.msra.mxu0 %v5736_v17  ;;  %2533 = vmatpush1.bf16.msra.mxu1 %v5739_v0 }
 0x56d   :  { %2493 = vmatprep.subr.bf16.mxu0 %v5742_v58  ;;  %2534 = vmatprep.subr.bf16.mxu1 %v5745_v20 }
 0x570   :  { %2494 = vmatpush1.bf16.msra.mxu0 %v5748_v7  ;;  %2535 = vmatpush1.bf16.msra.mxu1 %v5751_v41 }
 0x571   :  { %2495 = vmatprep.subr.bf16.mxu0 %v5754_v8  ;;  %2536 = vmatprep.subr.bf16.mxu1 %v5757_v40 }
 0x574   :  { %2496 = vmatpush1.bf16.msra.mxu0 %v5760_v3  ;;  %2537 = vmatpush1.bf16.msra.mxu1 %v5763_v19 }
 0x575   :  { %2497 = vmatprep.subr.bf16.mxu0 %v5766_v18  ;;  %2538 = vmatprep.subr.bf16.mxu1 %v6738_v12 }
 0x578   :  { %2498 = vmatpush1.bf16.msra.mxu0 %v6739_v11  ;;  %2539 = vmatpush1.bf16.msra.mxu1 %v6740_v9  ;;  %v2117_v11 = vld [vmem:[#allocation4 + $0x198] sm:$0xff] }
 0x579   :  { %2499 = vmatprep.subr.bf16.mxu0 %v6741_v44  ;;  %2540 = vmatprep.subr.bf16.mxu1 %v6742_v32 }
 0x57c   :  { %2500 = vmatpush1.bf16.msra.mxu0 %v6743_v30  ;;  %2541 = vmatpush1.bf16.msra.mxu1 %v6744_v56 }
 0x57d   :  { %2501 = vmatprep.subr.bf16.mxu0 %v6745_v53  ;;  %2542 = vmatprep.subr.bf16.mxu1 %v6746_v21  ;;  %v2119_v53 = vld [vmem:[#allocation4 + $0x1a8] sm:$0xff] }
 0x580   :  { %2502 = vmatpush1.bf16.msra.mxu0 %v6747_v4  ;;  %2543 = vmatpush1.bf16.msra.mxu1 %v6748_v14 }
 0x581   :  { %2569 = vmatprep.subr.bf16.mxu0 %v6749_v5  ;;  %2610 = vmatprep.subr.bf16.mxu1 %v6750_v37 }
 0x5e3   :  { %v2161_v45 = vpop.f32.mrf.mxu0  ;;  %v2202_v43 = vpop.f32.mrf.mxu1 }
 0x5e4   :  { %v2373_v24 = vadd.f32 %v2161_v45, %v2114_v48  ;;  %v2375_v50 = vadd.f32 %v2202_v43, %v2116_v22 }
 0x5e5   :  { %v2163_v2 = vpop.f32.mrf.mxu0  ;;  %v2204_v31 = vpop.f32.mrf.mxu1 }
 0x5e6   :  { %v2374_v27 = vadd.f32 %v2163_v2, %v2115_v23  ;;  %v3738_v9 = vmul.f32 -1.442695, %v2373_v24  ;;  %v3740_v30 = vmul.f32 -1.442695, %v2375_v50  ;;  %v2376_v4 = vadd.f32 %v2204_v31, %v2117_v11 }
 0x5e7   :  { %v2165_v6 = vpop.f32.mrf.mxu0  ;;  %v2206_v34 = vpop.f32.mrf.mxu1 }
 0x5e8   :  { %v3739_v21 = vmul.f32 -1.442695, %v2374_v27  ;;  %4127 = vpow2.f32 %v3738_v9  ;;  %v3741_v43 = vmul.f32 -1.442695, %v2376_v4  ;;  %v2120_v6 = vld [vmem:[#allocation4 + $0x1b0] sm:$0xff] }
 0x5e9   :  { %v2166_v46 = vpop.f32.mrf.mxu0  ;;  %v2207_v47 = vpop.f32.mrf.mxu1  ;;  %4129 = vpow2.f32 %v3740_v30  ;;  %v2124_v30 = vld [vmem:[#allocation4 + $0x1d0] sm:$0xff] }
 0x5ea   :  { %4131 = vpow2.f32 %v3739_v21  ;;  %v2121_v46 = vld [vmem:[#allocation4 + $0x1b8] sm:$0xff] }
 0x5f5   :  { %v4128_v34 = vpop.eup %4127 }
 0x5f6   :  { %v4130_v47 = vpop.eup %4129  ;;  %v2412_v23 = vadd.f32 1.0, %v4128_v34 }
 0x5f7   :  { %v4132_v48 = vpop.eup %4131  ;;  %v2414_v24 = vadd.f32 1.0, %v4130_v47 }
 0x5f8   :  { %v2413_v50 = vadd.f32 1.0, %v4132_v48 }
 0x603   :  { %v2243_v25 = vpop.f32.mrf.mxu0  ;;  %v2284_v49 = vpop.f32.mrf.mxu1 }
 0x604   :  { %v2377_v56 = vadd.f32 %v2243_v25, %v2118_v51  ;;  %v2379_v22 = vadd.f32 %v2284_v49, %v2120_v6 }
 0x605   :  { %v2245_v28 = vpop.f32.mrf.mxu0  ;;  %v2286_v12 = vpop.f32.mrf.mxu1 }
 0x606   :  { %v2378_v37 = vadd.f32 %v2245_v28, %v2119_v53  ;;  %v3742_v45 = vmul.f32 -1.442695, %v2377_v56  ;;  %v2380_v31 = vadd.f32 %v2286_v12, %v2121_v46  ;;  %v3744_v51 = vmul.f32 -1.442695, %v2379_v22  ;;  %v2123_v12 = vld [vmem:[#allocation4 + $0x1c8] sm:$0xff] }
 0x607   :  { %v2247_v44 = vpop.f32.mrf.mxu0  ;;  %v2288_v32 = vpop.f32.mrf.mxu1 }
 0x608   :  { %v3743_v2 = vmul.f32 -1.442695, %v2378_v37  ;;  %4133 = vpow2.f32 %v3742_v45  ;;  %v3745_v28 = vmul.f32 -1.442695, %v2380_v31  ;;  %v2122_v32 = vld [vmem:[#allocation4 + $0x1c0] sm:$0xff] }
 0x609   :  { %v2248_v14 = vpop.f32.mrf.mxu0  ;;  %v2289_v5 = vpop.f32.mrf.mxu1  ;;  %4135 = vpow2.f32 %v3741_v43 }
 0x60a   :  { %4137 = vpow2.f32 %v3743_v2  ;;  %v2125_v14 = vld [vmem:[#allocation4 + $0x1d8] sm:$0xff] }
 0x60b   :  { %4139 = vrcp.f32 %v2412_v23 }
 0x60c   :  { %4141 = vrcp.f32 %v2414_v24 }
 0x60d   :  { %4143 = vrcp.f32 %v2413_v50 }
 0x60e   :  { %4145 = vpow2.f32 %v3744_v51 }
 0x60f   :  { %4147 = vpow2.f32 %v3745_v28 }
 0x615   :  { %v4134_v25 = vpop.eup %4133 }
 0x616   :  { %v4136_v27 = vpop.eup %4135  ;;  %v2416_v9 = vadd.f32 1.0, %v4134_v25 }
 0x617   :  { %v4138_v11 = vpop.eup %4137  ;;  %v2415_v44 = vadd.f32 1.0, %v4136_v27 }
 0x618   :  { %v2417_v56 = vadd.f32 1.0, %v4138_v11  ;;  %4149 = vrcp.f32 %v2416_v9  ;;  %v4140_v48 = vpop.eup %4139 }
 0x619   :  { %4151 = vrcp.f32 %v2415_v44  ;;  %v4142_v22 = vpop.eup %4141 }
 0x61a   :  { %v4144_v23 = vpop.eup %4143 }
 0x61b   :  { %v4146_v31 = vpop.eup %4145 }
 0x61c   :  { %v4148_v24 = vpop.eup %4147  ;;  %v2418_v51 = vadd.f32 1.0, %v4146_v31 }
 0x61d   :  { %v2419_v11 = vadd.f32 1.0, %v4148_v24 }
 0x623   :  { %v2325_v49 = vpop.f32.mrf.mxu0  ;;  %v2366_v53 = vpop.f32.mrf.mxu1 }
 0x624   :  { %v2381_v21 = vadd.f32 %v2325_v49, %v2122_v32  ;;  %v2383_v4 = vadd.f32 %v2366_v53, %v2124_v30  ;;  %v2459_v30 = vld [vmem:[#allocation7 + $0x68] sm:$0xff] }
 0x625   :  { %v2327_v5 = vpop.f32.mrf.mxu0  ;;  %v2368_v37 = vpop.f32.mrf.mxu1 }
 0x626   :  { %v3746_v45 = vmul.f32 -1.442695, %v2381_v21  ;;  %4153 = vtanh.f32 %v2383_v4  ;;  %v2382_v43 = vadd.f32 %v2327_v5, %v2123_v12  ;;  %v2384_v2 = vadd.f32 %v2368_v37, %v2125_v14  ;;  %v4150_v25 = vpop.eup %4149  ;;  %v2458_v5 = vld [vmem:[#allocation7 + $0x60] sm:$0xff] }
 0x627   :  { %4155 = vrcp.f32 %v2417_v56  ;;  %v2329_v6 = vpop.f32.mrf.mxu0  ;;  %v2370_v34 = vpop.f32.mrf.mxu1  ;;  %v2443_v9 = vmul.f32 %v4150_v25, %v5628_v13 }
 0x628   :  { %4157 = vpow2.f32 %v3746_v45  ;;  %v4152_v50 = vpop.eup %4151 }
 0x629   :  { %4159 = vtanh.f32 %v2382_v43  ;;  %v2330_v46 = vpop.f32.mrf.mxu0  ;;  %v2371_v47 = vpop.f32.mrf.mxu1  ;;  %v2442_v21 = vmul.f32 %v4152_v50, %v5628_v13 }
 0x62a   :  { %4161 = vtanh.f32 %v2384_v2  ;;  %v2460_v2 = vld [vmem:[#allocation7 + $0x70] sm:$0xff] }
 0x62b   :  { %4163 = vrcp.f32 %v2418_v51 }
 0x62c   :  { %4165 = vrcp.f32 %v2419_v11 }
 0x633   :  { %v4154_v27 = vpop.eup %4153 }
 0x634   :  { %v4156_v28 = vpop.eup %4155  ;;  %v2446_v44 = vmul.f32 %v4154_v27, %v4144_v23 }
 0x635   :  { %v4158_v32 = vpop.eup %4157  ;;  %v2444_v37 = vmul.f32 %v4156_v28, %v5628_v13 }
 0x636   :  { %v4160_v56 = vpop.eup %4159  ;;  %v2420_v49 = vadd.f32 1.0, %v4158_v32  ;;  %v2449_v53 = vadd.f32 %v2446_v44, %v2443_v9 }
 0x637   :  { %v4162_v12 = vpop.eup %4161  ;;  %v2445_v4 = vmul.f32 %v4160_v56, %v4140_v48 }
 0x638   :  { %v2465_v14 = vmul.f32 %v2459_v30, %v2449_v53  ;;  %v2447_v45 = vmul.f32 %v4162_v12, %v4142_v22  ;;  %4167 = vtanh.f32 %v2449_v53  ;;  %v4164_v31 = vpop.eup %4163  ;;  %v5794_v53 = vld [vmem:[#allocation9 + $0x2b8] ss:$48 sps:$4 sm:$0xff]   ;;  %v5800_v12 = vld [vmem:[#allocation9 + $0x25c] ss:$48 sps:$4 sm:$0xff]  }
 0x639   :  { %v2448_v43 = vadd.f32 %v2445_v4, %v2442_v21  ;;  %4169 = vrcp.f32 %v2420_v49  ;;  %v4166_v48 = vpop.eup %4165  ;;  %v5791_v49 = vld [vmem:[#allocation9 + $0x2b0] ss:$48 sps:$4 sm:$0xff]   ;;  %v5808_v4 = vld [vmem:[#allocation9 + $0x258] ss:$48 sps:$4 sm:$0xff]  }
 0x63a   :  { %v2450_v6 = vadd.f32 %v2447_v45, %v2444_v37  ;;  %v5805_v21 = vld [vmem:[#allocation9 + $0x250] ss:$48 sps:$4 sm:$0xff]   ;;  %v5820_v45 = vld [vmem:[#allocation9 + $0x1f8] ss:$48 sps:$4 sm:$0xff]  }
 0x63b   :  { %4171 = vtanh.f32 %v2448_v43  ;;  %v2464_v34 = vmul.f32 %v2458_v5, %v2448_v43  ;;  %v5817_v37 = vld [vmem:[#allocation9 + $0x1f0] ss:$48 sps:$4 sm:$0xff]   ;;  %v5823_v43 = vld [vmem:[#allocation9 + $0x194] ss:$48 sps:$4 sm:$0xff]  }
 0x63c   :  { %4173 = vtanh.f32 %v2450_v6  ;;  %v2466_v46 = vmul.f32 %v2460_v2, %v2450_v6  ;;  %v5829_v6 = vld [vmem:[#allocation9 + $0x190] ss:$48 sps:$4 sm:$0xff]  }
 0x63d   :  { %v2468_v47 = vadd.f32 %v2465_v14, %v2464_v34  ;;  %v5811_v14 = vld [vmem:[#allocation9 + $0x1f4] ss:$48 sps:$4 sm:$0xff]   ;;  %v5832_v34 = vld [vmem:[#allocation9 + $0x198] ss:$48 sps:$4 sm:$0xff]  }
 0x63f   :  { %v5785_v23 = vadd.f32 %v2468_v47, %v2466_v46  ;;  %v5835_v46 = vld [vmem:[#allocation9 + $0x134] ss:$48 sps:$4 sm:$0xff]   ;;  %v5838_v47 = vld [vmem:[#allocation9 + $0x13c] ss:$48 sps:$4 sm:$0xff]  }
 0x645   :  { %v4168_v24 = vpop.eup %4167 }
 0x646   :  { %v4170_v25 = vpop.eup %4169  ;;  %v2455_v50 = vmul.f32 %v4168_v24, %v4166_v48  ;;  %v5844_v48 = vld [vmem:[#allocation9 + $0x138] ss:$48 sps:$4 sm:$0xff]   ;;  %v5847_v24 = vld [vmem:[#allocation9 + $0xd4] ss:$48 sps:$4 sm:$0xff]  }
 0x648   :  { %v4172_v27 = vpop.eup %4171  ;;  %v2462_v28 = vmul.f32 %v2459_v30, %v2455_v50  ;;  %v5797_v30 = vld [vmem:[#allocation9 + $0x254] ss:$48 sps:$4 sm:$0xff]   ;;  %v5853_v50 = vld [vmem:[#allocation9 + $0xd0] ss:$48 sps:$4 sm:$0xff]  }
 0x649   :  { %v4174_v13 = vpop.eup %4173  ;;  %v2454_v22 = vmul.f32 %v4172_v27, %v4164_v31  ;;  %v5841_v31 = vld [vmem:[#allocation9 + $0x130] ss:$48 sps:$4 sm:$0xff]   ;;  %v5856_v27 = vld [vmem:[#allocation9 + $0xd8] ss:$48 sps:$4 sm:$0xff]  }
 0x64a   :  { %v2456_v51 = vmul.f32 %v4174_v13, %v4170_v25  ;;  %v5850_v25 = vld [vmem:[#allocation9 + $0xdc] ss:$48 sps:$4 sm:$0xff]   ;;  %v5859_v13 = vld [vmem:[#allocation9 + $0x74] ss:$48 sps:$4 sm:$0xff]  }
 0x64b   :  { %v2461_v11 = vmul.f32 %v2458_v5, %v2454_v22  ;;  %v5814_v5 = vld [vmem:[#allocation9 + $0x1fc] ss:$48 sps:$4 sm:$0xff]  }
 0x64c   :  { %v2463_v9 = vmul.f32 %v2460_v2, %v2456_v51  ;;  %v5826_v2 = vld [vmem:[#allocation9 + $0x19c] ss:$48 sps:$4 sm:$0xff]   ;;  %v5865_v51 = vld [vmem:[#allocation9 + $0x70] ss:$48 sps:$4 sm:$0xff]  }
 0x64d   :  { %v2467_v44 = vadd.f32 %v2462_v28, %v2461_v11  ;;  %v5862_v22 = vld [vmem:[#allocation9 + $0x7c] ss:$48 sps:$4 sm:$0xff]   ;;  %6751 = vst [vmem:[#allocation40_spill] sm:$0xff] %v5865_v51  ;;  %v5868_v28 = vld [vmem:[#allocation9 + $0x78] ss:$48 sps:$4 sm:$0xff]  }
 0x64e   :  { %6752 = vst [vmem:[#allocation41_spill] sm:$0xff] %v5868_v28  ;;  %v5871_v11 = vld [vmem:[#allocation9 + $0x14] ss:$48 sps:$4 sm:$0xff]  }
 0x64f   :  { %v2469_v32 = vadd.f32 %v2467_v44, %v2463_v9  ;;  %6753 = vst [vmem:[#allocation54_spill] sm:$0xff] %v5871_v11  ;;  %v5874_v9 = vld [vmem:[#allocation9 + $0x1c] ss:$48 sps:$4 sm:$0xff]   ;;  %v5877_v44 = vld [vmem:[#allocation9 + $0x10] ss:$48 sps:$4 sm:$0xff]  }
 0x650   :  { %6754 = vst [vmem:[#allocation55_spill] sm:$0xff] %v5874_v9  ;;  %6755 = vst [vmem:[#allocation56_spill] sm:$0xff] %v5877_v44 }
 0x651   :  { %2472 = vst [vmem:[#allocation13 + $0x20] sm:$0xff] %v2469_v32  ;;  %v5787_v56 = vpack.c.bf16 %v2469_v32, %v2469_v32  ;;  %v5880_v32 = vld [vmem:[#allocation9 + $0x18] ss:$48 sps:$4 sm:$0xff]  }
 0x652   :  { %6756 = vst [vmem:[#allocation57_spill] sm:$0xff] %v5880_v32 }
 0x653   :  { %2520 = vmatmul.mubr.bf16.vlgmr.msra.gmra.mxu0 %v5787_v56  ;;  %2561 = vmatmul.mubr.bf16.vlgmr.msra.gmra.mxu1 %v5787_v56 }
 0x654   :  { %2570 = vmatpush1.bf16.msra.mxu0 %v5791_v49  ;;  %2611 = vmatpush1.bf16.msra.mxu1 %v5794_v53 }
 0x655   :  { %2571 = vmatprep.subr.bf16.mxu0 %v5797_v30  ;;  %2612 = vmatprep.subr.bf16.mxu1 %v5800_v12 }
 0x656   :  { %2601 = vmatprep.mubr.bf16.mxu0 %v6528_v33  ;;  %2642 = vmatprep.mubr.bf16.mxu1 %v6528_v33 }
 0x658   :  { %2572 = vmatpush1.bf16.msra.mxu0 %v5805_v21  ;;  %2613 = vmatpush1.bf16.msra.mxu1 %v5808_v4 }
 0x659   :  { %2573 = vmatprep.subr.bf16.mxu0 %v5811_v14  ;;  %2614 = vmatprep.subr.bf16.mxu1 %v5814_v5 }
 0x65c   :  { %2574 = vmatpush1.bf16.msra.mxu0 %v5817_v37  ;;  %2615 = vmatpush1.bf16.msra.mxu1 %v5820_v45 }
 0x65d   :  { %2575 = vmatprep.subr.bf16.mxu0 %v5823_v43  ;;  %2616 = vmatprep.subr.bf16.mxu1 %v5826_v2 }
 0x660   :  { %2576 = vmatpush1.bf16.msra.mxu0 %v5829_v6  ;;  %2617 = vmatpush1.bf16.msra.mxu1 %v5832_v34 }
 0x661   :  { %2577 = vmatprep.subr.bf16.mxu0 %v5835_v46  ;;  %2618 = vmatprep.subr.bf16.mxu1 %v5838_v47 }
 0x664   :  { %2578 = vmatpush1.bf16.msra.mxu0 %v5841_v31  ;;  %2619 = vmatpush1.bf16.msra.mxu1 %v5844_v48 }
 0x665   :  { %2579 = vmatprep.subr.bf16.mxu0 %v5847_v24  ;;  %2620 = vmatprep.subr.bf16.mxu1 %v5850_v25 }
 0x668   :  { %2580 = vmatpush1.bf16.msra.mxu0 %v5853_v50  ;;  %2621 = vmatpush1.bf16.msra.mxu1 %v5856_v27 }
 0x669   :  { %2581 = vmatprep.subr.bf16.mxu0 %v5859_v13  ;;  %2622 = vmatprep.subr.bf16.mxu1 %v5862_v22 }
 0x66c   :  { %2582 = vmatpush1.bf16.msra.mxu0 %v5865_v51  ;;  %2623 = vmatpush1.bf16.msra.mxu1 %v5868_v28  ;;  %v5883_v51 = vld [vmem:[#allocation9 + $0x2c4] ss:$48 sps:$4 sm:$0xff]   ;;  %v5886_v28 = vld [vmem:[#allocation9 + $0x2cc] ss:$48 sps:$4 sm:$0xff]  }
 0x66d   :  { %2583 = vmatprep.subr.bf16.mxu0 %v5871_v11  ;;  %2624 = vmatprep.subr.bf16.mxu1 %v5874_v9  ;;  %6757 = vst [vmem:[#allocation58_spill] sm:$0xff] %v5883_v51  ;;  %6758 = vst [vmem:[#allocation59_spill] sm:$0xff] %v5886_v28  ;;  %v5891_v9 = vld [vmem:[#allocation9 + $0x2c0] ss:$48 sps:$4 sm:$0xff]   ;;  %v5920_v11 = vld [vmem:[#allocation9 + $0x208] ss:$48 sps:$4 sm:$0xff]  }
 0x66e   :  { %6759 = vst [vmem:[#allocation60_spill] sm:$0xff] %v5891_v9  ;;  %6768 = vst [vmem:[#allocation64_spill] sm:$0xff] %v5920_v11 }
 0x670   :  { %2584 = vmatpush1.bf16.msra.mxu0 %v5877_v44  ;;  %2625 = vmatpush1.bf16.msra.mxu1 %v5880_v32  ;;  %v5894_v44 = vld [vmem:[#allocation9 + $0x2c8] ss:$48 sps:$4 sm:$0xff]   ;;  %v5897_v32 = vld [vmem:[#allocation9 + $0x264] ss:$48 sps:$4 sm:$0xff]  }
 0x671   :  { %2651 = vmatprep.subr.bf16.mxu0 %v5883_v51  ;;  %2692 = vmatprep.subr.bf16.mxu1 %v5886_v28  ;;  %6760 = vst [vmem:[#allocation22_spill] sm:$0xff] %v5894_v44  ;;  %6761 = vst [vmem:[#allocation23_spill] sm:$0xff] %v5897_v32  ;;  %v5900_v51 = vld [vmem:[#allocation9 + $0x26c] ss:$48 sps:$4 sm:$0xff]   ;;  %v5905_v28 = vld [vmem:[#allocation9 + $0x260] ss:$48 sps:$4 sm:$0xff]  }
 0x672   :  { %6762 = vst [vmem:[#allocation24_spill] sm:$0xff] %v5900_v51  ;;  %6763 = vst [vmem:[#allocation25_spill] sm:$0xff] %v5905_v28 }
 0x673   :  { %2602 = vmatmul.mubr.bf16.vlgmr.msra.gmra.mxu0 %v5787_v56  ;;  %2643 = vmatmul.mubr.bf16.vlgmr.msra.gmra.mxu1 %v5787_v56 }
 0x674   :  { %2652 = vmatpush1.bf16.msra.mxu0 %v5891_v9  ;;  %2693 = vmatpush1.bf16.msra.mxu1 %v5894_v44  ;;  %v5908_v9 = vld [vmem:[#allocation9 + $0x268] ss:$48 sps:$4 sm:$0xff]   ;;  %v5911_v44 = vld [vmem:[#allocation9 + $0x204] ss:$48 sps:$4 sm:$0xff]  }
 0x675   :  { %2653 = vmatprep.subr.bf16.mxu0 %v5897_v32  ;;  %2694 = vmatprep.subr.bf16.mxu1 %v5900_v51  ;;  %6764 = vst [vmem:[#allocation26_spill] sm:$0xff] %v5908_v9  ;;  %6765 = vst [vmem:[#allocation61_spill] sm:$0xff] %v5911_v44  ;;  %v5914_v32 = vld [vmem:[#allocation9 + $0x20c] ss:$48 sps:$4 sm:$0xff]   ;;  %v5917_v51 = vld [vmem:[#allocation9 + $0x200] ss:$48 sps:$4 sm:$0xff]  }
 0x676   :  { %2683 = vmatprep.mubr.bf16.mxu0 %v6528_v33  ;;  %2724 = vmatprep.mubr.bf16.mxu1 %v6528_v33  ;;  %6766 = vst [vmem:[#allocation62_spill] sm:$0xff] %v5914_v32  ;;  %6767 = vst [vmem:[#allocation63_spill] sm:$0xff] %v5917_v51 }
 0x678   :  { %2654 = vmatpush1.bf16.msra.mxu0 %v5905_v28  ;;  %2695 = vmatpush1.bf16.msra.mxu1 %v5908_v9  ;;  %v5923_v28 = vld [vmem:[#allocation9 + $0x1a4] ss:$48 sps:$4 sm:$0xff]   ;;  %v5926_v9 = vld [vmem:[#allocation9 + $0x1ac] ss:$48 sps:$4 sm:$0xff]  }
 0x679   :  { %2655 = vmatprep.subr.bf16.mxu0 %v5911_v44  ;;  %2696 = vmatprep.subr.bf16.mxu1 %v5914_v32  ;;  %6769 = vst [vmem:[#allocation42_spill] sm:$0xff] %v5923_v28  ;;  %6770 = vst [vmem:[#allocation43_spill] sm:$0xff] %v5926_v9  ;;  %v5929_v44 = vld [vmem:[#allocation9 + $0x1a0] ss:$48 sps:$4 sm:$0xff]   ;;  %v5932_v32 = vld [vmem:[#allocation9 + $0x1a8] ss:$48 sps:$4 sm:$0xff]  }
 0x67a   :  { %6771 = vst [vmem:[#allocation44_spill] sm:$0xff] %v5929_v44  ;;  %6772 = vst [vmem:[#allocation45_spill] sm:$0xff] %v5932_v32 }
 0x67c   :  { %2656 = vmatpush1.bf16.msra.mxu0 %v5917_v51  ;;  %2697 = vmatpush1.bf16.msra.mxu1 %v5920_v11  ;;  %v5935_v51 = vld [vmem:[#allocation9 + $0x144] ss:$48 sps:$4 sm:$0xff]   ;;  %v5938_v11 = vld [vmem:[#allocation9 + $0x14c] ss:$48 sps:$4 sm:$0xff]  }
 0x67d   :  { %2657 = vmatprep.subr.bf16.mxu0 %v5923_v28  ;;  %2698 = vmatprep.subr.bf16.mxu1 %v5926_v9  ;;  %6773 = vst [vmem:[#allocation46_spill] sm:$0xff] %v5935_v51  ;;  %6774 = vst [vmem:[#allocation47_spill] sm:$0xff] %v5938_v11  ;;  %v5941_v28 = vld [vmem:[#allocation9 + $0x140] ss:$48 sps:$4 sm:$0xff]   ;;  %v5944_v9 = vld [vmem:[#allocation9 + $0x148] ss:$48 sps:$4 sm:$0xff]  }
 0x67e   :  { %6775 = vst [vmem:[#allocation48_spill] sm:$0xff] %v5941_v28  ;;  %6776 = vst [vmem:[#allocation49_spill] sm:$0xff] %v5944_v9 }
 0x680   :  { %2658 = vmatpush1.bf16.msra.mxu0 %v5929_v44  ;;  %2699 = vmatpush1.bf16.msra.mxu1 %v5932_v32  ;;  %v5947_v44 = vld [vmem:[#allocation9 + $0xe4] ss:$48 sps:$4 sm:$0xff]   ;;  %v5950_v32 = vld [vmem:[#allocation9 + $0xec] ss:$48 sps:$4 sm:$0xff]  }
 0x681   :  { %2659 = vmatprep.subr.bf16.mxu0 %v5935_v51  ;;  %2700 = vmatprep.subr.bf16.mxu1 %v5938_v11  ;;  %6777 = vst [vmem:[#allocation50_spill] sm:$0xff] %v5947_v44  ;;  %6778 = vst [vmem:[#allocation51_spill] sm:$0xff] %v5950_v32 }
 0x684   :  { %2660 = vmatpush1.bf16.msra.mxu0 %v5941_v28  ;;  %2701 = vmatpush1.bf16.msra.mxu1 %v5944_v9 }
 0x685   :  { %2661 = vmatprep.subr.bf16.mxu0 %v5947_v44  ;;  %2702 = vmatprep.subr.bf16.mxu1 %v5950_v32 }
 0x688   :  { %2662 = vmatpush1.bf16.msra.mxu0 %v6713_v26  ;;  %2703 = vmatpush1.bf16.msra.mxu1 %v6714_v52  ;;  %v5988_v26 = vld [vmem:[#allocation9 + $0xcc] ss:$48 sps:$4 sm:$0xff]   ;;  %v5991_v52 = vld [vmem:[#allocation9 + $0xc0] ss:$48 sps:$4 sm:$0xff]  }
 0x689   :  { %2663 = vmatprep.subr.bf16.mxu0 %v6715_v54  ;;  %2704 = vmatprep.subr.bf16.mxu1 %v6716_v55  ;;  %6779 = vst [vmem:[#allocation65_spill] sm:$0xff] %v5988_v26  ;;  %6780 = vst [vmem:[#allocation66_spill] sm:$0xff] %v5991_v52  ;;  %v5994_v54 = vld [vmem:[#allocation9 + $0xc8] ss:$48 sps:$4 sm:$0xff]   ;;  %v5997_v55 = vld [vmem:[#allocation9 + $0x64] ss:$48 sps:$4 sm:$0xff]  }
 0x68a   :  { %6781 = vst [vmem:[#allocation67_spill] sm:$0xff] %v5994_v54  ;;  %6782 = vst [vmem:[#allocation68_spill] sm:$0xff] %v5997_v55 }
 0x68c   :  { %2664 = vmatpush1.bf16.msra.mxu0 %v6717_v15  ;;  %2705 = vmatpush1.bf16.msra.mxu1 %v6718_v16  ;;  %v6000_v15 = vld [vmem:[#allocation9 + $0x6c] ss:$48 sps:$4 sm:$0xff]   ;;  %v6003_v16 = vld [vmem:[#allocation9 + $0x60] ss:$48 sps:$4 sm:$0xff]  }
 0x68d   :  { %2665 = vmatprep.subr.bf16.mxu0 %v6719_v1  ;;  %2706 = vmatprep.subr.bf16.mxu1 %v6720_v29  ;;  %6783 = vst [vmem:[#allocation69_spill] sm:$0xff] %v6000_v15  ;;  %6784 = vst [vmem:[#allocation70_spill] sm:$0xff] %v6003_v16  ;;  %v6006_v1 = vld [vmem:[#allocation9 + $0x68] ss:$48 sps:$4 sm:$0xff]   ;;  %v6009_v29 = vld [vmem:[#allocation9 + $0x4] ss:$48 sps:$4 sm:$0xff]  }
 0x68e   :  { %6785 = vst [vmem:[#allocation71_spill] sm:$0xff] %v6006_v1  ;;  %6786 = vst [vmem:[#allocation72_spill] sm:$0xff] %v6009_v29 }
 0x690   :  { %2666 = vmatpush1.bf16.msra.mxu0 %v6721_v62  ;;  %2707 = vmatpush1.bf16.msra.mxu1 %v6722_v39  ;;  %v6012_v62 = vld [vmem:[#allocation9 + $0xc] ss:$48 sps:$4 sm:$0xff]   ;;  %v6015_v39 = vld [vmem:[#allocation9] ss:$48 sps:$4 sm:$0xff]  }
 0x691   :  { %2847 = vmatprep.subr.bf16.mxu0 %v5702_v42  ;;  %2888 = vmatprep.subr.bf16.mxu1 %v5705_v59  ;;  %6787 = vst [vmem:[#allocation73_spill] sm:$0xff] %v6012_v62  ;;  %6788 = vst [vmem:[#allocation74_spill] sm:$0xff] %v6015_v39 }
 0x693   :  { %2684 = vmatmul.mubr.bf16.vlgmr.msra.gmra.mxu0 %v5787_v56  ;;  %2725 = vmatmul.mubr.bf16.vlgmr.msra.gmra.mxu1 %v5787_v56  ;;  %v6018_v56 = vld [vmem:[#allocation9 + $0x8] ss:$48 sps:$4 sm:$0xff]  }
 0x694   :  { %2848 = vmatpush1.bf16.msra.mxu0 %v5710_v60  ;;  %2889 = vmatpush1.bf16.msra.mxu1 %v5713_v10  ;;  %6789 = vst [vmem:[#allocation75_spill] sm:$0xff] %v6018_v56 }
 0x695   :  { %2849 = vmatprep.subr.bf16.mxu0 %v5716_v35  ;;  %2890 = vmatprep.subr.bf16.mxu1 %v5719_v38 }
 0x696   :  { %2879 = vmatprep.mubr.bf16.mxu0 %v6528_v33  ;;  %2920 = vmatprep.mubr.bf16.mxu1 %v6528_v33 }
 0x698   :  { %2850 = vmatpush1.bf16.msra.mxu0 %v5724_v61  ;;  %2891 = vmatpush1.bf16.msra.mxu1 %v5727_v63 }
 0x699   :  { %2851 = vmatprep.subr.bf16.mxu0 %v5730_v57  ;;  %2892 = vmatprep.subr.bf16.mxu1 %v5733_v36 }
 0x69c   :  { %2852 = vmatpush1.bf16.msra.mxu0 %v5736_v17  ;;  %2893 = vmatpush1.bf16.msra.mxu1 %v5739_v0 }
 0x69d   :  { %2853 = vmatprep.subr.bf16.mxu0 %v5742_v58  ;;  %2894 = vmatprep.subr.bf16.mxu1 %v5745_v20 }
 0x6a0   :  { %2854 = vmatpush1.bf16.msra.mxu0 %v5748_v7  ;;  %2895 = vmatpush1.bf16.msra.mxu1 %v5751_v41  ;;  %v2478_v7 = vld [vmem:[#allocation4 + $0x200] sm:$0xff] }
 0x6a1   :  { %2855 = vmatprep.subr.bf16.mxu0 %v5754_v8  ;;  %2896 = vmatprep.subr.bf16.mxu1 %v5757_v40 }
 0x6a4   :  { %2856 = vmatpush1.bf16.msra.mxu0 %v5760_v3  ;;  %2897 = vmatpush1.bf16.msra.mxu1 %v5763_v19  ;;  %v2476_v19 = vld [vmem:[#allocation4 + $0x1f0] sm:$0xff]  ;;  %v2475_v3 = vld [vmem:[#allocation4 + $0x1e8] sm:$0xff] }
 0x6a5   :  { %2857 = vmatprep.subr.bf16.mxu0 %v5766_v18  ;;  %2898 = vmatprep.subr.bf16.mxu1 %v5988_v26  ;;  %v2474_v18 = vld [vmem:[#allocation4 + $0x1e0] sm:$0xff] }
 0x6a8   :  { %2858 = vmatpush1.bf16.msra.mxu0 %v5991_v52  ;;  %2899 = vmatpush1.bf16.msra.mxu1 %v5994_v54 }
 0x6a9   :  { %2859 = vmatprep.subr.bf16.mxu0 %v5997_v55  ;;  %2900 = vmatprep.subr.bf16.mxu1 %v6000_v15 }
 0x6ac   :  { %2860 = vmatpush1.bf16.msra.mxu0 %v6003_v16  ;;  %2901 = vmatpush1.bf16.msra.mxu1 %v6006_v1  ;;  %v6021_v16 = vld [vmem:[#allocation9 + $0x2b4] ss:$48 sps:$4 sm:$0xff]   ;;  %v6024_v1 = vld [vmem:[#allocation9 + $0x2bc] ss:$48 sps:$4 sm:$0xff]  }
 0x6ad   :  { %2861 = vmatprep.subr.bf16.mxu0 %v6009_v29  ;;  %2902 = vmatprep.subr.bf16.mxu1 %v6012_v62  ;;  %6790 = vst [vmem:[#allocation76_spill] sm:$0xff] %v6021_v16  ;;  %6791 = vst [vmem:[#allocation77_spill] sm:$0xff] %v6024_v1 }
 0x6b0   :  { %2862 = vmatpush1.bf16.msra.mxu0 %v6015_v39  ;;  %2903 = vmatpush1.bf16.msra.mxu1 %v6018_v56 }
 0x6b1   :  { %2929 = vmatprep.subr.bf16.mxu0 %v6021_v16  ;;  %2970 = vmatprep.subr.bf16.mxu1 %v6024_v1  ;;  %v2477_v1 = vld [vmem:[#allocation4 + $0x1f8] sm:$0xff] }
 0x713   :  { %v2521_v29 = vpop.f32.mrf.mxu0  ;;  %v2562_v15 = vpop.f32.mrf.mxu1 }
 0x714   :  { %v2733_v56 = vadd.f32 %v2521_v29, %v2474_v18  ;;  %v2735_v41 = vadd.f32 %v2562_v15, %v2476_v19 }
 0x715   :  { %v2523_v55 = vpop.f32.mrf.mxu0  ;;  %v2564_v62 = vpop.f32.mrf.mxu1 }
 0x716   :  { %v2734_v16 = vadd.f32 %v2523_v55, %v2475_v3  ;;  %v3747_v0 = vmul.f32 -1.442695, %v2733_v56  ;;  %v3749_v57 = vmul.f32 -1.442695, %v2735_v41  ;;  %v2480_v55 = vld [vmem:[#allocation4 + $0x210] sm:$0xff] }
 0x717   :  { %v2525_v54 = vpop.f32.mrf.mxu0  ;;  %v2566_v52 = vpop.f32.mrf.mxu1 }
 0x718   :  { %v2479_v52 = vld [vmem:[#allocation4 + $0x208] sm:$0xff]  ;;  %4175 = vpow2.f32 %v3747_v0 }
 0x719   :  { %v2526_v26 = vpop.f32.mrf.mxu0  ;;  %v2567_v39 = vpop.f32.mrf.mxu1  ;;  %4177 = vpow2.f32 %v3749_v57 }
 0x71a   :  { %v3748_v26 = vmul.f32 -1.442695, %v2734_v16  ;;  %v2736_v39 = vadd.f32 %v2564_v62, %v2477_v1 }
 0x71c   :  { %4179 = vpow2.f32 %v3748_v26  ;;  %v3750_v3 = vmul.f32 -1.442695, %v2736_v39  ;;  %v2484_v26 = vld [vmem:[#allocation4 + $0x230] sm:$0xff] }
 0x733   :  { %v2603_v40 = vpop.f32.mrf.mxu0  ;;  %v2644_v8 = vpop.f32.mrf.mxu1 }
 0x734   :  { %v2737_v54 = vadd.f32 %v2603_v40, %v2478_v7  ;;  %v2739_v40 = vadd.f32 %v2644_v8, %v2480_v55 }
 0x735   :  { %v2605_v20 = vpop.f32.mrf.mxu0  ;;  %v2646_v58 = vpop.f32.mrf.mxu1 }
 0x736   :  { %v2738_v18 = vadd.f32 %v2605_v20, %v2479_v52  ;;  %v3751_v29 = vmul.f32 -1.442695, %v2737_v54  ;;  %v3753_v57 = vmul.f32 -1.442695, %v2739_v40  ;;  %v2482_v52 = vld [vmem:[#allocation4 + $0x220] sm:$0xff] }
 0x737   :  { %v2607_v17 = vpop.f32.mrf.mxu0  ;;  %v2648_v36 = vpop.f32.mrf.mxu1 }
 0x738   :  { %v3752_v19 = vmul.f32 -1.442695, %v2738_v18  ;;  %4181 = vpow2.f32 %v3751_v29  ;;  %v4176_v17 = vpop.eup %4175  ;;  %v2481_v36 = vld [vmem:[#allocation4 + $0x218] sm:$0xff] }
 0x739   :  { %v2608_v63 = vpop.f32.mrf.mxu0  ;;  %v2649_v61 = vpop.f32.mrf.mxu1  ;;  %4183 = vpow2.f32 %v3750_v3  ;;  %v2772_v15 = vadd.f32 1.0, %v4176_v17  ;;  %v2740_v16 = vadd.f32 %v2646_v58, %v2481_v36  ;;  %v2483_v58 = vld [vmem:[#allocation4 + $0x228] sm:$0xff] }
 0x73a   :  { %4185 = vpow2.f32 %v3752_v19  ;;  %v4178_v41 = vpop.eup %4177  ;;  %v2485_v19 = vld [vmem:[#allocation4 + $0x238] sm:$0xff] }
 0x73b   :  { %v4180_v7 = vpop.eup %4179  ;;  %v2774_v63 = vadd.f32 1.0, %v4178_v41  ;;  %4187 = vrcp.f32 %v2772_v15  ;;  %v3754_v1 = vmul.f32 -1.442695, %v2740_v16 }
 0x73c   :  { %v2773_v0 = vadd.f32 1.0, %v4180_v7 }
 0x73d   :  { %4189 = vrcp.f32 %v2774_v63 }
 0x73e   :  { %4191 = vrcp.f32 %v2773_v0 }
 0x73f   :  { %4193 = vpow2.f32 %v3753_v57 }
 0x740   :  { %4195 = vpow2.f32 %v3754_v1 }
 0x745   :  { %v4182_v61 = vpop.eup %4181 }
 0x746   :  { %v4184_v20 = vpop.eup %4183  ;;  %v2776_v56 = vadd.f32 1.0, %v4182_v61 }
 0x747   :  { %v4186_v62 = vpop.eup %4185  ;;  %v2775_v54 = vadd.f32 1.0, %v4184_v20 }
 0x748   :  { %v2777_v39 = vadd.f32 1.0, %v4186_v62  ;;  %4197 = vrcp.f32 %v2776_v56  ;;  %v4188_v61 = vpop.eup %4187 }
 0x749   :  { %4199 = vrcp.f32 %v2775_v54 }
 0x74a   :  { %v4190_v0 = vpop.eup %4189 }
 0x74b   :  { %v4192_v20 = vpop.eup %4191 }
 0x74c   :  { %v4194_v57 = vpop.eup %4193 }
 0x74d   :  { %v4196_v1 = vpop.eup %4195 }
 0x753   :  { %v2685_v8 = vpop.f32.mrf.mxu0  ;;  %v2726_v18 = vpop.f32.mrf.mxu1 }
 0x754   :  { %v2741_v29 = vadd.f32 %v2685_v8, %v2482_v52  ;;  %v2743_v3 = vadd.f32 %v2726_v18, %v2484_v26  ;;  %v2778_v52 = vadd.f32 1.0, %v4194_v57  ;;  %v2779_v8 = vadd.f32 1.0, %v4196_v1  ;;  %v2820_v57 = vld [vmem:[#allocation7 + $0x88] sm:$0xff] }
 0x755   :  { %v2687_v55 = vpop.f32.mrf.mxu0  ;;  %v2728_v17 = vpop.f32.mrf.mxu1 }
 0x756   :  { %v3755_v36 = vmul.f32 -1.442695, %v2741_v29  ;;  %4201 = vtanh.f32 %v2743_v3  ;;  %v2742_v41 = vadd.f32 %v2687_v55, %v2483_v58  ;;  %v2744_v7 = vadd.f32 %v2728_v17, %v2485_v19  ;;  %v4198_v62 = vpop.eup %4197  ;;  %v2819_v29 = vld [vmem:[#allocation7 + $0x80] sm:$0xff] }
 0x757   :  { %4203 = vrcp.f32 %v2777_v39  ;;  %v2689_v40 = vpop.f32.mrf.mxu0  ;;  %v2730_v15 = vpop.f32.mrf.mxu1  ;;  %v2803_v39 = vmul.f32 %v4198_v62, %v5785_v23 }
 0x758   :  { %4205 = vpow2.f32 %v3755_v36  ;;  %v4200_v56 = vpop.eup %4199  ;;  %v2818_v40 = vld [vmem:[#allocation7 + $0x78] sm:$0xff] }
 0x759   :  { %4207 = vtanh.f32 %v2742_v41  ;;  %v2690_v16 = vpop.f32.mrf.mxu0  ;;  %v2731_v63 = vpop.f32.mrf.mxu1  ;;  %v2802_v36 = vmul.f32 %v4200_v56, %v5785_v23 }
 0x75a   :  { %4209 = vtanh.f32 %v2744_v7 }
 0x75b   :  { %4211 = vrcp.f32 %v2778_v52 }
 0x75c   :  { %4213 = vrcp.f32 %v2779_v8 }
 0x763   :  { %v4202_v54 = vpop.eup %4201 }
 0x764   :  { %v4204_v26 = vpop.eup %4203  ;;  %v2806_v18 = vmul.f32 %v4202_v54, %v4192_v20 }
 0x765   :  { %v4206_v58 = vpop.eup %4205  ;;  %v2804_v15 = vmul.f32 %v4204_v26, %v5785_v23 }
 0x766   :  { %v4208_v3 = vpop.eup %4207  ;;  %v2780_v19 = vadd.f32 1.0, %v4206_v58  ;;  %v2809_v55 = vadd.f32 %v2806_v18, %v2803_v39 }
 0x767   :  { %v4210_v17 = vpop.eup %4209  ;;  %v2805_v41 = vmul.f32 %v4208_v3, %v4188_v61 }
 0x768   :  { %v2825_v7 = vmul.f32 %v2819_v29, %v2809_v55  ;;  %v2807_v16 = vmul.f32 %v4210_v17, %v4190_v0  ;;  %4215 = vtanh.f32 %v2809_v55  ;;  %v4212_v56 = vpop.eup %4211 }
 0x769   :  { %v2808_v63 = vadd.f32 %v2805_v41, %v2802_v36  ;;  %4217 = vrcp.f32 %v2780_v19  ;;  %v4214_v61 = vpop.eup %4213 }
 0x76a   :  { %v2810_v20 = vadd.f32 %v2807_v16, %v2804_v15  ;;  %v6795_v15 = vld [vmem:[#allocation55_spill] sm:$0xff]  ;;  %v6796_v16 = vld [vmem:[#allocation56_spill] sm:$0xff] }
 0x76b   :  { %4219 = vtanh.f32 %v2808_v63  ;;  %v2824_v1 = vmul.f32 %v2818_v40, %v2808_v63  ;;  %v6797_v63 = vld [vmem:[#allocation57_spill] sm:$0xff] }
 0x76c   :  { %4221 = vtanh.f32 %v2810_v20  ;;  %v2826_v62 = vmul.f32 %v2820_v57, %v2810_v20  ;;  %v6799_v20 = vld [vmem:[#allocation59_spill] sm:$0xff] }
 0x76d   :  { %v2828_v54 = vadd.f32 %v2825_v7, %v2824_v1  ;;  %v6793_v7 = vld [vmem:[#allocation41_spill] sm:$0xff]  ;;  %v6800_v1 = vld [vmem:[#allocation60_spill] sm:$0xff] }
 0x76f   :  { %v6030_v52 = vadd.f32 %v2828_v54, %v2826_v62  ;;  %v6801_v62 = vld [vmem:[#allocation22_spill] sm:$0xff]  ;;  %v6802_v54 = vld [vmem:[#allocation23_spill] sm:$0xff] }
 0x775   :  { %v4216_v8 = vpop.eup %4215 }
 0x776   :  { %v4218_v39 = vpop.eup %4217  ;;  %v2815_v18 = vmul.f32 %v4216_v8, %v4214_v61  ;;  %v6804_v61 = vld [vmem:[#allocation25_spill] sm:$0xff]  ;;  %v6805_v8 = vld [vmem:[#allocation26_spill] sm:$0xff] }
 0x778   :  { %v4220_v58 = vpop.eup %4219  ;;  %v2822_v3 = vmul.f32 %v2819_v29, %v2815_v18  ;;  %v6792_v29 = vld [vmem:[#allocation40_spill] sm:$0xff]  ;;  %v6807_v18 = vld [vmem:[#allocation62_spill] sm:$0xff] }
 0x779   :  { %v4222_v23 = vpop.eup %4221  ;;  %v2814_v0 = vmul.f32 %v4220_v58, %v4212_v56  ;;  %v6803_v56 = vld [vmem:[#allocation24_spill] sm:$0xff]  ;;  %v6808_v58 = vld [vmem:[#allocation63_spill] sm:$0xff] }
 0x77a   :  { %v2816_v26 = vmul.f32 %v4222_v23, %v4218_v39  ;;  %v6806_v39 = vld [vmem:[#allocation61_spill] sm:$0xff]  ;;  %v6809_v23 = vld [vmem:[#allocation64_spill] sm:$0xff] }
 0x77b   :  { %v2821_v55 = vmul.f32 %v2818_v40, %v2814_v0  ;;  %v6794_v40 = vld [vmem:[#allocation54_spill] sm:$0xff] }
 0x77c   :  { %v2823_v19 = vmul.f32 %v2820_v57, %v2816_v26  ;;  %v6798_v57 = vld [vmem:[#allocation58_spill] sm:$0xff]  ;;  %v6811_v26 = vld [vmem:[#allocation43_spill] sm:$0xff] }
 0x77d   :  { %v2827_v17 = vadd.f32 %v2822_v3, %v2821_v55  ;;  %v6810_v0 = vld [vmem:[#allocation42_spill] sm:$0xff]  ;;  %v6812_v3 = vld [vmem:[#allocation44_spill] sm:$0xff]  ;;  %v6813_v55 = vld [vmem:[#allocation45_spill] sm:$0xff] }
 0x77f   :  { %v2829_v36 = vadd.f32 %v2827_v17, %v2823_v19  ;;  %v6094_v19 = vld [vmem:[#allocation9 + $0xe0] ss:$48 sps:$4 sm:$0xff]   ;;  %v6097_v17 = vld [vmem:[#allocation9 + $0xe8] ss:$48 sps:$4 sm:$0xff]  }
 0x780   :  { %6814 = vst [vmem:[#allocation40_spill] sm:$0xff] %v6094_v19  ;;  %6815 = vst [vmem:[#allocation41_spill] sm:$0xff] %v6097_v17 }
 0x781   :  { %2832 = vst [vmem:[#allocation13 + $0x28] sm:$0xff] %v2829_v36  ;;  %v6032_v41 = vpack.c.bf16 %v2829_v36, %v2829_v36  ;;  %v6100_v36 = vld [vmem:[#allocation9 + $0x84] ss:$48 sps:$4 sm:$0xff]  }
 0x782   :  { %6816 = vst [vmem:[#allocation54_spill] sm:$0xff] %v6100_v36 }
 0x783   :  { %2880 = vmatmul.mubr.bf16.vlgmr.msra.gmra.mxu0 %v6032_v41  ;;  %2921 = vmatmul.mubr.bf16.vlgmr.msra.gmra.mxu1 %v6032_v41 }
 0x784   :  { %2930 = vmatpush1.bf16.msra.mxu0 %v5791_v49  ;;  %2971 = vmatpush1.bf16.msra.mxu1 %v5794_v53 }
 0x785   :  { %2931 = vmatprep.subr.bf16.mxu0 %v5797_v30  ;;  %2972 = vmatprep.subr.bf16.mxu1 %v5800_v12 }
 0x786   :  { %2961 = vmatprep.mubr.bf16.mxu0 %v6528_v33  ;;  %3002 = vmatprep.mubr.bf16.mxu1 %v6528_v33 }
 0x788   :  { %2932 = vmatpush1.bf16.msra.mxu0 %v5805_v21  ;;  %2973 = vmatpush1.bf16.msra.mxu1 %v5808_v4 }
 0x789   :  { %2933 = vmatprep.subr.bf16.mxu0 %v5811_v14  ;;  %2974 = vmatprep.subr.bf16.mxu1 %v5814_v5 }
 0x78c   :  { %2934 = vmatpush1.bf16.msra.mxu0 %v5817_v37  ;;  %2975 = vmatpush1.bf16.msra.mxu1 %v5820_v45 }
 0x78d   :  { %2935 = vmatprep.subr.bf16.mxu0 %v5823_v43  ;;  %2976 = vmatprep.subr.bf16.mxu1 %v5826_v2 }
 0x790   :  { %2936 = vmatpush1.bf16.msra.mxu0 %v5829_v6  ;;  %2977 = vmatpush1.bf16.msra.mxu1 %v5832_v34 }
 0x791   :  { %2937 = vmatprep.subr.bf16.mxu0 %v5835_v46  ;;  %2978 = vmatprep.subr.bf16.mxu1 %v5838_v47 }
 0x794   :  { %2938 = vmatpush1.bf16.msra.mxu0 %v5841_v31  ;;  %2979 = vmatpush1.bf16.msra.mxu1 %v5844_v48 }
 0x795   :  { %2939 = vmatprep.subr.bf16.mxu0 %v5847_v24  ;;  %2980 = vmatprep.subr.bf16.mxu1 %v5850_v25 }
 0x798   :  { %2940 = vmatpush1.bf16.msra.mxu0 %v5853_v50  ;;  %2981 = vmatpush1.bf16.msra.mxu1 %v5856_v27 }
 0x799   :  { %2941 = vmatprep.subr.bf16.mxu0 %v5859_v13  ;;  %2982 = vmatprep.subr.bf16.mxu1 %v5862_v22 }
 0x79c   :  { %2942 = vmatpush1.bf16.msra.mxu0 %v6792_v29  ;;  %2983 = vmatpush1.bf16.msra.mxu1 %v6793_v7 }
 0x79d   :  { %2943 = vmatprep.subr.bf16.mxu0 %v6794_v40  ;;  %2984 = vmatprep.subr.bf16.mxu1 %v6795_v15 }
 0x7a0   :  { %2944 = vmatpush1.bf16.msra.mxu0 %v6796_v16  ;;  %2985 = vmatpush1.bf16.msra.mxu1 %v6797_v63 }
 0x7a1   :  { %3011 = vmatprep.subr.bf16.mxu0 %v6798_v57  ;;  %3052 = vmatprep.subr.bf16.mxu1 %v6799_v20 }
 0x7a3   :  { %2962 = vmatmul.mubr.bf16.vlgmr.msra.gmra.mxu0 %v6032_v41  ;;  %3003 = vmatmul.mubr.bf16.vlgmr.msra.gmra.mxu1 %v6032_v41 }
 0x7a4   :  { %3012 = vmatpush1.bf16.msra.mxu0 %v6800_v1  ;;  %3053 = vmatpush1.bf16.msra.mxu1 %v6801_v62 }
 0x7a5   :  { %3013 = vmatprep.subr.bf16.mxu0 %v6802_v54  ;;  %3054 = vmatprep.subr.bf16.mxu1 %v6803_v56 }
 0x7a6   :  { %3043 = vmatprep.mubr.bf16.mxu0 %v6528_v33  ;;  %3084 = vmatprep.mubr.bf16.mxu1 %v6528_v33 }
 0x7a8   :  { %3014 = vmatpush1.bf16.msra.mxu0 %v6804_v61  ;;  %3055 = vmatpush1.bf16.msra.mxu1 %v6805_v8 }
 0x7a9   :  { %3015 = vmatprep.subr.bf16.mxu0 %v6806_v39  ;;  %3056 = vmatprep.subr.bf16.mxu1 %v6807_v18 }
 0x7ac   :  { %3016 = vmatpush1.bf16.msra.mxu0 %v6808_v58  ;;  %3057 = vmatpush1.bf16.msra.mxu1 %v6809_v23 }
 0x7ad   :  { %3017 = vmatprep.subr.bf16.mxu0 %v6810_v0  ;;  %3058 = vmatprep.subr.bf16.mxu1 %v6811_v26  ;;  %v2838_v26 = vld [vmem:[#allocation4 + $0x260] sm:$0xff] }
 0x7b0   :  { %3018 = vmatpush1.bf16.msra.mxu0 %v6812_v3  ;;  %3059 = vmatpush1.bf16.msra.mxu1 %v6813_v55 }
 0x7b1   :  { %3019 = vmatprep.subr.bf16.mxu0 %v5935_v51  ;;  %3060 = vmatprep.subr.bf16.mxu1 %v5938_v11  ;;  %v6103_v11 = vld [vmem:[#allocation9 + $0x8c] ss:$48 sps:$4 sm:$0xff]  }
 0x7b2   :  { %6817 = vst [vmem:[#allocation55_spill] sm:$0xff] %v6103_v11  ;;  %v2835_v51 = vld [vmem:[#allocation4 + $0x248] sm:$0xff] }
 0x7b4   :  { %3020 = vmatpush1.bf16.msra.mxu0 %v5941_v28  ;;  %3061 = vmatpush1.bf16.msra.mxu1 %v5944_v9  ;;  %v6106_v9 = vld [vmem:[#allocation9 + $0x80] ss:$48 sps:$4 sm:$0xff]  }
 0x7b5   :  { %3021 = vmatprep.subr.bf16.mxu0 %v5947_v44  ;;  %3062 = vmatprep.subr.bf16.mxu1 %v5950_v32  ;;  %6818 = vst [vmem:[#allocation56_spill] sm:$0xff] %v6106_v9  ;;  %v6109_v32 = vld [vmem:[#allocation9 + $0x88] ss:$48 sps:$4 sm:$0xff]   ;;  %v2834_v28 = vld [vmem:[#allocation4 + $0x240] sm:$0xff] }
 0x7b6   :  { %6819 = vst [vmem:[#allocation57_spill] sm:$0xff] %v6109_v32 }
 0x7b8   :  { %3022 = vmatpush1.bf16.msra.mxu0 %v6094_v19  ;;  %3063 = vmatpush1.bf16.msra.mxu1 %v6097_v17  ;;  %v6112_v19 = vld [vmem:[#allocation9 + $0x24] ss:$48 sps:$4 sm:$0xff]   ;;  %v6115_v17 = vld [vmem:[#allocation9 + $0x2c] ss:$48 sps:$4 sm:$0xff]  }
 0x7b9   :  { %3023 = vmatprep.subr.bf16.mxu0 %v6100_v36  ;;  %3064 = vmatprep.subr.bf16.mxu1 %v6103_v11  ;;  %6820 = vst [vmem:[#allocation58_spill] sm:$0xff] %v6112_v19  ;;  %6821 = vst [vmem:[#allocation59_spill] sm:$0xff] %v6115_v17  ;;  %v6118_v36 = vld [vmem:[#allocation9 + $0x20] ss:$48 sps:$4 sm:$0xff]   ;;  %v6121_v11 = vld [vmem:[#allocation9 + $0x28] ss:$48 sps:$4 sm:$0xff]  }
 0x7ba   :  { %6822 = vst [vmem:[#allocation60_spill] sm:$0xff] %v6118_v36  ;;  %6823 = vst [vmem:[#allocation22_spill] sm:$0xff] %v6121_v11 }
 0x7bc   :  { %3024 = vmatpush1.bf16.msra.mxu0 %v6106_v9  ;;  %3065 = vmatpush1.bf16.msra.mxu1 %v6109_v32 }
 0x7bd   :  { %3025 = vmatprep.subr.bf16.mxu0 %v6112_v19  ;;  %3066 = vmatprep.subr.bf16.mxu1 %v6115_v17  ;;  %v6833_v17 = vld [vmem:[#allocation34_spill] sm:$0xff]  ;;  %v6834_v19 = vld [vmem:[#allocation35_spill] sm:$0xff] }
 0x7c0   :  { %3026 = vmatpush1.bf16.msra.mxu0 %v6118_v36  ;;  %3067 = vmatpush1.bf16.msra.mxu1 %v6121_v11  ;;  %v6824_v11 = vld [vmem:[#allocation52_spill] sm:$0xff] }
 0x7c1   :  { %3207 = vmatprep.subr.bf16.mxu0 %v5702_v42  ;;  %3248 = vmatprep.subr.bf16.mxu1 %v5705_v59  ;;  %v6825_v42 = vld [vmem:[#allocation53_spill] sm:$0xff]  ;;  %v6826_v59 = vld [vmem:[#allocation27_spill] sm:$0xff]  ;;  %v6827_v36 = vld [vmem:[#allocation28_spill] sm:$0xff] }
 0x7c3   :  { %3044 = vmatmul.mubr.bf16.vlgmr.msra.gmra.mxu0 %v6032_v41  ;;  %3085 = vmatmul.mubr.bf16.vlgmr.msra.gmra.mxu1 %v6032_v41  ;;  %v6828_v41 = vld [vmem:[#allocation29_spill] sm:$0xff] }
 0x7c4   :  { %3208 = vmatpush1.bf16.msra.mxu0 %v5710_v60  ;;  %3249 = vmatpush1.bf16.msra.mxu1 %v5713_v10  ;;  %v6829_v60 = vld [vmem:[#allocation30_spill] sm:$0xff]  ;;  %v6830_v10 = vld [vmem:[#allocation31_spill] sm:$0xff] }
 0x7c5   :  { %3209 = vmatprep.subr.bf16.mxu0 %v5716_v35  ;;  %3250 = vmatprep.subr.bf16.mxu1 %v5719_v38  ;;  %v6831_v35 = vld [vmem:[#allocation32_spill] sm:$0xff]  ;;  %v6832_v38 = vld [vmem:[#allocation33_spill] sm:$0xff] }
 0x7c6   :  { %3239 = vmatprep.mubr.bf16.mxu0 %v6528_v33  ;;  %3280 = vmatprep.mubr.bf16.mxu1 %v6528_v33 }
 0x7c8   :  { %3210 = vmatpush1.bf16.msra.mxu0 %v6824_v11  ;;  %3251 = vmatpush1.bf16.msra.mxu1 %v6825_v42  ;;  %v6835_v11 = vld [vmem:[#allocation36_spill] sm:$0xff]  ;;  %v6836_v42 = vld [vmem:[#allocation37_spill] sm:$0xff] }
 0x7c9   :  { %3211 = vmatprep.subr.bf16.mxu0 %v6826_v59  ;;  %3252 = vmatprep.subr.bf16.mxu1 %v6827_v36  ;;  %v6837_v59 = vld [vmem:[#allocation38_spill] sm:$0xff]  ;;  %v6838_v36 = vld [vmem:[#allocation39_spill] sm:$0xff] }
 0x7cc   :  { %3212 = vmatpush1.bf16.msra.mxu0 %v6828_v41  ;;  %3253 = vmatpush1.bf16.msra.mxu1 %v6829_v60  ;;  %v6839_v41 = vld [vmem:[#allocation65_spill] sm:$0xff]  ;;  %v6840_v60 = vld [vmem:[#allocation66_spill] sm:$0xff] }
 0x7cd   :  { %3213 = vmatprep.subr.bf16.mxu0 %v6830_v10  ;;  %3254 = vmatprep.subr.bf16.mxu1 %v6831_v35  ;;  %v6841_v10 = vld [vmem:[#allocation67_spill] sm:$0xff]  ;;  %v6842_v35 = vld [vmem:[#allocation68_spill] sm:$0xff] }
 0x7d0   :  { %3214 = vmatpush1.bf16.msra.mxu0 %v6832_v38  ;;  %3255 = vmatpush1.bf16.msra.mxu1 %v6833_v17  ;;  %v6843_v38 = vld [vmem:[#allocation69_spill] sm:$0xff]  ;;  %v6844_v17 = vld [vmem:[#allocation70_spill] sm:$0xff] }
 0x7d1   :  { %3215 = vmatprep.subr.bf16.mxu0 %v6834_v19  ;;  %3256 = vmatprep.subr.bf16.mxu1 %v6835_v11  ;;  %v6845_v19 = vld [vmem:[#allocation71_spill] sm:$0xff]  ;;  %v6846_v11 = vld [vmem:[#allocation72_spill] sm:$0xff] }
 0x7d4   :  { %3216 = vmatpush1.bf16.msra.mxu0 %v6836_v42  ;;  %3257 = vmatpush1.bf16.msra.mxu1 %v6837_v59  ;;  %v6847_v42 = vld [vmem:[#allocation73_spill] sm:$0xff]  ;;  %v6848_v59 = vld [vmem:[#allocation74_spill] sm:$0xff] }
 0x7d5   :  { %3217 = vmatprep.subr.bf16.mxu0 %v6838_v36  ;;  %3258 = vmatprep.subr.bf16.mxu1 %v6839_v41  ;;  %v6849_v36 = vld [vmem:[#allocation75_spill] sm:$0xff]  ;;  %v6850_v41 = vld [vmem:[#allocation76_spill] sm:$0xff] }
 0x7d8   :  { %3218 = vmatpush1.bf16.msra.mxu0 %v6840_v60  ;;  %3259 = vmatpush1.bf16.msra.mxu1 %v6841_v10  ;;  %v6851_v60 = vld [vmem:[#allocation77_spill] sm:$0xff] }
 0x7d9   :  { %3219 = vmatprep.subr.bf16.mxu0 %v6842_v35  ;;  %3260 = vmatprep.subr.bf16.mxu1 %v6843_v38 }
 0x7dc   :  { %3220 = vmatpush1.bf16.msra.mxu0 %v6844_v17  ;;  %3261 = vmatpush1.bf16.msra.mxu1 %v6845_v19 }
 0x7dd   :  { %3221 = vmatprep.subr.bf16.mxu0 %v6846_v11  ;;  %3262 = vmatprep.subr.bf16.mxu1 %v6847_v42  ;;  %v2836_v11 = vld [vmem:[#allocation4 + $0x250] sm:$0xff] }
 0x7e0   :  { %3222 = vmatpush1.bf16.msra.mxu0 %v6848_v59  ;;  %3263 = vmatpush1.bf16.msra.mxu1 %v6849_v36 }
 0x7e1   :  { %3289 = vmatprep.subr.bf16.mxu0 %v6850_v41  ;;  %3330 = vmatprep.subr.bf16.mxu1 %v6851_v60  ;;  %v2837_v60 = vld [vmem:[#allocation4 + $0x258] sm:$0xff] }
 0x843   :  { %v2881_v10 = vpop.f32.mrf.mxu0  ;;  %v2922_v35 = vpop.f32.mrf.mxu1 }
 0x844   :  { %v3093_v42 = vadd.f32 %v2881_v10, %v2834_v28  ;;  %v3095_v3 = vadd.f32 %v2922_v35, %v2836_v11  ;;  %v2840_v35 = vld [vmem:[#allocation4 + $0x270] sm:$0xff] }
 0x845   :  { %v2883_v32 = vpop.f32.mrf.mxu0  ;;  %v2924_v38 = vpop.f32.mrf.mxu1 }
 0x846   :  { %v3094_v36 = vadd.f32 %v2883_v32, %v2835_v51  ;;  %v3756_v23 = vmul.f32 -1.442695, %v3093_v42  ;;  %v3758_v39 = vmul.f32 -1.442695, %v3095_v3 }
 0x847   :  { %v2885_v9 = vpop.f32.mrf.mxu0  ;;  %v2926_v17 = vpop.f32.mrf.mxu1 }
 0x848   :  { %v2839_v17 = vld [vmem:[#allocation4 + $0x268] sm:$0xff]  ;;  %4223 = vpow2.f32 %v3756_v23 }
 0x849   :  { %v2886_v44 = vpop.f32.mrf.mxu0  ;;  %v2927_v19 = vpop.f32.mrf.mxu1  ;;  %4225 = vpow2.f32 %v3758_v39 }
 0x84a   :  { %v3757_v44 = vmul.f32 -1.442695, %v3094_v36  ;;  %v3096_v19 = vadd.f32 %v2924_v38, %v2837_v60 }
 0x84c   :  { %4227 = vpow2.f32 %v3757_v44  ;;  %v3759_v51 = vmul.f32 -1.442695, %v3096_v19  ;;  %v2844_v44 = vld [vmem:[#allocation4 + $0x290] sm:$0xff] }
 0x863   :  { %v2963_v55 = vpop.f32.mrf.mxu0  ;;  %v3004_v59 = vpop.f32.mrf.mxu1 }
 0x864   :  { %v3097_v9 = vadd.f32 %v2963_v55, %v2838_v26  ;;  %v3099_v55 = vadd.f32 %v3004_v59, %v2840_v35 }
 0x865   :  { %v2965_v41 = vpop.f32.mrf.mxu0  ;;  %v3006_v0 = vpop.f32.mrf.mxu1 }
 0x866   :  { %v3098_v28 = vadd.f32 %v2965_v41, %v2839_v17  ;;  %v3760_v10 = vmul.f32 -1.442695, %v3097_v9  ;;  %v3762_v39 = vmul.f32 -1.442695, %v3099_v55  ;;  %v2842_v17 = vld [vmem:[#allocation4 + $0x280] sm:$0xff] }
 0x867   :  { %v2967_v58 = vpop.f32.mrf.mxu0  ;;  %v3008_v18 = vpop.f32.mrf.mxu1 }
 0x868   :  { %v3761_v32 = vmul.f32 -1.442695, %v3098_v28  ;;  %4229 = vpow2.f32 %v3760_v10  ;;  %v4224_v58 = vpop.eup %4223  ;;  %v2841_v18 = vld [vmem:[#allocation4 + $0x278] sm:$0xff] }
 0x869   :  { %v2968_v8 = vpop.f32.mrf.mxu0  ;;  %v3009_v61 = vpop.f32.mrf.mxu1  ;;  %4231 = vpow2.f32 %v3759_v51  ;;  %v3132_v11 = vadd.f32 1.0, %v4224_v58  ;;  %v3100_v38 = vadd.f32 %v3006_v0, %v2841_v18  ;;  %v2843_v0 = vld [vmem:[#allocation4 + $0x288] sm:$0xff] }
 0x86a   :  { %4233 = vpow2.f32 %v3761_v32  ;;  %v4226_v3 = vpop.eup %4225  ;;  %v2845_v32 = vld [vmem:[#allocation4 + $0x298] sm:$0xff] }
 0x86b   :  { %v4228_v26 = vpop.eup %4227  ;;  %v3134_v8 = vadd.f32 1.0, %v4226_v3  ;;  %4235 = vrcp.f32 %v3132_v11  ;;  %v3763_v36 = vmul.f32 -1.442695, %v3100_v38 }
 0x86c   :  { %v3133_v23 = vadd.f32 1.0, %v4228_v26 }
 0x86d   :  { %4237 = vrcp.f32 %v3134_v8 }
 0x86e   :  { %4239 = vrcp.f32 %v3133_v23 }
 0x86f   :  { %4241 = vpow2.f32 %v3762_v39 }
 0x870   :  { %4243 = vpow2.f32 %v3763_v36 }
 0x875   :  { %v4230_v61 = vpop.eup %4229 }
 0x876   :  { %v4232_v42 = vpop.eup %4231  ;;  %v3136_v60 = vadd.f32 1.0, %v4230_v61 }
 0x877   :  { %v4234_v41 = vpop.eup %4233  ;;  %v3135_v9 = vadd.f32 1.0, %v4232_v42 }
 0x878   :  { %v3137_v19 = vadd.f32 1.0, %v4234_v41  ;;  %4245 = vrcp.f32 %v3136_v60  ;;  %v4236_v61 = vpop.eup %4235 }
 0x879   :  { %4247 = vrcp.f32 %v3135_v9 }
 0x87a   :  { %v4238_v23 = vpop.eup %4237 }
 0x87b   :  { %v4240_v42 = vpop.eup %4239 }
 0x87c   :  { %v4242_v39 = vpop.eup %4241 }
 0x87d   :  { %v4244_v36 = vpop.eup %4243 }
 0x883   :  { %v3045_v59 = vpop.f32.mrf.mxu0  ;;  %v3086_v28 = vpop.f32.mrf.mxu1 }
 0x884   :  { %v3101_v10 = vadd.f32 %v3045_v59, %v2842_v17  ;;  %v3103_v51 = vadd.f32 %v3086_v28, %v2844_v44  ;;  %v3138_v17 = vadd.f32 1.0, %v4242_v39  ;;  %v3139_v59 = vadd.f32 1.0, %v4244_v36  ;;  %v3180_v39 = vld [vmem:[#allocation7 + $0xa0] sm:$0xff] }
 0x885   :  { %v3047_v35 = vpop.f32.mrf.mxu0  ;;  %v3088_v58 = vpop.f32.mrf.mxu1 }
 0x886   :  { %v3764_v18 = vmul.f32 -1.442695, %v3101_v10  ;;  %4249 = vtanh.f32 %v3103_v51  ;;  %v3102_v3 = vadd.f32 %v3047_v35, %v2843_v0  ;;  %v3104_v26 = vadd.f32 %v3088_v58, %v2845_v32  ;;  %v4246_v41 = vpop.eup %4245  ;;  %v3179_v10 = vld [vmem:[#allocation7 + $0x98] sm:$0xff] }
 0x887   :  { %4251 = vrcp.f32 %v3137_v19  ;;  %v3049_v55 = vpop.f32.mrf.mxu0  ;;  %v3090_v11 = vpop.f32.mrf.mxu1  ;;  %v3163_v19 = vmul.f32 %v4246_v41, %v6030_v52 }
 0x888   :  { %4253 = vpow2.f32 %v3764_v18  ;;  %v4248_v60 = vpop.eup %4247  ;;  %v3178_v55 = vld [vmem:[#allocation7 + $0x90] sm:$0xff] }
 0x889   :  { %4255 = vtanh.f32 %v3102_v3  ;;  %v3050_v38 = vpop.f32.mrf.mxu0  ;;  %v3091_v8 = vpop.f32.mrf.mxu1  ;;  %v3162_v18 = vmul.f32 %v4248_v60, %v6030_v52 }
 0x88a   :  { %4257 = vtanh.f32 %v3104_v26 }
 0x88b   :  { %4259 = vrcp.f32 %v3138_v17 }
 0x88c   :  { %4261 = vrcp.f32 %v3139_v59 }
 0x893   :  { %v4250_v9 = vpop.eup %4249 }
 0x894   :  { %v4252_v44 = vpop.eup %4251  ;;  %v3166_v28 = vmul.f32 %v4250_v9, %v4240_v42 }
 0x895   :  { %v4254_v0 = vpop.eup %4253  ;;  %v3164_v11 = vmul.f32 %v4252_v44, %v6030_v52 }
 0x896   :  { %v4256_v51 = vpop.eup %4255  ;;  %v3140_v32 = vadd.f32 1.0, %v4254_v0  ;;  %v3169_v35 = vadd.f32 %v3166_v28, %v3163_v19 }
 0x897   :  { %v4258_v58 = vpop.eup %4257  ;;  %v3165_v3 = vmul.f32 %v4256_v51, %v4236_v61 }
 0x898   :  { %v3185_v26 = vmul.f32 %v3179_v10, %v3169_v35  ;;  %v3167_v38 = vmul.f32 %v4258_v58, %v4238_v23  ;;  %4263 = vtanh.f32 %v3169_v35  ;;  %v4260_v60 = vpop.eup %4259 }
 0x899   :  { %v3168_v8 = vadd.f32 %v3165_v3, %v3162_v18  ;;  %4265 = vrcp.f32 %v3140_v32  ;;  %v4262_v61 = vpop.eup %4261 }
 0x89a   :  { %v3170_v42 = vadd.f32 %v3167_v38, %v3164_v11 }
 0x89b   :  { %4267 = vtanh.f32 %v3168_v8  ;;  %v3184_v36 = vmul.f32 %v3178_v55, %v3168_v8  ;;  %v3198_v8 = vld [vmem:[#allocation4 + $0x2c0] sm:$0xff] }
 0x89c   :  { %4269 = vtanh.f32 %v3170_v42  ;;  %v3186_v41 = vmul.f32 %v3180_v39, %v3170_v42 }
 0x89d   :  { %v3188_v9 = vadd.f32 %v3185_v26, %v3184_v36  ;;  %v3197_v36 = vld [vmem:[#allocation4 + $0x2b8] sm:$0xff] }
 0x89f   :  { %v6165_v17 = vadd.f32 %v3188_v9, %v3186_v41 }
 0x8a5   :  { %v4264_v59 = vpop.eup %4263 }
 0x8a6   :  { %v4266_v19 = vpop.eup %4265  ;;  %v3175_v28 = vmul.f32 %v4264_v59, %v4262_v61 }
 0x8a8   :  { %v4268_v0 = vpop.eup %4267  ;;  %v3182_v51 = vmul.f32 %v3179_v10, %v3175_v28 }
 0x8a9   :  { %v4270_v52 = vpop.eup %4269  ;;  %v3174_v23 = vmul.f32 %v4268_v0, %v4260_v60 }
 0x8aa   :  { %v3176_v44 = vmul.f32 %v4270_v52, %v4266_v19  ;;  %v3199_v19 = vld [vmem:[#allocation4 + $0x2c8] sm:$0xff] }
 0x8ab   :  { %v3181_v35 = vmul.f32 %v3178_v55, %v3174_v23 }
 0x8ac   :  { %v3183_v32 = vmul.f32 %v3180_v39, %v3176_v44 }
 0x8ad   :  { %v3187_v58 = vadd.f32 %v3182_v51, %v3181_v35 }
 0x8af   :  { %v3189_v18 = vadd.f32 %v3187_v58, %v3183_v32  ;;  %v3200_v58 = vld [vmem:[#allocation4 + $0x2d0] sm:$0xff] }
 0x8b1   :  { %3192 = vst [vmem:[#allocation13 + $0x30] sm:$0xff] %v3189_v18  ;;  %v6167_v3 = vpack.c.bf16 %v3189_v18, %v3189_v18 }
 0x8b3   :  { %3240 = vmatmul.mubr.bf16.vlgmr.msra.gmra.mxu0 %v6167_v3  ;;  %3281 = vmatmul.mubr.bf16.vlgmr.msra.gmra.mxu1 %v6167_v3 }
 0x8b4   :  { %3290 = vmatpush1.bf16.msra.mxu0 %v5791_v49  ;;  %3331 = vmatpush1.bf16.msra.mxu1 %v5794_v53  ;;  %v6852_v49 = vld [vmem:[#allocation25_spill] sm:$0xff]  ;;  %v6853_v53 = vld [vmem:[#allocation26_spill] sm:$0xff] }
 0x8b5   :  { %3291 = vmatprep.subr.bf16.mxu0 %v5797_v30  ;;  %3332 = vmatprep.subr.bf16.mxu1 %v5800_v12  ;;  %v6854_v30 = vld [vmem:[#allocation61_spill] sm:$0xff]  ;;  %v6855_v12 = vld [vmem:[#allocation62_spill] sm:$0xff] }
 0x8b6   :  { %3321 = vmatprep.mubr.bf16.mxu0 %v6528_v33  ;;  %3362 = vmatprep.mubr.bf16.mxu1 %v6528_v33 }
 0x8b8   :  { %3292 = vmatpush1.bf16.msra.mxu0 %v5805_v21  ;;  %3333 = vmatpush1.bf16.msra.mxu1 %v5808_v4  ;;  %v6856_v21 = vld [vmem:[#allocation63_spill] sm:$0xff]  ;;  %v6857_v4 = vld [vmem:[#allocation64_spill] sm:$0xff] }
 0x8b9   :  { %3293 = vmatprep.subr.bf16.mxu0 %v5811_v14  ;;  %3334 = vmatprep.subr.bf16.mxu1 %v5814_v5  ;;  %v6858_v14 = vld [vmem:[#allocation42_spill] sm:$0xff]  ;;  %v6859_v5 = vld [vmem:[#allocation43_spill] sm:$0xff] }
 0x8bc   :  { %3294 = vmatpush1.bf16.msra.mxu0 %v5817_v37  ;;  %3335 = vmatpush1.bf16.msra.mxu1 %v5820_v45  ;;  %v6860_v37 = vld [vmem:[#allocation44_spill] sm:$0xff]  ;;  %v6861_v45 = vld [vmem:[#allocation45_spill] sm:$0xff] }
 0x8bd   :  { %3295 = vmatprep.subr.bf16.mxu0 %v5823_v43  ;;  %3336 = vmatprep.subr.bf16.mxu1 %v5826_v2  ;;  %v6863_v43 = vld [vmem:[#allocation47_spill] sm:$0xff]  ;;  %v6864_v2 = vld [vmem:[#allocation48_spill] sm:$0xff] }
 0x8c0   :  { %3296 = vmatpush1.bf16.msra.mxu0 %v5829_v6  ;;  %3337 = vmatpush1.bf16.msra.mxu1 %v5832_v34  ;;  %v6865_v6 = vld [vmem:[#allocation49_spill] sm:$0xff]  ;;  %v6866_v34 = vld [vmem:[#allocation50_spill] sm:$0xff] }
 0x8c1   :  { %3297 = vmatprep.subr.bf16.mxu0 %v5835_v46  ;;  %3338 = vmatprep.subr.bf16.mxu1 %v5838_v47  ;;  %v6867_v46 = vld [vmem:[#allocation51_spill] sm:$0xff]  ;;  %v6868_v47 = vld [vmem:[#allocation40_spill] sm:$0xff] }
 0x8c4   :  { %3298 = vmatpush1.bf16.msra.mxu0 %v5841_v31  ;;  %3339 = vmatpush1.bf16.msra.mxu1 %v5844_v48  ;;  %v6869_v31 = vld [vmem:[#allocation41_spill] sm:$0xff]  ;;  %v6870_v48 = vld [vmem:[#allocation54_spill] sm:$0xff] }
 0x8c5   :  { %3299 = vmatprep.subr.bf16.mxu0 %v5847_v24  ;;  %3340 = vmatprep.subr.bf16.mxu1 %v5850_v25  ;;  %v6871_v24 = vld [vmem:[#allocation55_spill] sm:$0xff]  ;;  %v6872_v25 = vld [vmem:[#allocation56_spill] sm:$0xff] }
 0x8c8   :  { %3300 = vmatpush1.bf16.msra.mxu0 %v5853_v50  ;;  %3341 = vmatpush1.bf16.msra.mxu1 %v5856_v27  ;;  %v6873_v50 = vld [vmem:[#allocation57_spill] sm:$0xff]  ;;  %v6874_v27 = vld [vmem:[#allocation58_spill] sm:$0xff] }
 0x8c9   :  { %3301 = vmatprep.subr.bf16.mxu0 %v5859_v13  ;;  %3342 = vmatprep.subr.bf16.mxu1 %v5862_v22  ;;  %v6875_v13 = vld [vmem:[#allocation59_spill] sm:$0xff]  ;;  %v6876_v22 = vld [vmem:[#allocation60_spill] sm:$0xff] }
 0x8cc   :  { %3302 = vmatpush1.bf16.msra.mxu0 %v6792_v29  ;;  %3343 = vmatpush1.bf16.msra.mxu1 %v6793_v7  ;;  %v6877_v29 = vld [vmem:[#allocation22_spill] sm:$0xff] }
 0x8cd   :  { %3303 = vmatprep.subr.bf16.mxu0 %v6794_v40  ;;  %3344 = vmatprep.subr.bf16.mxu1 %v6795_v15 }
 0x8d0   :  { %3304 = vmatpush1.bf16.msra.mxu0 %v6796_v16  ;;  %3345 = vmatpush1.bf16.msra.mxu1 %v6797_v63 }
 0x8d1   :  { %3371 = vmatprep.subr.bf16.mxu0 %v6798_v57  ;;  %3412 = vmatprep.subr.bf16.mxu1 %v6799_v20 }
 0x8d3   :  { %3322 = vmatmul.mubr.bf16.vlgmr.msra.gmra.mxu0 %v6167_v3  ;;  %3363 = vmatmul.mubr.bf16.vlgmr.msra.gmra.mxu1 %v6167_v3 }
 0x8d4   :  { %3372 = vmatpush1.bf16.msra.mxu0 %v6800_v1  ;;  %3413 = vmatpush1.bf16.msra.mxu1 %v6801_v62  ;;  %v3194_v62 = vld [vmem:[#allocation4 + $0x2a0] sm:$0xff] }
 0x8d5   :  { %3373 = vmatprep.subr.bf16.mxu0 %v6802_v54  ;;  %3414 = vmatprep.subr.bf16.mxu1 %v6803_v56  ;;  %v3196_v54 = vld [vmem:[#allocation4 + $0x2b0] sm:$0xff]  ;;  %v3195_v56 = vld [vmem:[#allocation4 + $0x2a8] sm:$0xff] }
 0x8d6   :  { %3403 = vmatprep.mubr.bf16.mxu0 %v6528_v33  ;;  %3444 = vmatprep.mubr.bf16.mxu1 %v6528_v33  ;;  %v6862_v33 = vld [vmem:[#allocation46_spill] sm:$0xff] }
 0x8d8   :  { %3374 = vmatpush1.bf16.msra.mxu0 %v6852_v49  ;;  %3415 = vmatpush1.bf16.msra.mxu1 %v6853_v53 }
 0x8d9   :  { %3375 = vmatprep.subr.bf16.mxu0 %v6854_v30  ;;  %3416 = vmatprep.subr.bf16.mxu1 %v6855_v12 }
 0x8dc   :  { %3376 = vmatpush1.bf16.msra.mxu0 %v6856_v21  ;;  %3417 = vmatpush1.bf16.msra.mxu1 %v6857_v4 }
 0x8dd   :  { %3377 = vmatprep.subr.bf16.mxu0 %v6858_v14  ;;  %3418 = vmatprep.subr.bf16.mxu1 %v6859_v5 }
 0x8e0   :  { %3378 = vmatpush1.bf16.msra.mxu0 %v6860_v37  ;;  %3419 = vmatpush1.bf16.msra.mxu1 %v6861_v45 }
 0x8e1   :  { %3379 = vmatprep.subr.bf16.mxu0 %v6862_v33  ;;  %3420 = vmatprep.subr.bf16.mxu1 %v6863_v43 }
 0x8e4   :  { %3380 = vmatpush1.bf16.msra.mxu0 %v6864_v2  ;;  %3421 = vmatpush1.bf16.msra.mxu1 %v6865_v6 }
 0x8e5   :  { %3381 = vmatprep.subr.bf16.mxu0 %v6866_v34  ;;  %3422 = vmatprep.subr.bf16.mxu1 %v6867_v46  ;;  %v3202_v34 = vld [vmem:[#allocation4 + $0x2e0] sm:$0xff]  ;;  %v3204_v46 = vld [vmem:[#allocation4 + $0x2f0] sm:$0xff] }
 0x8e8   :  { %3382 = vmatpush1.bf16.msra.mxu0 %v6868_v47  ;;  %3423 = vmatpush1.bf16.msra.mxu1 %v6869_v31 }
 0x8e9   :  { %3383 = vmatprep.subr.bf16.mxu0 %v6870_v48  ;;  %3424 = vmatprep.subr.bf16.mxu1 %v6871_v24  ;;  %v3203_v24 = vld [vmem:[#allocation4 + $0x2e8] sm:$0xff] }
 0x8ec   :  { %3384 = vmatpush1.bf16.msra.mxu0 %v6872_v25  ;;  %3425 = vmatpush1.bf16.msra.mxu1 %v6873_v50 }
 0x8ed   :  { %3385 = vmatprep.subr.bf16.mxu0 %v6874_v27  ;;  %3426 = vmatprep.subr.bf16.mxu1 %v6875_v13  ;;  %v3205_v27 = vld [vmem:[#allocation4 + $0x2f8] sm:$0xff] }
 0x8f0   :  { %3386 = vmatpush1.bf16.msra.mxu0 %v6876_v22  ;;  %3427 = vmatpush1.bf16.msra.mxu1 %v6877_v29 }
 0x8f3   :  { %3404 = vmatmul.mubr.bf16.vlgmr.msra.gmra.mxu0 %v6167_v3  ;;  %3445 = vmatmul.mubr.bf16.vlgmr.msra.gmra.mxu1 %v6167_v3  ;;  %v3201_v3 = vld [vmem:[#allocation4 + $0x2d8] sm:$0xff] }
 0x973   :  { %v3241_v7 = vpop.f32.mrf.mxu0  ;;  %v3282_v40 = vpop.f32.mrf.mxu1 }
 0x974   :  { %v3453_v10 = vadd.f32 %v3241_v7, %v3194_v62  ;;  %v3455_v11 = vadd.f32 %v3282_v40, %v3196_v54 }
 0x975   :  { %v3243_v15 = vpop.f32.mrf.mxu0  ;;  %v3284_v16 = vpop.f32.mrf.mxu1 }
 0x976   :  { %v3454_v38 = vadd.f32 %v3243_v15, %v3195_v56  ;;  %v3765_v41 = vmul.f32 -1.442695, %v3453_v10  ;;  %v3767_v61 = vmul.f32 -1.442695, %v3455_v11  ;;  %v3456_v0 = vadd.f32 %v3284_v16, %v3197_v36 }
 0x977   :  { %v3245_v63 = vpop.f32.mrf.mxu0  ;;  %v3286_v57 = vpop.f32.mrf.mxu1 }
 0x978   :  { %v3766_v28 = vmul.f32 -1.442695, %v3454_v38  ;;  %4271 = vpow2.f32 %v3765_v41  ;;  %v3768_v35 = vmul.f32 -1.442695, %v3456_v0 }
 0x979   :  { %v3246_v20 = vpop.f32.mrf.mxu0  ;;  %v3287_v1 = vpop.f32.mrf.mxu1  ;;  %4273 = vpow2.f32 %v3767_v61 }
 0x97a   :  { %4275 = vpow2.f32 %v3766_v28 }
 0x985   :  { %v4272_v18 = vpop.eup %4271 }
 0x986   :  { %v4274_v49 = vpop.eup %4273  ;;  %v3492_v12 = vadd.f32 1.0, %v4272_v18 }
 0x987   :  { %v4276_v53 = vpop.eup %4275  ;;  %v3494_v4 = vadd.f32 1.0, %v4274_v49 }
 0x988   :  { %v3493_v5 = vadd.f32 1.0, %v4276_v53 }
 0x993   :  { %v3323_v26 = vpop.f32.mrf.mxu0  ;;  %v3364_v55 = vpop.f32.mrf.mxu1 }
 0x994   :  { %v3457_v59 = vadd.f32 %v3323_v26, %v3198_v8  ;;  %v3459_v30 = vadd.f32 %v3364_v55, %v3200_v58 }
 0x995   :  { %v3325_v39 = vpop.f32.mrf.mxu0  ;;  %v3366_v42 = vpop.f32.mrf.mxu1 }
 0x996   :  { %v3458_v44 = vadd.f32 %v3325_v39, %v3199_v19  ;;  %v3769_v51 = vmul.f32 -1.442695, %v3457_v59  ;;  %v3460_v21 = vadd.f32 %v3366_v42, %v3201_v3  ;;  %v3771_v45 = vmul.f32 -1.442695, %v3459_v30 }
 0x997   :  { %v3327_v9 = vpop.f32.mrf.mxu0  ;;  %v3368_v60 = vpop.f32.mrf.mxu1 }
 0x998   :  { %v3770_v32 = vmul.f32 -1.442695, %v3458_v44  ;;  %4277 = vpow2.f32 %v3769_v51  ;;  %v3772_v33 = vmul.f32 -1.442695, %v3460_v21 }
 0x999   :  { %v3328_v52 = vpop.f32.mrf.mxu0  ;;  %v3369_v23 = vpop.f32.mrf.mxu1  ;;  %4279 = vpow2.f32 %v3768_v35  ;;  %v3540_v35 = vld [vmem:[#allocation7 + $0xb8] sm:$0xff] }
 0x99a   :  { %4281 = vpow2.f32 %v3770_v32  ;;  %v3538_v52 = vld [vmem:[#allocation7 + $0xa8] sm:$0xff]  ;;  %v3539_v23 = vld [vmem:[#allocation7 + $0xb0] sm:$0xff] }
 0x99b   :  { %4283 = vrcp.f32 %v3492_v12 }
 0x99c   :  { %4285 = vrcp.f32 %v3494_v4 }
 0x99d   :  { %4287 = vrcp.f32 %v3493_v5 }
 0x99e   :  { %4289 = vpow2.f32 %v3771_v45 }
 0x99f   :  { %4291 = vpow2.f32 %v3772_v33 }
 0x9a5   :  { %v4278_v14 = vpop.eup %4277 }
 0x9a6   :  { %v4280_v37 = vpop.eup %4279  ;;  %v3496_v2 = vadd.f32 1.0, %v4278_v14 }
 0x9a7   :  { %v4282_v43 = vpop.eup %4281  ;;  %v3495_v6 = vadd.f32 1.0, %v4280_v37 }
 0x9a8   :  { %v3497_v47 = vadd.f32 1.0, %v4282_v43  ;;  %4293 = vrcp.f32 %v3496_v2  ;;  %v4284_v20 = vpop.eup %4283 }
 0x9a9   :  { %4295 = vrcp.f32 %v3495_v6  ;;  %v4286_v1 = vpop.eup %4285 }
 0x9aa   :  { %v4288_v62 = vpop.eup %4287 }
 0x9ab   :  { %v4290_v54 = vpop.eup %4289 }
 0x9ac   :  { %v4292_v56 = vpop.eup %4291  ;;  %v3498_v11 = vadd.f32 1.0, %v4290_v54 }
 0x9ad   :  { %v3499_v8 = vadd.f32 1.0, %v4292_v56 }
 0x9b3   :  { %v3405_v31 = vpop.f32.mrf.mxu0  ;;  %v3446_v48 = vpop.f32.mrf.mxu1 }
 0x9b4   :  { %v3461_v25 = vadd.f32 %v3405_v31, %v3202_v34  ;;  %v3463_v50 = vadd.f32 %v3446_v48, %v3204_v46 }
 0x9b5   :  { %v3407_v13 = vpop.f32.mrf.mxu0  ;;  %v3448_v22 = vpop.f32.mrf.mxu1 }
 0x9b6   :  { %v3773_v29 = vmul.f32 -1.442695, %v3461_v25  ;;  %4297 = vtanh.f32 %v3463_v50  ;;  %v3462_v7 = vadd.f32 %v3407_v13, %v3203_v24  ;;  %v3464_v40 = vadd.f32 %v3448_v22, %v3205_v27  ;;  %v4294_v10 = vpop.eup %4293 }
 0x9b7   :  { %4299 = vrcp.f32 %v3497_v47  ;;  %v3409_v15 = vpop.f32.mrf.mxu0  ;;  %v3450_v16 = vpop.f32.mrf.mxu1  ;;  %v3523_v39 = vmul.f32 %v4294_v10, %v6165_v17 }
 0x9b8   :  { %4301 = vpow2.f32 %v3773_v29  ;;  %v4296_v26 = vpop.eup %4295 }
 0x9b9   :  { %4303 = vtanh.f32 %v3462_v7  ;;  %v3410_v63 = vpop.f32.mrf.mxu0  ;;  %v3451_v57 = vpop.f32.mrf.mxu1  ;;  %v3522_v59 = vmul.f32 %v4296_v26, %v6165_v17 }
 0x9ba   :  { %4305 = vtanh.f32 %v3464_v40 }
 0x9bb   :  { %4307 = vrcp.f32 %v3498_v11 }
 0x9bc   :  { %4309 = vrcp.f32 %v3499_v8 }
 0x9c3   :  { %v4298_v55 = vpop.eup %4297 }
 0x9c4   :  { %v4300_v38 = vpop.eup %4299  ;;  %v3526_v42 = vmul.f32 %v4298_v55, %v4288_v62 }
 0x9c5   :  { %v4302_v36 = vpop.eup %4301  ;;  %v3524_v28 = vmul.f32 %v4300_v38, %v6165_v17 }
 0x9c6   :  { %v4304_v41 = vpop.eup %4303  ;;  %v3500_v9 = vadd.f32 1.0, %v4302_v36  ;;  %v3529_v60 = vadd.f32 %v3526_v42, %v3523_v39 }
 0x9c7   :  { %v4306_v61 = vpop.eup %4305  ;;  %v3525_v19 = vmul.f32 %v4304_v41, %v4284_v20 }
 0x9c8   :  { %v3527_v0 = vmul.f32 %v4306_v61, %v4286_v1  ;;  %4311 = vtanh.f32 %v3529_v60  ;;  %v3545_v58 = vmul.f32 %v3539_v23, %v3529_v60  ;;  %v4308_v53 = vpop.eup %4307 }
 0x9c9   :  { %v3528_v44 = vadd.f32 %v3525_v19, %v3522_v59  ;;  %4313 = vrcp.f32 %v3500_v9  ;;  %v4310_v30 = vpop.eup %4309 }
 0x9ca   :  { %v3530_v51 = vadd.f32 %v3527_v0, %v3524_v28 }
 0x9cb   :  { %4315 = vtanh.f32 %v3528_v44  ;;  %v3544_v32 = vmul.f32 %v3538_v52, %v3528_v44 }
 0x9cc   :  { %4317 = vtanh.f32 %v3530_v51  ;;  %v3546_v18 = vmul.f32 %v3540_v35, %v3530_v51 }
 0x9cd   :  { %v3548_v3 = vadd.f32 %v3545_v58, %v3544_v32 }
 0x9cf   :  { %v3550_v49 = vadd.f32 %v3548_v3, %v3546_v18 }
 0x9d1   :  { %3559 = vst [vmem:[#allocation16] sm:$0xff] %v3550_v49 }
 0x9d5   :  { %v4312_v12 = vpop.eup %4311 }
 0x9d6   :  { %v4314_v17 = vpop.eup %4313  ;;  %v3535_v21 = vmul.f32 %v4312_v12, %v4310_v30 }
 0x9d8   :  { %v4316_v4 = vpop.eup %4315  ;;  %v3542_v33 = vmul.f32 %v3539_v23, %v3535_v21 }
 0x9d9   :  { %v4318_v14 = vpop.eup %4317  ;;  %v3534_v5 = vmul.f32 %v4316_v4, %v4308_v53 }
 0x9da   :  { %v3536_v37 = vmul.f32 %v4318_v14, %v4314_v17 }
 0x9db   :  { %v3541_v45 = vmul.f32 %v3538_v52, %v3534_v5 }
 0x9dc   :  { %v3543_v43 = vmul.f32 %v3540_v35, %v3536_v37 }
 0x9dd   :  { %v3547_v2 = vadd.f32 %v3542_v33, %v3541_v45 }
 0x9df   :  { %v3549_v6 = vadd.f32 %v3547_v2, %v3543_v43 }
 0x9e1   :  { %3552 = vst [vmem:[#allocation13 + $0x38] sm:$0xff] %v3549_v6  ;;  %3558 = vst [vmem:[#allocation14] sm:$0xff] %v3549_v6 }
 0x9e2   :  { %4622 = shalt.err (!%p4619_p1)
}
 0x9e3   :  { %3581 = dma.vmem_to_hbm [thread:$0]  %s3579_s4, 128, %s6259_s6, [#allocation15]  }
 0x9e4   :  { %s4631_s13 = scalar_lea.vmem %s3566_s30, 1024  ;;  %p4636_p3 = scmp.lt.s32.totalorder %s3566_s30, %s3566_s30 }
 0x9e5   :  { %p4632_p2 = scmp.ne.s32.totalorder %s3566_s30, %s4631_s13  ;;  %p4637_p4 = scmp.lt.s32.totalorder %s4631_s13, %s4631_s13 }
 0x9e7   :  { %p4638_p5 = por %p4637_p4, %p4636_p3 }
 0x9e9   :  { %p4639_p6 = pnand %p4638_p5, %p4632_p2 }
 0x9eb   :  { %4642 = shalt.err (!%p4639_p6)
}
 0x9ec   :  { %s4696_s14 = smov 128   ;;  %s4697_s15 = smov 8  }
 0x9ed   :  { %3571 = dma.vmem_to_hbm [thread:$0]  %s3566_s30, 1024, %s6258_s5, [#allocation6], %s4696_s14, %s4696_s14, %s4697_s15  }
 0x9ee   :  { %s4651_s17 = scalar_lea.vmem %s3589_s9, 128  ;;  %p4656_p8 = scmp.lt.s32.totalorder %s3589_s9, %s3589_s9 }
 0x9ef   :  { %p4652_p7 = scmp.ne.s32.totalorder %s3589_s9, %s4651_s17  ;;  %p4657_p9 = scmp.lt.s32.totalorder %s4651_s17, %s4651_s17 }
 0x9f1   :  { %p4658_p10 = por %p4657_p9, %p4656_p8 }
 0x9f3   :  { %p4659_p11 = pnand %p4658_p10, %p4652_p7 }
 0x9f5   :  { %4662 = shalt.err (!%p4659_p11)
}
 0x9f6   :  { %3591 = dma.vmem_to_hbm [thread:$0]  %s3589_s9, 128, %s6260_s7, [#allocation15]  }
 0x9f7   :  { %4677 = dma.done.wait [#allocation6], 1024  }
 0x9f8   :  { %4678 = vsyncadd [#allocation6], 4294966272 }
 0x9f9   :  { %4679 = dma.done.wait [#allocation15], 256  }
 0x9fa   :  { %4680 = vsyncadd [#allocation15], 4294967040 }
 0x9fb   :  { %3601 = vsyncpa [#allocation5], 1 }
 0x9fc   :  { %3602 = vsyncpa [#allocation8], 1 }
 0x9fd   :  { %3603 = vsyncpa [#allocation11], 1 }
 0x9fe   :  { %3604 = vsyncpa [#allocation6], 1 }
 0x9ff   :  { %3605 = vsyncpa [#allocation15], 1 }

</bundles_post_ra>
